<compile_context>
chip_gen: v6e
topology: v6e:2x2x1
jax: 0.10.0
libtpu: 0.0.40
codegen_flags: <defaults>
</compile_context>

<pallas_src>
import jax
import jax.numpy as jnp
from jax.experimental import pallas as pl
from jax.experimental.pallas import tpu as pltpu

P = 128           # lane-segment width
IN_SEGS = 2       # [hid|obs|act] , [eps_enc|eps_post]
OUT_SEGS = 7      # prior_mu | prior_lv | post_mu | post_lv | z | next_h | obs_dec


# ----------------------------------------------------------------------------
# Kernel: whole RSSM step.  Every slice is 128-lane aligned; matmuls run in the
# weight dtype (bf16 or f32) with f32 accumulation; elementwise math is f32.
# ----------------------------------------------------------------------------
def _rssm_kernel(x_ref,
                 ew0, eb0, ew1, eb1, ew2, eb2,      # encoder
                 pw0, pb0, pw1, pb1,                # prior   (K=256 fused layer 0)
                 qw0, qb0, qw1, qb1,                # posterior
                 dw0, db0, dw1, db1, dw2, db2,      # decoder (K=256 fused layer 0)
                 wih, bih, whh, bhh,                # GRUCell (K=256 fused ih)
                 out_ref):
    f32 = jnp.float32
    mmd = ew0.dtype                                  # MXU operand dtype
    od = out_ref.dtype

    x = x_ref[...]
    x_f32 = x.astype(f32)
    seg0_f = x_f32[:, 0 * P:1 * P]                   # [hid|obs|act] (f32, blend)
    eps_f = x_f32[:, 1 * P:2 * P]                    # [eps_enc|eps_post]
    seg0_m = x[:, 0 * P:1 * P].astype(mmd)           # cast ONCE, reused 5x

    def mm(a, w_ref, b_ref):
        return jnp.dot(a, w_ref[...], preferred_element_type=f32) + b_ref[...]

    relu = lambda v: jnp.maximum(v, 0.0)

    # ---------------- encoder (obs rows placed at obs' lane offset) ----------
    e1 = relu(mm(seg0_m, ew0, eb0)).astype(mmd)
    e2 = relu(mm(e1, ew1, eb1)).astype(mmd)
    q = mm(e2, ew2, eb2)                             # [mean@0..z | logvar@0..z]
    z_enc = q[:, :P] + eps_f * jnp.exp(0.5 * q[:, P:])   # real at lanes 0..z
    z_enc_m = z_enc.astype(mmd)

    # ---------------- prior: K=256 fused over [seg0 | z_enc] -----------------
    p1 = relu(mm(jnp.concatenate([seg0_m, z_enc_m], axis=1), pw0, pb0)).astype(mmd)
    prior = mm(p1, pw1, pb1)                         # [chunk0@0..half | chunk1@0..half]

    # ---------------- posterior: seg0 already == cat([h, obs, act]) ----------
    s1 = relu(mm(seg0_m, qw0, qb0)).astype(mmd)
    post = mm(s1, qw1, qb1)                          # [mean@z..2z | logvar@z..2z]
    z = post[:, :P] + eps_f * jnp.exp(0.5 * post[:, P:])  # real at lanes z..2z
    z_m = z.astype(mmd)

    # ---------------- GRU transition: ih K=256 fused over [z | seg0] ---------
    gi = mm(jnp.concatenate([z_m, seg0_m], axis=1), wih, bih)   # (B, 3*128) r|u|n
    gh = mm(seg0_m, whh, bhh)
    r = jax.nn.sigmoid(gi[:, 0 * P:1 * P] + gh[:, 0 * P:1 * P])
    u = jax.nn.sigmoid(gi[:, 1 * P:2 * P] + gh[:, 1 * P:2 * P])
    n = jnp.tanh(gi[:, 2 * P:3 * P] + r * gh[:, 2 * P:3 * P])
    # hid sits at lanes 0..h of seg0; lanes beyond h produce harmless garbage
    # (all downstream weight rows there are zero; wrapper reads real lanes only).
    next_h = (1.0 - u) * n + u * seg0_f
    next_h_m = next_h.astype(mmd)

    # ---------------- decoder: K=256 fused over [next_h | z] -----------------
    d1 = relu(mm(jnp.concatenate([next_h_m, z_m], axis=1), dw0, db0)).astype(mmd)
    d2 = relu(mm(d1, dw1, db1)).astype(mmd)
    dec = mm(d2, dw2, db2)

    # lane-dense packed output slab (all stores 128-aligned, unmasked)
    out_ref[:, 0 * P:2 * P] = prior.astype(od)
    out_ref[:, 2 * P:4 * P] = post.astype(od)
    out_ref[:, 4 * P:5 * P] = z.astype(od)
    out_ref[:, 5 * P:6 * P] = next_h.astype(od)
    out_ref[:, 6 * P:7 * P] = dec.astype(od)


# ----------------------------------------------------------------------------
# Wrapper-side weight re-layout (free XLA work, done once per call).
# ----------------------------------------------------------------------------
def _place(shape, pieces, dtype):
    """Dense zero block of `shape`; pieces = [(row_off, col_off, array), ...]."""
    out = jnp.zeros(shape, jnp.float32)
    for (r, c, a) in pieces:
        out = out.at[r:r + a.shape[0], c:c + a.shape[1]].set(a.astype(jnp.float32))
    return out.astype(dtype)


def prepare_params(raw, *, obs_dim, act_dim, z_dim, h_dim, w_dtype=jnp.bfloat16):
    (ew0, eb0, ew1, eb1, ew2, eb2,
     pw0, pb0, pw1, pb1,
     qw0, qb0, qw1, qb1,
     dw0, db0, dw1, db1, dw2, db2,
     wih, bih, whh, bhh) = raw
    f32 = jnp.float32
    Hm = ew0.shape[1]                       # MLP hidden width (256)
    assert Hm % P == 0
    half = (h_dim + z_dim) // 2
    obs_off = h_dim                         # lane offsets inside seg0 = [hid|obs|act]
    act_off = h_dim + obs_dim

    def gate_block(w):                      # (rows, 3*h) -> (rows, 3*P), r|u|n blocks
        return jnp.concatenate(
            [jnp.pad(w[:, g * h_dim:(g + 1) * h_dim], ((0, 0), (0, P - h_dim)))
             for g in range(3)], axis=1)

    W = lambda a: a.astype(w_dtype)
    Bv = lambda a: a.astype(f32)

    # encoder: obs rows placed at obs' lane offset; outputs [mean@0..z | lv@0..z]
    enc0 = _place((P, Hm), [(obs_off, 0, ew0)], w_dtype)
    enc2 = _place((Hm, 2 * P), [(0, 0, ew2[:, :z_dim]), (0, P, ew2[:, z_dim:2 * z_dim])], w_dtype)
    enc2b = _place((1, 2 * P), [(0, 0, eb2[:, :z_dim]), (0, P, eb2[:, z_dim:2 * z_dim])], f32)
    # prior layer0 fused over [seg0 | z_enc]; output torch.chunk halves @0..half
    pri0 = _place((2 * P, Hm), [(0, 0, pw0[:h_dim]), (P, 0, pw0[h_dim:h_dim + z_dim])], w_dtype)
    pri1 = _place((Hm, 2 * P), [(0, 0, pw1[:, :half]), (0, P, pw1[:, half:half * 2])], w_dtype)
    pri1b = _place((1, 2 * P), [(0, 0, pb1[:, :half]), (0, P, pb1[:, half:half * 2])], f32)
    # posterior: seg0 order already matches cat([h, obs, act]); mean/lv @ lanes z..2z
    post0 = _place((P, Hm), [(0, 0, qw0)], w_dtype)
    post1 = _place((Hm, 2 * P), [(0, z_dim, qw1[:, :z_dim]),
                                 (0, P + z_dim, qw1[:, z_dim:2 * z_dim])], w_dtype)
    post1b = _place((1, 2 * P), [(0, z_dim, qb1[:, :z_dim]),
                                 (0, P + z_dim, qb1[:, z_dim:2 * z_dim])], f32)
    # decoder layer0 fused over [next_h | z(@z..2z)]
    dec0 = _place((2 * P, Hm), [(0, 0, dw0[:h_dim]),
                                (P + z_dim, 0, dw0[h_dim:h_dim + z_dim])], w_dtype)
    dec2 = _place((Hm, P), [(0, 0, dw2)], w_dtype)
    dec2b = _place((1, P), [(0, 0, db2)], f32)
    # GRU: ih fused over [z(@z..2z) | seg0(act@act_off)], hh over seg0(hid@0); gate-blocked
    gih = _place((2 * P, 3 * P), [(z_dim, 0, gate_block(wih[:z_dim])),
                                  (P + act_off, 0, gate_block(wih[z_dim:z_dim + act_dim]))], w_dtype)
    gihb = _place((1, 3 * P), [(0, 0, gate_block(bih))], f32)
    ghh = _place((P, 3 * P), [(0, 0, gate_block(whh))], w_dtype)
    ghhb = _place((1, 3 * P), [(0, 0, gate_block(bhh))], f32)

    return (enc0, Bv(eb0), W(ew1), Bv(eb1), enc2, enc2b,
            pri0, Bv(pb0), pri1, pri1b,
            post0, Bv(qb0), post1, post1b,
            dec0, Bv(db0), W(dw1), Bv(db1), dec2, dec2b,
            gih, gihb, ghh, ghhb)


def _pack_inputs(obs, act, hidden, eps_enc, eps_post, io_dtype):
    seg0 = jnp.concatenate([hidden, obs, act], axis=1)
    seg0 = jnp.pad(seg0, ((0, 0), (0, P - seg0.shape[1])))
    eps = jnp.concatenate([eps_enc, eps_post], axis=1)
    eps = jnp.pad(eps, ((0, 0), (0, P - eps.shape[1])))
    return jnp.concatenate([seg0, eps], axis=1).astype(io_dtype)


def _unpack_outputs(slab, *, B, z_dim, h_dim, obs_dim):
    slab = slab[:B]
    half = (h_dim + z_dim) // 2
    prior_mean   = slab[:, 0 * P:0 * P + half]
    prior_logvar = slab[:, 1 * P:1 * P + half]
    post_mean    = slab[:, 2 * P + z_dim:2 * P + 2 * z_dim]
    post_logvar  = slab[:, 3 * P + z_dim:3 * P + 2 * z_dim]
    z            = slab[:, 4 * P + z_dim:4 * P + 2 * z_dim]
    next_h       = slab[:, 5 * P:5 * P + h_dim]
    obs_dec      = slab[:, 6 * P:6 * P + obs_dim]
    return prior_mean, prior_logvar, post_mean, post_logvar, z, next_h, obs_dec


def _pick_batch_tile(B, batch_tile):
    """Return (tile, padded_batch).  Tile is always a multiple of 8."""
    if batch_tile is not None:
        tb = int(batch_tile)
        assert tb > 0 and tb % 8 == 0, "batch_tile must be a positive multiple of 8"
        return tb, pl.cdiv(B, tb) * tb
    b8 = ((B + 7) // 8) * 8
    if b8 <= 128:
        return b8, b8
    # largest tile in [128, 512] dividing the 8-padded batch with >=2 grid steps
    # (double-buffer overlap; lets v7x shard the "parallel" axis over its 2 TCs)
    for tb in range(512, 127, -8):
        if b8 % tb == 0 and b8 // tb >= 2:
            return tb, b8
    tb = 256 if b8 >= 512 else 128
    return tb, pl.cdiv(B, tb) * tb


# ----------------------------------------------------------------------------
# Wrapper: one pallas_call over a batch-tiled grid.
# ----------------------------------------------------------------------------
def rssm_forward(obs, act, hidden, eps_enc, eps_post, raw_params, *,
                 z_dim, h_dim, batch_tile=None,
                 param_dtype=jnp.bfloat16, io_dtype=None, out_dtype=jnp.float32):
    B, obs_dim = obs.shape
    act_dim = act.shape[1]
    assert (h_dim + z_dim) % 2 == 0, "torch.chunk halves need even h_dim+z_dim"
    for d in (h_dim + obs_dim + act_dim, 2 * z_dim, (h_dim + z_dim) // 2,
              obs_dim, h_dim):
        assert d <= P, "feature segment wider than one 128-lane block"
    if io_dtype is None:
        io_dtype = param_dtype

    tb, Bp = _pick_batch_tile(B, batch_tile)
    grid = (Bp // tb,)

    x = _pack_inputs(obs, act, hidden, eps_enc, eps_post, io_dtype)   # (B, 2*128)
    if Bp != B:
        x = jnp.pad(x, ((0, Bp - B), (0, 0)))
    kparams = prepare_params(raw_params, obs_dim=obs_dim, act_dim=act_dim,
                             z_dim=z_dim, h_dim=h_dim, w_dtype=param_dtype)

    in_specs = ([pl.BlockSpec((tb, IN_SEGS * P), lambda i: (i, 0))] +
                [pl.BlockSpec(p.shape, lambda i: (0, 0)) for p in kparams])
    out_spec = pl.BlockSpec((tb, OUT_SEGS * P), lambda i: (i, 0))
    out_shape = jax.ShapeDtypeStruct((Bp, OUT_SEGS * P), out_dtype)

    # Advisory cost from the RAW (un-padded) layer dims.
    Hm = 256
    raw_dims = [(obs_dim, Hm), (Hm, Hm), (Hm, 2 * z_dim),
                (h_dim + z_dim, Hm), (Hm, h_dim + z_dim),
                (h_dim + obs_dim + act_dim, Hm), (Hm, h_dim + 2 * z_dim),
                (h_dim + z_dim, Hm), (Hm, Hm), (Hm, obs_dim),
                (z_dim + act_dim, 3 * h_dim), (h_dim, 3 * h_dim)]
    flops = int(2 * B * sum(a * b for a, b in raw_dims))
    bytes_accessed = int(x.nbytes + Bp * OUT_SEGS * P * jnp.dtype(out_dtype).itemsize +
                         sum(int(p.nbytes) for p in kparams))
    cost = pl.CostEstimate(flops=flops,
                           transcendentals=int(B * (2 * z_dim + 3 * h_dim)),
                           bytes_accessed=bytes_accessed)

    slab = pl.pallas_call(
        _rssm_kernel,
        out_shape=out_shape,
        grid_spec=pltpu.PrefetchScalarGridSpec(
            num_scalar_prefetch=0,
            grid=grid,
            in_specs=in_specs,
            out_specs=out_spec),
        compiler_params=pltpu.CompilerParams(
            # independent batch tiles -> shard across v7x's 2 TensorCores
            dimension_semantics=("parallel",)),
        cost_estimate=cost,
    )(x, *kparams)

    return _unpack_outputs(slab, B=B, z_dim=z_dim, h_dim=h_dim, obs_dim=obs_dim)


# ----------------------------------------------------------------------------
# Deterministic parameter init (PyTorch-style uniform(-1/sqrt(fan_in), ..)).
# Raw weights stored as [in, out]; biases as [1, out].
# ----------------------------------------------------------------------------
def init_params(key, obs_dim, act_dim, z_dim, h_dim):
    def linear(k, din, dout):
        k1, k2 = jax.random.split(k)
        lim = 1.0 / float(din) ** 0.5
        w = jax.random.uniform(k1, (din, dout), jnp.float32, -lim, lim)
        b = jax.random.uniform(k2, (1, dout), jnp.float32, -lim, lim)
        return w, b

    keys = jax.random.split(key, 12)
    params = []
    params += linear(keys[0], obs_dim, 256)                      # encoder
    params += linear(keys[1], 256, 256)
    params += linear(keys[2], 256, 2 * z_dim)
    params += linear(keys[3], h_dim + z_dim, 256)                 # prior
    params += linear(keys[4], 256, h_dim + z_dim)
    params += linear(keys[5], h_dim + obs_dim + act_dim, 256)     # posterior
    params += linear(keys[6], 256, h_dim + 2 * z_dim)
    params += linear(keys[7], h_dim + z_dim, 256)                 # decoder
    params += linear(keys[8], 256, 256)
    params += linear(keys[9], 256, obs_dim)
    lim = 1.0 / float(h_dim) ** 0.5                               # GRUCell
    kih, kbih, khh, kbhh = jax.random.split(keys[10], 4)
    params.append(jax.random.uniform(kih, (z_dim + act_dim, 3 * h_dim), jnp.float32, -lim, lim))
    params.append(jax.random.uniform(kbih, (1, 3 * h_dim), jnp.float32, -lim, lim))
    params.append(jax.random.uniform(khh, (h_dim, 3 * h_dim), jnp.float32, -lim, lim))
    params.append(jax.random.uniform(kbhh, (1, 3 * h_dim), jnp.float32, -lim, lim))
    return tuple(params)


# ----------------------------------------------------------------------------
# Pure-JAX reference (same math, raw un-padded params).
# ----------------------------------------------------------------------------
def rssm_reference(obs, act, hid, eps_enc, eps_post, params, *, z_dim, h_dim):
    (ew0, eb0, ew1, eb1, ew2, eb2,
     pw0, pb0, pw1, pb1,
     qw0, qb0, qw1, qb1,
     dw0, db0, dw1, db1, dw2, db2,
     wih, bih, whh, bhh) = params
    relu = lambda x: jnp.maximum(x, 0.0)

    q = relu(relu(obs @ ew0 + eb0) @ ew1 + eb1) @ ew2 + eb2
    z_enc = q[:, :z_dim] + eps_enc * jnp.exp(0.5 * q[:, z_dim:])

    pout = relu(jnp.concatenate([hid, z_enc], axis=-1) @ pw0 + pb0) @ pw1 + pb1
    half = (h_dim + z_dim) // 2
    prior_mean, prior_logvar = pout[:, :half], pout[:, half:]

    qout = relu(jnp.concatenate([hid, obs, act], axis=-1) @ qw0 + qb0) @ qw1 + qb1
    post_mean, post_logvar = qout[:, :z_dim], qout[:, z_dim:2 * z_dim]
    z = post_mean + eps_post * jnp.exp(0.5 * post_logvar)

    gi = jnp.concatenate([z, act], axis=-1) @ wih + bih
    gh = hid @ whh + bhh
    r = jax.nn.sigmoid(gi[:, :h_dim] + gh[:, :h_dim])
    u = jax.nn.sigmoid(gi[:, h_dim:2 * h_dim] + gh[:, h_dim:2 * h_dim])
    n = jnp.tanh(gi[:, 2 * h_dim:] + r * gh[:, 2 * h_dim:])
    next_h = (1.0 - u) * n + u * hid

    din = jnp.concatenate([next_h, z], axis=-1)
    obs_dec = relu(relu(din @ dw0 + db0) @ dw1 + db1) @ dw2 + db2
    return (prior_mean, prior_logvar, post_mean, post_logvar, z, next_h, obs_dec)


if __name__ == "__main__":
    obs_dim, act_dim, z_dim, h_dim = 16, 4, 8, 16
    key = jax.random.PRNGKey(0)
    kp, kd = jax.random.split(key)
    raw_params = init_params(kp, obs_dim, act_dim, z_dim, h_dim)

    def make_inputs(k, B):
        ko, ka, kh, ke1, ke2 = jax.random.split(k, 5)
        return (jax.random.normal(ko, (B, obs_dim), jnp.float32),
                jax.random.normal(ka, (B, act_dim), jnp.float32),
                jax.random.normal(kh, (B, h_dim), jnp.float32),
                # torch.randn_like reparameterization noise, generated host-side
                jax.random.normal(ke1, (B, z_dim), jnp.float32),
                jax.random.normal(ke2, (B, z_dim), jnp.float32))

    # --- small batch, f32 end-to-end (tight correctness check) ---------------
    inputs = make_inputs(jax.random.fold_in(kd, 0), 8)
    refs = rssm_reference(*inputs, raw_params, z_dim=z_dim, h_dim=h_dim)
    outs = rssm_forward(*inputs, raw_params, z_dim=z_dim, h_dim=h_dim,
                        param_dtype=jnp.float32)
    outs = jax.block_until_ready(outs)
    for o, r in zip(outs, refs):
        assert o.shape == r.shape and o.dtype == r.dtype
        assert jnp.allclose(o, r, atol=5e-4, rtol=5e-4)

    # --- ragged batch (padding) + multi-step grid, f32 -----------------------
    inputs = make_inputs(jax.random.fold_in(kd, 1), 200)
    refs = rssm_reference(*inputs, raw_params, z_dim=z_dim, h_dim=h_dim)
    outs = rssm_forward(*inputs, raw_params, z_dim=z_dim, h_dim=h_dim,
                        param_dtype=jnp.float32, batch_tile=64)   # grid=(4,)
    outs = jax.block_until_ready(outs)
    for o, r in zip(outs, refs):
        assert o.shape == r.shape
        assert jnp.allclose(o, r, atol=5e-4, rtol=5e-4)

    # --- default fast path: bf16 weights + bf16 input slab, f32 outputs ------
    inputs = make_inputs(jax.random.fold_in(kd, 2), 8)
    refs = rssm_reference(*inputs, raw_params, z_dim=z_dim, h_dim=h_dim)
    outs = rssm_forward(*inputs, raw_params, z_dim=z_dim, h_dim=h_dim)
    outs = jax.block_until_ready(outs)
    for o, r in zip(outs, refs):
        assert o.shape == r.shape
        assert jnp.allclose(jnp.asarray(o, jnp.float32), r, atol=1e-1, rtol=1e-1)

    print("KERNEL_OK")
</pallas_src>

<mosaic_0001>
module attributes {stable_mosaic.version = 11 : i64} {
  func.func @_rssm_kernel(%arg0: i32, %arg1: memref<8x256xf32, #tpu.memory_space<vmem>>, %arg2: memref<128x256xf32, #tpu.memory_space<vmem>>, %arg3: memref<1x256xf32, #tpu.memory_space<vmem>>, %arg4: memref<256x256xf32, #tpu.memory_space<vmem>>, %arg5: memref<1x256xf32, #tpu.memory_space<vmem>>, %arg6: memref<256x256xf32, #tpu.memory_space<vmem>>, %arg7: memref<1x256xf32, #tpu.memory_space<vmem>>, %arg8: memref<256x256xf32, #tpu.memory_space<vmem>>, %arg9: memref<1x256xf32, #tpu.memory_space<vmem>>, %arg10: memref<256x256xf32, #tpu.memory_space<vmem>>, %arg11: memref<1x256xf32, #tpu.memory_space<vmem>>, %arg12: memref<128x256xf32, #tpu.memory_space<vmem>>, %arg13: memref<1x256xf32, #tpu.memory_space<vmem>>, %arg14: memref<256x256xf32, #tpu.memory_space<vmem>>, %arg15: memref<1x256xf32, #tpu.memory_space<vmem>>, %arg16: memref<256x256xf32, #tpu.memory_space<vmem>>, %arg17: memref<1x256xf32, #tpu.memory_space<vmem>>, %arg18: memref<256x256xf32, #tpu.memory_space<vmem>>, %arg19: memref<1x256xf32, #tpu.memory_space<vmem>>, %arg20: memref<256x128xf32, #tpu.memory_space<vmem>>, %arg21: memref<1x128xf32, #tpu.memory_space<vmem>>, %arg22: memref<256x384xf32, #tpu.memory_space<vmem>>, %arg23: memref<1x384xf32, #tpu.memory_space<vmem>>, %arg24: memref<128x384xf32, #tpu.memory_space<vmem>>, %arg25: memref<1x384xf32, #tpu.memory_space<vmem>>, %arg26: memref<8x896xf32, #tpu.memory_space<vmem>>) attributes {dimension_semantics = [#tpu.dimension_semantics<parallel>], iteration_bounds = array<i64: 1>, scalar_prefetch = 0 : i64, scratch_operands = 0 : i64, tpu.core_type = #tpu.core_type<tc>, window_params = [{transform_indices = @transform_0, window_bounds = array<i64: 8, 256>}, {pipeline_mode = #tpu.pipeline_mode<synchronous>, transform_indices = @transform_1, window_bounds = array<i64: 128, 256>}, {pipeline_mode = #tpu.pipeline_mode<synchronous>, transform_indices = @transform_2, window_bounds = array<i64: 1, 256>}, {pipeline_mode = #tpu.pipeline_mode<synchronous>, transform_indices = @transform_3, window_bounds = array<i64: 256, 256>}, {pipeline_mode = #tpu.pipeline_mode<synchronous>, transform_indices = @transform_4, window_bounds = array<i64: 1, 256>}, {pipeline_mode = #tpu.pipeline_mode<synchronous>, transform_indices = @transform_5, window_bounds = array<i64: 256, 256>}, {pipeline_mode = #tpu.pipeline_mode<synchronous>, transform_indices = @transform_6, window_bounds = array<i64: 1, 256>}, {pipeline_mode = #tpu.pipeline_mode<synchronous>, transform_indices = @transform_7, window_bounds = array<i64: 256, 256>}, {pipeline_mode = #tpu.pipeline_mode<synchronous>, transform_indices = @transform_8, window_bounds = array<i64: 1, 256>}, {pipeline_mode = #tpu.pipeline_mode<synchronous>, transform_indices = @transform_9, window_bounds = array<i64: 256, 256>}, {pipeline_mode = #tpu.pipeline_mode<synchronous>, transform_indices = @transform_10, window_bounds = array<i64: 1, 256>}, {pipeline_mode = #tpu.pipeline_mode<synchronous>, transform_indices = @transform_11, window_bounds = array<i64: 128, 256>}, {pipeline_mode = #tpu.pipeline_mode<synchronous>, transform_indices = @transform_12, window_bounds = array<i64: 1, 256>}, {pipeline_mode = #tpu.pipeline_mode<synchronous>, transform_indices = @transform_13, window_bounds = array<i64: 256, 256>}, {pipeline_mode = #tpu.pipeline_mode<synchronous>, transform_indices = @transform_14, window_bounds = array<i64: 1, 256>}, {pipeline_mode = #tpu.pipeline_mode<synchronous>, transform_indices = @transform_15, window_bounds = array<i64: 256, 256>}, {pipeline_mode = #tpu.pipeline_mode<synchronous>, transform_indices = @transform_16, window_bounds = array<i64: 1, 256>}, {pipeline_mode = #tpu.pipeline_mode<synchronous>, transform_indices = @transform_17, window_bounds = array<i64: 256, 256>}, {pipeline_mode = #tpu.pipeline_mode<synchronous>, transform_indices = @transform_18, window_bounds = array<i64: 1, 256>}, {pipeline_mode = #tpu.pipeline_mode<synchronous>, transform_indices = @transform_19, window_bounds = array<i64: 256, 128>}, {pipeline_mode = #tpu.pipeline_mode<synchronous>, transform_indices = @transform_20, window_bounds = array<i64: 1, 128>}, {pipeline_mode = #tpu.pipeline_mode<synchronous>, transform_indices = @transform_21, window_bounds = array<i64: 256, 384>}, {pipeline_mode = #tpu.pipeline_mode<synchronous>, transform_indices = @transform_22, window_bounds = array<i64: 1, 384>}, {pipeline_mode = #tpu.pipeline_mode<synchronous>, transform_indices = @transform_23, window_bounds = array<i64: 128, 384>}, {pipeline_mode = #tpu.pipeline_mode<synchronous>, transform_indices = @transform_24, window_bounds = array<i64: 1, 384>}, {transform_indices = @transform_25, window_bounds = array<i64: 8, 896>}]} {
    %c0 = arith.constant 0 : index
    %c0_0 = arith.constant 0 : index
    %0 = vector.load %arg1[%c0, %c0_0] : memref<8x256xf32, #tpu.memory_space<vmem>>, vector<8x256xf32>
    %1 = vector.extract_strided_slice %0 {offsets = [0, 0], sizes = [8, 128], strides = [1, 1]} : vector<8x256xf32> to vector<8x128xf32>
    %2 = vector.extract_strided_slice %0 {offsets = [0, 128], sizes = [8, 128], strides = [1, 1]} : vector<8x256xf32> to vector<8x128xf32>
    %3 = vector.extract_strided_slice %0 {offsets = [0, 0], sizes = [8, 128], strides = [1, 1]} : vector<8x256xf32> to vector<8x128xf32>
    %c0_1 = arith.constant 0 : index
    %c0_2 = arith.constant 0 : index
    %4 = vector.load %arg2[%c0_1, %c0_2] : memref<128x256xf32, #tpu.memory_space<vmem>>, vector<128x256xf32>
    %cst = arith.constant dense<0.000000e+00> : vector<8x256xf32>
    %5 = tpu.matmul %3, %4, %cst {dimension_numbers = #tpu.dot_dimension_numbers<[1], [0], [0], [1], [0, 0, 1, 1], [], []>} : vector<8x128xf32>, vector<128x256xf32>, vector<8x256xf32> -> vector<8x256xf32>
    %c0_3 = arith.constant 0 : index
    %c0_4 = arith.constant 0 : index
    %6 = vector.load %arg3[%c0_3, %c0_4] : memref<1x256xf32, #tpu.memory_space<vmem>>, vector<1x256xf32>
    %7 = vector.broadcast %6 : vector<1x256xf32> to vector<8x256xf32>
    %8 = arith.addf %5, %7 : vector<8x256xf32>
    %cst_5 = arith.constant 0.000000e+00 : f32
    %9 = vector.broadcast %cst_5 : f32 to vector<8x256xf32>
    %10 = arith.maximumf %8, %9 : vector<8x256xf32>
    %c0_6 = arith.constant 0 : index
    %c0_7 = arith.constant 0 : index
    %11 = vector.load %arg4[%c0_6, %c0_7] : memref<256x256xf32, #tpu.memory_space<vmem>>, vector<256x256xf32>
    %cst_8 = arith.constant dense<0.000000e+00> : vector<8x256xf32>
    %12 = tpu.matmul %10, %11, %cst_8 {dimension_numbers = #tpu.dot_dimension_numbers<[1], [0], [0], [1], [0, 0, 1, 1], [], []>} : vector<8x256xf32>, vector<256x256xf32>, vector<8x256xf32> -> vector<8x256xf32>
    %c0_9 = arith.constant 0 : index
    %c0_10 = arith.constant 0 : index
    %13 = vector.load %arg5[%c0_9, %c0_10] : memref<1x256xf32, #tpu.memory_space<vmem>>, vector<1x256xf32>
    %14 = vector.broadcast %13 : vector<1x256xf32> to vector<8x256xf32>
    %15 = arith.addf %12, %14 : vector<8x256xf32>
    %cst_11 = arith.constant 0.000000e+00 : f32
    %16 = vector.broadcast %cst_11 : f32 to vector<8x256xf32>
    %17 = arith.maximumf %15, %16 : vector<8x256xf32>
    %c0_12 = arith.constant 0 : index
    %c0_13 = arith.constant 0 : index
    %18 = vector.load %arg6[%c0_12, %c0_13] : memref<256x256xf32, #tpu.memory_space<vmem>>, vector<256x256xf32>
    %cst_14 = arith.constant dense<0.000000e+00> : vector<8x256xf32>
    %19 = tpu.matmul %17, %18, %cst_14 {dimension_numbers = #tpu.dot_dimension_numbers<[1], [0], [0], [1], [0, 0, 1, 1], [], []>} : vector<8x256xf32>, vector<256x256xf32>, vector<8x256xf32> -> vector<8x256xf32>
    %c0_15 = arith.constant 0 : index
    %c0_16 = arith.constant 0 : index
    %20 = vector.load %arg7[%c0_15, %c0_16] : memref<1x256xf32, #tpu.memory_space<vmem>>, vector<1x256xf32>
    %21 = vector.broadcast %20 : vector<1x256xf32> to vector<8x256xf32>
    %22 = arith.addf %19, %21 : vector<8x256xf32>
    %23 = vector.extract_strided_slice %22 {offsets = [0, 0], sizes = [8, 128], strides = [1, 1]} : vector<8x256xf32> to vector<8x128xf32>
    %24 = vector.extract_strided_slice %22 {offsets = [0, 128], sizes = [8, 128], strides = [1, 1]} : vector<8x256xf32> to vector<8x128xf32>
    %cst_17 = arith.constant 5.000000e-01 : f32
    %25 = vector.broadcast %cst_17 : f32 to vector<8x128xf32>
    %26 = arith.mulf %25, %24 : vector<8x128xf32>
    %27 = math.exp %26 : vector<8x128xf32>
    %28 = arith.mulf %2, %27 : vector<8x128xf32>
    %29 = arith.addf %23, %28 : vector<8x128xf32>
    %30 = tpu.concatenate %3, %29 in 1 : vector<8x128xf32>, vector<8x128xf32> -> vector<8x256xf32>
    %c0_18 = arith.constant 0 : index
    %c0_19 = arith.constant 0 : index
    %31 = vector.load %arg8[%c0_18, %c0_19] : memref<256x256xf32, #tpu.memory_space<vmem>>, vector<256x256xf32>
    %cst_20 = arith.constant dense<0.000000e+00> : vector<8x256xf32>
    %32 = tpu.matmul %30, %31, %cst_20 {dimension_numbers = #tpu.dot_dimension_numbers<[1], [0], [0], [1], [0, 0, 1, 1], [], []>} : vector<8x256xf32>, vector<256x256xf32>, vector<8x256xf32> -> vector<8x256xf32>
    %c0_21 = arith.constant 0 : index
    %c0_22 = arith.constant 0 : index
    %33 = vector.load %arg9[%c0_21, %c0_22] : memref<1x256xf32, #tpu.memory_space<vmem>>, vector<1x256xf32>
    %34 = vector.broadcast %33 : vector<1x256xf32> to vector<8x256xf32>
    %35 = arith.addf %32, %34 : vector<8x256xf32>
    %cst_23 = arith.constant 0.000000e+00 : f32
    %36 = vector.broadcast %cst_23 : f32 to vector<8x256xf32>
    %37 = arith.maximumf %35, %36 : vector<8x256xf32>
    %c0_24 = arith.constant 0 : index
    %c0_25 = arith.constant 0 : index
    %38 = vector.load %arg10[%c0_24, %c0_25] : memref<256x256xf32, #tpu.memory_space<vmem>>, vector<256x256xf32>
    %cst_26 = arith.constant dense<0.000000e+00> : vector<8x256xf32>
    %39 = tpu.matmul %37, %38, %cst_26 {dimension_numbers = #tpu.dot_dimension_numbers<[1], [0], [0], [1], [0, 0, 1, 1], [], []>} : vector<8x256xf32>, vector<256x256xf32>, vector<8x256xf32> -> vector<8x256xf32>
    %c0_27 = arith.constant 0 : index
    %c0_28 = arith.constant 0 : index
    %40 = vector.load %arg11[%c0_27, %c0_28] : memref<1x256xf32, #tpu.memory_space<vmem>>, vector<1x256xf32>
    %41 = vector.broadcast %40 : vector<1x256xf32> to vector<8x256xf32>
    %42 = arith.addf %39, %41 : vector<8x256xf32>
    %c0_29 = arith.constant 0 : index
    %c0_30 = arith.constant 0 : index
    %43 = vector.load %arg12[%c0_29, %c0_30] : memref<128x256xf32, #tpu.memory_space<vmem>>, vector<128x256xf32>
    %cst_31 = arith.constant dense<0.000000e+00> : vector<8x256xf32>
    %44 = tpu.matmul %3, %43, %cst_31 {dimension_numbers = #tpu.dot_dimension_numbers<[1], [0], [0], [1], [0, 0, 1, 1], [], []>} : vector<8x128xf32>, vector<128x256xf32>, vector<8x256xf32> -> vector<8x256xf32>
    %c0_32 = arith.constant 0 : index
    %c0_33 = arith.constant 0 : index
    %45 = vector.load %arg13[%c0_32, %c0_33] : memref<1x256xf32, #tpu.memory_space<vmem>>, vector<1x256xf32>
    %46 = vector.broadcast %45 : vector<1x256xf32> to vector<8x256xf32>
    %47 = arith.addf %44, %46 : vector<8x256xf32>
    %cst_34 = arith.constant 0.000000e+00 : f32
    %48 = vector.broadcast %cst_34 : f32 to vector<8x256xf32>
    %49 = arith.maximumf %47, %48 : vector<8x256xf32>
    %c0_35 = arith.constant 0 : index
    %c0_36 = arith.constant 0 : index
    %50 = vector.load %arg14[%c0_35, %c0_36] : memref<256x256xf32, #tpu.memory_space<vmem>>, vector<256x256xf32>
    %cst_37 = arith.constant dense<0.000000e+00> : vector<8x256xf32>
    %51 = tpu.matmul %49, %50, %cst_37 {dimension_numbers = #tpu.dot_dimension_numbers<[1], [0], [0], [1], [0, 0, 1, 1], [], []>} : vector<8x256xf32>, vector<256x256xf32>, vector<8x256xf32> -> vector<8x256xf32>
    %c0_38 = arith.constant 0 : index
    %c0_39 = arith.constant 0 : index
    %52 = vector.load %arg15[%c0_38, %c0_39] : memref<1x256xf32, #tpu.memory_space<vmem>>, vector<1x256xf32>
    %53 = vector.broadcast %52 : vector<1x256xf32> to vector<8x256xf32>
    %54 = arith.addf %51, %53 : vector<8x256xf32>
    %55 = vector.extract_strided_slice %54 {offsets = [0, 0], sizes = [8, 128], strides = [1, 1]} : vector<8x256xf32> to vector<8x128xf32>
    %56 = vector.extract_strided_slice %54 {offsets = [0, 128], sizes = [8, 128], strides = [1, 1]} : vector<8x256xf32> to vector<8x128xf32>
    %cst_40 = arith.constant 5.000000e-01 : f32
    %57 = vector.broadcast %cst_40 : f32 to vector<8x128xf32>
    %58 = arith.mulf %57, %56 : vector<8x128xf32>
    %59 = math.exp %58 : vector<8x128xf32>
    %60 = arith.mulf %2, %59 : vector<8x128xf32>
    %61 = arith.addf %55, %60 : vector<8x128xf32>
    %62 = tpu.concatenate %61, %3 in 1 : vector<8x128xf32>, vector<8x128xf32> -> vector<8x256xf32>
    %c0_41 = arith.constant 0 : index
    %c0_42 = arith.constant 0 : index
    %63 = vector.load %arg22[%c0_41, %c0_42] : memref<256x384xf32, #tpu.memory_space<vmem>>, vector<256x384xf32>
    %cst_43 = arith.constant dense<0.000000e+00> : vector<8x384xf32>
    %64 = tpu.matmul %62, %63, %cst_43 {dimension_numbers = #tpu.dot_dimension_numbers<[1], [0], [0], [1], [0, 0, 1, 1], [], []>} : vector<8x256xf32>, vector<256x384xf32>, vector<8x384xf32> -> vector<8x384xf32>
    %c0_44 = arith.constant 0 : index
    %c0_45 = arith.constant 0 : index
    %65 = vector.load %arg23[%c0_44, %c0_45] : memref<1x384xf32, #tpu.memory_space<vmem>>, vector<1x384xf32>
    %66 = vector.broadcast %65 : vector<1x384xf32> to vector<8x384xf32>
    %67 = arith.addf %64, %66 : vector<8x384xf32>
    %c0_46 = arith.constant 0 : index
    %c0_47 = arith.constant 0 : index
    %68 = vector.load %arg24[%c0_46, %c0_47] : memref<128x384xf32, #tpu.memory_space<vmem>>, vector<128x384xf32>
    %cst_48 = arith.constant dense<0.000000e+00> : vector<8x384xf32>
    %69 = tpu.matmul %3, %68, %cst_48 {dimension_numbers = #tpu.dot_dimension_numbers<[1], [0], [0], [1], [0, 0, 1, 1], [], []>} : vector<8x128xf32>, vector<128x384xf32>, vector<8x384xf32> -> vector<8x384xf32>
    %c0_49 = arith.constant 0 : index
    %c0_50 = arith.constant 0 : index
    %70 = vector.load %arg25[%c0_49, %c0_50] : memref<1x384xf32, #tpu.memory_space<vmem>>, vector<1x384xf32>
    %71 = vector.broadcast %70 : vector<1x384xf32> to vector<8x384xf32>
    %72 = arith.addf %69, %71 : vector<8x384xf32>
    %73 = vector.extract_strided_slice %67 {offsets = [0, 0], sizes = [8, 128], strides = [1, 1]} : vector<8x384xf32> to vector<8x128xf32>
    %74 = vector.extract_strided_slice %72 {offsets = [0, 0], sizes = [8, 128], strides = [1, 1]} : vector<8x384xf32> to vector<8x128xf32>
    %75 = arith.addf %73, %74 : vector<8x128xf32>
    %76 = arith.negf %75 : vector<8x128xf32>
    %77 = math.exp %76 : vector<8x128xf32>
    %cst_51 = arith.constant 1.000000e+00 : f32
    %78 = vector.broadcast %cst_51 : f32 to vector<8x128xf32>
    %79 = arith.addf %78, %77 : vector<8x128xf32>
    %80 = arith.divf %78, %79 : vector<8x128xf32>
    %81 = vector.extract_strided_slice %67 {offsets = [0, 128], sizes = [8, 128], strides = [1, 1]} : vector<8x384xf32> to vector<8x128xf32>
    %82 = vector.extract_strided_slice %72 {offsets = [0, 128], sizes = [8, 128], strides = [1, 1]} : vector<8x384xf32> to vector<8x128xf32>
    %83 = arith.addf %81, %82 : vector<8x128xf32>
    %84 = arith.negf %83 : vector<8x128xf32>
    %85 = math.exp %84 : vector<8x128xf32>
    %cst_52 = arith.constant 1.000000e+00 : f32
    %86 = vector.broadcast %cst_52 : f32 to vector<8x128xf32>
    %87 = arith.addf %86, %85 : vector<8x128xf32>
    %88 = arith.divf %86, %87 : vector<8x128xf32>
    %89 = vector.extract_strided_slice %67 {offsets = [0, 256], sizes = [8, 128], strides = [1, 1]} : vector<8x384xf32> to vector<8x128xf32>
    %90 = vector.extract_strided_slice %72 {offsets = [0, 256], sizes = [8, 128], strides = [1, 1]} : vector<8x384xf32> to vector<8x128xf32>
    %91 = arith.mulf %80, %90 : vector<8x128xf32>
    %92 = arith.addf %89, %91 : vector<8x128xf32>
    %93 = math.tanh %92 : vector<8x128xf32>
    %cst_53 = arith.constant 1.000000e+00 : f32
    %94 = vector.broadcast %cst_53 : f32 to vector<8x128xf32>
    %95 = arith.subf %94, %88 : vector<8x128xf32>
    %96 = arith.mulf %95, %93 : vector<8x128xf32>
    %97 = arith.mulf %88, %1 : vector<8x128xf32>
    %98 = arith.addf %96, %97 : vector<8x128xf32>
    %99 = tpu.concatenate %98, %61 in 1 : vector<8x128xf32>, vector<8x128xf32> -> vector<8x256xf32>
    %c0_54 = arith.constant 0 : index
    %c0_55 = arith.constant 0 : index
    %100 = vector.load %arg16[%c0_54, %c0_55] : memref<256x256xf32, #tpu.memory_space<vmem>>, vector<256x256xf32>
    %cst_56 = arith.constant dense<0.000000e+00> : vector<8x256xf32>
    %101 = tpu.matmul %99, %100, %cst_56 {dimension_numbers = #tpu.dot_dimension_numbers<[1], [0], [0], [1], [0, 0, 1, 1], [], []>} : vector<8x256xf32>, vector<256x256xf32>, vector<8x256xf32> -> vector<8x256xf32>
    %c0_57 = arith.constant 0 : index
    %c0_58 = arith.constant 0 : index
    %102 = vector.load %arg17[%c0_57, %c0_58] : memref<1x256xf32, #tpu.memory_space<vmem>>, vector<1x256xf32>
    %103 = vector.broadcast %102 : vector<1x256xf32> to vector<8x256xf32>
    %104 = arith.addf %101, %103 : vector<8x256xf32>
    %cst_59 = arith.constant 0.000000e+00 : f32
    %105 = vector.broadcast %cst_59 : f32 to vector<8x256xf32>
    %106 = arith.maximumf %104, %105 : vector<8x256xf32>
    %c0_60 = arith.constant 0 : index
    %c0_61 = arith.constant 0 : index
    %107 = vector.load %arg18[%c0_60, %c0_61] : memref<256x256xf32, #tpu.memory_space<vmem>>, vector<256x256xf32>
    %cst_62 = arith.constant dense<0.000000e+00> : vector<8x256xf32>
    %108 = tpu.matmul %106, %107, %cst_62 {dimension_numbers = #tpu.dot_dimension_numbers<[1], [0], [0], [1], [0, 0, 1, 1], [], []>} : vector<8x256xf32>, vector<256x256xf32>, vector<8x256xf32> -> vector<8x256xf32>
    %c0_63 = arith.constant 0 : index
    %c0_64 = arith.constant 0 : index
    %109 = vector.load %arg19[%c0_63, %c0_64] : memref<1x256xf32, #tpu.memory_space<vmem>>, vector<1x256xf32>
    %110 = vector.broadcast %109 : vector<1x256xf32> to vector<8x256xf32>
    %111 = arith.addf %108, %110 : vector<8x256xf32>
    %cst_65 = arith.constant 0.000000e+00 : f32
    %112 = vector.broadcast %cst_65 : f32 to vector<8x256xf32>
    %113 = arith.maximumf %111, %112 : vector<8x256xf32>
    %c0_66 = arith.constant 0 : index
    %c0_67 = arith.constant 0 : index
    %114 = vector.load %arg20[%c0_66, %c0_67] : memref<256x128xf32, #tpu.memory_space<vmem>>, vector<256x128xf32>
    %cst_68 = arith.constant dense<0.000000e+00> : vector<8x128xf32>
    %115 = tpu.matmul %113, %114, %cst_68 {dimension_numbers = #tpu.dot_dimension_numbers<[1], [0], [0], [1], [0, 0, 1, 1], [], []>} : vector<8x256xf32>, vector<256x128xf32>, vector<8x128xf32> -> vector<8x128xf32>
    %c0_69 = arith.constant 0 : index
    %c0_70 = arith.constant 0 : index
    %116 = vector.load %arg21[%c0_69, %c0_70] : memref<1x128xf32, #tpu.memory_space<vmem>>, vector<1x128xf32>
    %117 = vector.broadcast %116 : vector<1x128xf32> to vector<8x128xf32>
    %118 = arith.addf %115, %117 : vector<8x128xf32>
    %c0_71 = arith.constant 0 : index
    %c0_72 = arith.constant 0 : index
    %119 = vector.load %arg26[%c0_71, %c0_72] : memref<8x896xf32, #tpu.memory_space<vmem>>, vector<8x256xf32>
    tpu.vector_store %arg26[%c0_71, %c0_72], %42 {strides = array<i32>} : memref<8x896xf32, #tpu.memory_space<vmem>>, vector<8x256xf32>,
    %c0_73 = arith.constant 0 : index
    %c256 = arith.constant 256 : index
    %120 = vector.load %arg26[%c0_73, %c256] : memref<8x896xf32, #tpu.memory_space<vmem>>, vector<8x256xf32>
    tpu.vector_store %arg26[%c0_73, %c256], %54 {strides = array<i32>} : memref<8x896xf32, #tpu.memory_space<vmem>>, vector<8x256xf32>,
    %c0_74 = arith.constant 0 : index
    %c512 = arith.constant 512 : index
    %121 = vector.load %arg26[%c0_74, %c512] : memref<8x896xf32, #tpu.memory_space<vmem>>, vector<8x128xf32>
    tpu.vector_store %arg26[%c0_74, %c512], %61 {strides = array<i32>} : memref<8x896xf32, #tpu.memory_space<vmem>>, vector<8x128xf32>,
    %c0_75 = arith.constant 0 : index
    %c640 = arith.constant 640 : index
    %122 = vector.load %arg26[%c0_75, %c640] : memref<8x896xf32, #tpu.memory_space<vmem>>, vector<8x128xf32>
    tpu.vector_store %arg26[%c0_75, %c640], %98 {strides = array<i32>} : memref<8x896xf32, #tpu.memory_space<vmem>>, vector<8x128xf32>,
    %c0_76 = arith.constant 0 : index
    %c768 = arith.constant 768 : index
    %123 = vector.load %arg26[%c0_76, %c768] : memref<8x896xf32, #tpu.memory_space<vmem>>, vector<8x128xf32>
    tpu.vector_store %arg26[%c0_76, %c768], %118 {strides = array<i32>} : memref<8x896xf32, #tpu.memory_space<vmem>>, vector<8x128xf32>,
    return
  }
  func.func @transform_0(%arg0: i32) -> (i32, i32) {
    %c0_i32 = arith.constant 0 : i32
    %c0_i32_0 = arith.constant 0 : i32
    return %arg0, %c0_i32 : i32, i32
  }
  func.func @transform_1(%arg0: i32) -> (i32, i32) {
    %c0_i32 = arith.constant 0 : i32
    %c0_i32_0 = arith.constant 0 : i32
    %c0_i32_1 = arith.constant 0 : i32
    return %c0_i32, %c0_i32_0 : i32, i32
  }
  func.func @transform_2(%arg0: i32) -> (i32, i32) {
    %c0_i32 = arith.constant 0 : i32
    %c0_i32_0 = arith.constant 0 : i32
    %c0_i32_1 = arith.constant 0 : i32
    return %c0_i32, %c0_i32_0 : i32, i32
  }
  func.func @transform_3(%arg0: i32) -> (i32, i32) {
    %c0_i32 = arith.constant 0 : i32
    %c0_i32_0 = arith.constant 0 : i32
    %c0_i32_1 = arith.constant 0 : i32
    return %c0_i32, %c0_i32_0 : i32, i32
  }
  func.func @transform_4(%arg0: i32) -> (i32, i32) {
    %c0_i32 = arith.constant 0 : i32
    %c0_i32_0 = arith.constant 0 : i32
    %c0_i32_1 = arith.constant 0 : i32
    return %c0_i32, %c0_i32_0 : i32, i32
  }
  func.func @transform_5(%arg0: i32) -> (i32, i32) {
    %c0_i32 = arith.constant 0 : i32
    %c0_i32_0 = arith.constant 0 : i32
    %c0_i32_1 = arith.constant 0 : i32
    return %c0_i32, %c0_i32_0 : i32, i32
  }
  func.func @transform_6(%arg0: i32) -> (i32, i32) {
    %c0_i32 = arith.constant 0 : i32
    %c0_i32_0 = arith.constant 0 : i32
    %c0_i32_1 = arith.constant 0 : i32
    return %c0_i32, %c0_i32_0 : i32, i32
  }
  func.func @transform_7(%arg0: i32) -> (i32, i32) {
    %c0_i32 = arith.constant 0 : i32
    %c0_i32_0 = arith.constant 0 : i32
    %c0_i32_1 = arith.constant 0 : i32
    return %c0_i32, %c0_i32_0 : i32, i32
  }
  func.func @transform_8(%arg0: i32) -> (i32, i32) {
    %c0_i32 = arith.constant 0 : i32
    %c0_i32_0 = arith.constant 0 : i32
    %c0_i32_1 = arith.constant 0 : i32
    return %c0_i32, %c0_i32_0 : i32, i32
  }
  func.func @transform_9(%arg0: i32) -> (i32, i32) {
    %c0_i32 = arith.constant 0 : i32
    %c0_i32_0 = arith.constant 0 : i32
    %c0_i32_1 = arith.constant 0 : i32
    return %c0_i32, %c0_i32_0 : i32, i32
  }
  func.func @transform_10(%arg0: i32) -> (i32, i32) {
    %c0_i32 = arith.constant 0 : i32
    %c0_i32_0 = arith.constant 0 : i32
    %c0_i32_1 = arith.constant 0 : i32
    return %c0_i32, %c0_i32_0 : i32, i32
  }
  func.func @transform_11(%arg0: i32) -> (i32, i32) {
    %c0_i32 = arith.constant 0 : i32
    %c0_i32_0 = arith.constant 0 : i32
    %c0_i32_1 = arith.constant 0 : i32
    return %c0_i32, %c0_i32_0 : i32, i32
  }
  func.func @transform_12(%arg0: i32) -> (i32, i32) {
    %c0_i32 = arith.constant 0 : i32
    %c0_i32_0 = arith.constant 0 : i32
    %c0_i32_1 = arith.constant 0 : i32
    return %c0_i32, %c0_i32_0 : i32, i32
  }
  func.func @transform_13(%arg0: i32) -> (i32, i32) {
    %c0_i32 = arith.constant 0 : i32
    %c0_i32_0 = arith.constant 0 : i32
    %c0_i32_1 = arith.constant 0 : i32
    return %c0_i32, %c0_i32_0 : i32, i32
  }
  func.func @transform_14(%arg0: i32) -> (i32, i32) {
    %c0_i32 = arith.constant 0 : i32
    %c0_i32_0 = arith.constant 0 : i32
    %c0_i32_1 = arith.constant 0 : i32
    return %c0_i32, %c0_i32_0 : i32, i32
  }
  func.func @transform_15(%arg0: i32) -> (i32, i32) {
    %c0_i32 = arith.constant 0 : i32
    %c0_i32_0 = arith.constant 0 : i32
    %c0_i32_1 = arith.constant 0 : i32
    return %c0_i32, %c0_i32_0 : i32, i32
  }
  func.func @transform_16(%arg0: i32) -> (i32, i32) {
    %c0_i32 = arith.constant 0 : i32
    %c0_i32_0 = arith.constant 0 : i32
    %c0_i32_1 = arith.constant 0 : i32
    return %c0_i32, %c0_i32_0 : i32, i32
  }
  func.func @transform_17(%arg0: i32) -> (i32, i32) {
    %c0_i32 = arith.constant 0 : i32
    %c0_i32_0 = arith.constant 0 : i32
    %c0_i32_1 = arith.constant 0 : i32
    return %c0_i32, %c0_i32_0 : i32, i32
  }
  func.func @transform_18(%arg0: i32) -> (i32, i32) {
    %c0_i32 = arith.constant 0 : i32
    %c0_i32_0 = arith.constant 0 : i32
    %c0_i32_1 = arith.constant 0 : i32
    return %c0_i32, %c0_i32_0 : i32, i32
  }
  func.func @transform_19(%arg0: i32) -> (i32, i32) {
    %c0_i32 = arith.constant 0 : i32
    %c0_i32_0 = arith.constant 0 : i32
    %c0_i32_1 = arith.constant 0 : i32
    return %c0_i32, %c0_i32_0 : i32, i32
  }
  func.func @transform_20(%arg0: i32) -> (i32, i32) {
    %c0_i32 = arith.constant 0 : i32
    %c0_i32_0 = arith.constant 0 : i32
    %c0_i32_1 = arith.constant 0 : i32
    return %c0_i32, %c0_i32_0 : i32, i32
  }
  func.func @transform_21(%arg0: i32) -> (i32, i32) {
    %c0_i32 = arith.constant 0 : i32
    %c0_i32_0 = arith.constant 0 : i32
    %c0_i32_1 = arith.constant 0 : i32
    return %c0_i32, %c0_i32_0 : i32, i32
  }
  func.func @transform_22(%arg0: i32) -> (i32, i32) {
    %c0_i32 = arith.constant 0 : i32
    %c0_i32_0 = arith.constant 0 : i32
    %c0_i32_1 = arith.constant 0 : i32
    return %c0_i32, %c0_i32_0 : i32, i32
  }
  func.func @transform_23(%arg0: i32) -> (i32, i32) {
    %c0_i32 = arith.constant 0 : i32
    %c0_i32_0 = arith.constant 0 : i32
    %c0_i32_1 = arith.constant 0 : i32
    return %c0_i32, %c0_i32_0 : i32, i32
  }
  func.func @transform_24(%arg0: i32) -> (i32, i32) {
    %c0_i32 = arith.constant 0 : i32
    %c0_i32_0 = arith.constant 0 : i32
    %c0_i32_1 = arith.constant 0 : i32
    return %c0_i32, %c0_i32_0 : i32, i32
  }
  func.func @transform_25(%arg0: i32) -> (i32, i32) {
    %c0_i32 = arith.constant 0 : i32
    %c0_i32_0 = arith.constant 0 : i32
    return %arg0, %c0_i32 : i32, i32
  }
}

</mosaic_0001>

<bundles_post_ra>
// kernel: tpu_custom_call.1
= control target key start
LH: loop header
LB: loop body
LE: loop exit
PB: predicated region body
PF: predicated region fallthrough
CT: control target
= control target key end

     0   :  { %s3027_s0 = inlined_call_operand.hbm [shape: f32[8,256], index: 0, kind: input, shape index: {}]   ;;  %s3028_s1 = inlined_call_operand.hbm [shape: f32[128,256], index: 1, kind: input, shape index: {}]   ;;  %s3029_s2 = inlined_call_operand.hbm [shape: f32[1,256], index: 2, kind: input, shape index: {}]   ;;  %s3030_s3 = inlined_call_operand.hbm [shape: f32[256,256], index: 3, kind: input, shape index: {}]   ;;  %s3031_s4 = inlined_call_operand.hbm [shape: f32[1,256], index: 4, kind: input, shape index: {}]   ;;  %s3032_s5 = inlined_call_operand.hbm [shape: f32[256,256], index: 5, kind: input, shape index: {}]   ;;  %s3033_s6 = inlined_call_operand.vmem [shape: f32[1,256], index: 6, kind: input, shape index: {}]   ;;  %s3034_s7 = inlined_call_operand.hbm [shape: f32[256,256], index: 7, kind: input, shape index: {}]   ;;  %s3035_s8 = inlined_call_operand.vmem [shape: f32[1,256], index: 8, kind: input, shape index: {}]   ;;  %s3036_s9 = inlined_call_operand.hbm [shape: f32[256,256], index: 9, kind: input, shape index: {}]   ;;  %s3037_s10 = inlined_call_operand.vmem [shape: f32[1,256], index: 10, kind: input, shape index: {}]   ;;  %s3038_s11 = inlined_call_operand.hbm [shape: f32[128,256], index: 11, kind: input, shape index: {}]   ;;  %s3039_s12 = inlined_call_operand.vmem [shape: f32[1,256], index: 12, kind: input, shape index: {}]   ;;  %s3040_s13 = inlined_call_operand.hbm [shape: f32[256,256], index: 13, kind: input, shape index: {}]   ;;  %s3041_s14 = inlined_call_operand.vmem [shape: f32[1,256], index: 14, kind: input, shape index: {}]   ;;  %s3042_s15 = inlined_call_operand.hbm [shape: f32[256,256], index: 15, kind: input, shape index: {}]   ;;  %s3043_s16 = inlined_call_operand.vmem [shape: f32[1,256], index: 16, kind: input, shape index: {}]   ;;  %s3044_s17 = inlined_call_operand.hbm [shape: f32[256,256], index: 17, kind: input, shape index: {}]   ;;  %s3045_s18 = inlined_call_operand.vmem [shape: f32[1,256], index: 18, kind: input, shape index: {}]   ;;  %s3046_s19 = inlined_call_operand.hbm [shape: f32[256,128], index: 19, kind: input, shape index: {}]   ;;  %s3047_s20 = inlined_call_operand.vmem [shape: f32[1,128], index: 20, kind: input, shape index: {}]   ;;  %s3048_s21 = inlined_call_operand.hbm [shape: f32[256,384], index: 21, kind: input, shape index: {}]   ;;  %s3049_s22 = inlined_call_operand.vmem [shape: f32[1,384], index: 22, kind: input, shape index: {}]   ;;  %s3050_s23 = inlined_call_operand.hbm [shape: f32[128,384], index: 23, kind: input, shape index: {}]   ;;  %s3051_s24 = inlined_call_operand.vmem [shape: f32[1,384], index: 24, kind: input, shape index: {}]   ;;  %s3052_s25 = inlined_call_operand.hbm [shape: f32[8,896], index: 25, kind: output, shape index: {}]  }
   0x1   :  { %3053 = sst [smem:[#allocation36_spill]] %s3027_s0 }
   0x2   :  { %3054 = sst [smem:[#allocation37_spill]] %s3028_s1 }
   0x3   :  { %3055 = sst [smem:[#allocation38_spill]] %s3029_s2 }
   0x4   :  { %3056 = sst [smem:[#allocation39_spill]] %s3030_s3 }
   0x5   :  { %3057 = sst [smem:[#allocation40_spill]] %s3031_s4 }
   0x6   :  { %3058 = sst [smem:[#allocation41_spill]] %s3032_s5 }
   0x7   :  { %3059 = sst [smem:[#allocation42_spill]] %s3033_s6 }
   0x8   :  { %3060 = sst [smem:[#allocation43_spill]] %s3034_s7 }
   0x9   :  { %3061 = sst [smem:[#allocation44_spill]] %s3035_s8 }
   0xa   :  { %3062 = sst [smem:[#allocation45_spill]] %s3036_s9 }
   0xb   :  { %30 = vsyncpa [#allocation3], 0 }
   0xc   :  { %31 = vsyncpa [#allocation6], 0 }
   0xd   :  { %32 = vsyncpa [#allocation9], 0 }
   0xe   :  { %33 = vsyncpa [#allocation12], 0 }
   0xf   :  { %34 = vsyncpa [#allocation15], 0 }
  0x10   :  { %35 = vsyncpa [#allocation18], 0 }
  0x11   :  { %36 = vsyncpa [#allocation21], 0 }
  0x12   :  { %37 = vsyncpa [#allocation24], 0 }
  0x13   :  { %38 = vsyncpa [#allocation4], 0  ;;  %s2683_s29 = smov [#allocation5]  }
  0x14   :  { %s54_s2 = sshll.u32 %s2683_s29, 4  ;;  %s55_s2 = int_to_ptr.vmem [resolvable:$true] %s54_s2 }
  0x15   :  { %s2353_s6 = scalar_lea.vmem %s55_s2, 4096  ;;  %p2358_p1 = scmp.lt.s32.totalorder %s55_s2, %s55_s2 }
  0x16   :  { %p2354_p0 = scmp.ne.s32.totalorder %s55_s2, %s2353_s6  ;;  %p2359_p2 = scmp.lt.s32.totalorder %s2353_s6, %s2353_s6 }
  0x18   :  { %p2360_p3 = por %p2359_p2, %p2358_p1 }
  0x1a   :  { %p2361_p4 = pnand %p2360_p3, %p2354_p0 }
  0x1c   :  { %2364 = shalt.err (!%p2361_p4)
}
  0x1d   :  { %s2684_s30 = smov 256   ;;  %s2685_s7 = smov 16  }
  0x1e   :  { %s3063_s1 = sld [smem:[#allocation37_spill]]  ;;  %s2686_s8 = smov [#allocation8]  }
  0x1f   :  { %s76_s27 = sshll.u32 %s2686_s8, 4  ;;  %s2687_s4 = smov [#allocation11]   ;;  %s77_s27 = int_to_ptr.vmem [resolvable:$true] %s76_s27 }
  0x20   :  { %s98_s28 = sshll.u32 %s2687_s4, 4  ;;  %s2373_s9 = scalar_lea.vmem %s77_s27, 8192  ;;  %s99_s28 = int_to_ptr.vmem [resolvable:$true] %s98_s28 }
  0x21   :  { %p2374_p5 = scmp.ne.s32.totalorder %s77_s27, %s2373_s9  ;;  %p2378_p6 = scmp.lt.s32.totalorder %s77_s27, %s77_s27 }
  0x22   :  { %p2379_p7 = scmp.lt.s32.totalorder %s2373_s9, %s2373_s9 }
  0x24   :  { %60 = dma.hbm_to_vmem [thread:$0]  %s3063_s1, 4096, %s55_s2, [#allocation6], %s2684_s30, %s2684_s30, %s2685_s7  }
  0x25   :  { %p2380_p8 = por %p2379_p7, %p2378_p6 }
  0x27   :  { %p2381_p9 = pnand %p2380_p8, %p2374_p5 }
  0x29   :  { %2384 = shalt.err (!%p2381_p9)
}
  0x2a   :  { %s3064_s29 = sld [smem:[#allocation39_spill]]  ;;  %s2393_s2 = scalar_lea.vmem %s99_s28, 8192 }
  0x2b   :  { %p2394_p10 = scmp.ne.s32.totalorder %s99_s28, %s2393_s2  ;;  %p2398_p11 = scmp.lt.s32.totalorder %s99_s28, %s99_s28 }
  0x2c   :  { %p2399_p12 = scmp.lt.s32.totalorder %s2393_s2, %s2393_s2 }
  0x2e   :  { %p2400_p13 = por %p2399_p12, %p2398_p11 }
  0x30   :  { %82 = dma.hbm_to_vmem [thread:$0]  %s3064_s29, 8192, %s77_s27, [#allocation9], %s2684_s30, %s2684_s30, %s2685_s7  }
  0x31   :  { %p2401_p0 = pnand %p2400_p13, %p2394_p10 }
  0x33   :  { %2404 = shalt.err (!%p2401_p0)
}
  0x34   :  { %s3065_s26 = sld [smem:[#allocation41_spill]]  ;;  %s2688_s1 = smov [#allocation14]  }
  0x35   :  { %s126_s8 = sshll.u32 %s2688_s1, 4  ;;  %s2689_s4 = smov [#allocation17]   ;;  %s127_s8 = int_to_ptr.vmem [resolvable:$true] %s126_s8 }
  0x36   :  { %s154_s27 = sshll.u32 %s2689_s4, 4  ;;  %s2413_s9 = scalar_lea.vmem %s127_s8, 8192  ;;  %s155_s27 = int_to_ptr.vmem [resolvable:$true] %s154_s27 }
  0x37   :  { %p2414_p1 = scmp.ne.s32.totalorder %s127_s8, %s2413_s9  ;;  %p2418_p2 = scmp.lt.s32.totalorder %s127_s8, %s127_s8 }
  0x38   :  { %p2419_p3 = scmp.lt.s32.totalorder %s2413_s9, %s2413_s9 }
  0x3a   :  { %104 = dma.hbm_to_vmem [thread:$0]  %s3065_s26, 8192, %s99_s28, [#allocation12], %s2684_s30, %s2684_s30, %s2685_s7  }
  0x3b   :  { %p2420_p4 = por %p2419_p3, %p2418_p2 }
  0x3d   :  { %p2421_p5 = pnand %p2420_p4, %p2414_p1 }
  0x3f   :  { %2424 = shalt.err (!%p2421_p5)
}
  0x40   :  { %s3066_s29 = sld [smem:[#allocation45_spill]]  ;;  %s2433_s28 = scalar_lea.vmem %s155_s27, 8192 }
  0x41   :  { %p2434_p6 = scmp.ne.s32.totalorder %s155_s27, %s2433_s28  ;;  %p2438_p7 = scmp.lt.s32.totalorder %s155_s27, %s155_s27 }
  0x42   :  { %p2439_p8 = scmp.lt.s32.totalorder %s2433_s28, %s2433_s28 }
  0x44   :  { %p2440_p9 = por %p2439_p8, %p2438_p7 }
  0x46   :  { %132 = dma.hbm_to_vmem [thread:$0]  %s3066_s29, 8192, %s127_s8, [#allocation15], %s2684_s30, %s2684_s30, %s2685_s7  }
  0x47   :  { %p2441_p10 = pnand %p2440_p9, %p2434_p6 }
  0x49   :  { %2444 = shalt.err (!%p2441_p10)
}
  0x4a   :  { %160 = dma.hbm_to_vmem [thread:$0]  %s3040_s13, 8192, %s155_s27, [#allocation18], %s2684_s30, %s2684_s30, %s2685_s7  }
  0x4b   :  { %s2690_s3 = smov [#allocation20]   ;;  %s2691_s1 = smov [#allocation23]  }
  0x4c   :  { %s182_s26 = sshll.u32 %s2690_s3, 4  ;;  %s210_s8 = sshll.u32 %s2691_s1, 4  ;;  %s183_s26 = int_to_ptr.vmem [resolvable:$true] %s182_s26  ;;  %s211_s8 = int_to_ptr.vmem [resolvable:$true] %s210_s8 }
  0x4d   :  { %s2453_s4 = scalar_lea.vmem %s183_s26, 8192  ;;  %p2458_p12 = scmp.lt.s32.totalorder %s183_s26, %s183_s26 }
  0x4e   :  { %p2454_p11 = scmp.ne.s32.totalorder %s183_s26, %s2453_s4  ;;  %p2459_p13 = scmp.lt.s32.totalorder %s2453_s4, %s2453_s4 }
  0x50   :  { %p2460_p0 = por %p2459_p13, %p2458_p12 }
  0x52   :  { %p2461_p1 = pnand %p2460_p0, %p2454_p11 }
  0x54   :  { %2464 = shalt.err (!%p2461_p1)
}
  0x55   :  { %188 = dma.hbm_to_vmem [thread:$0]  %s3044_s17, 8192, %s183_s26, [#allocation21], %s2684_s30, %s2684_s30, %s2685_s7  }
  0x56   :  { %s2473_s13 = scalar_lea.vmem %s211_s8, 12288  ;;  %p2478_p3 = scmp.lt.s32.totalorder %s211_s8, %s211_s8 }
  0x57   :  { %p2474_p2 = scmp.ne.s32.totalorder %s211_s8, %s2473_s13  ;;  %p2479_p4 = scmp.lt.s32.totalorder %s2473_s13, %s2473_s13 }
  0x59   :  { %p2480_p5 = por %p2479_p4, %p2478_p3 }
  0x5b   :  { %p2481_p6 = pnand %p2480_p5, %p2474_p2 }
  0x5d   :  { %2484 = shalt.err (!%p2481_p6)
}
  0x5e   :  { %s2692_s27 = smov 384   ;;  %s2693_s0 = smov 24  }
  0x5f   :  { %216 = dma.hbm_to_vmem [thread:$0]  %s3048_s21, 12288, %s211_s8, [#allocation24], %s2692_s27, %s2692_s27, %s2693_s0  }
  0x60   :  { %s2694_s2 = smov [#allocation2]   ;;  %s2695_s17 = smov [#allocation7]  }
  0x61   :  { %s45_s6 = sshll.u32 %s2694_s2, 4  ;;  %s67_s3 = sshll.u32 %s2695_s17, 4  ;;  %s46_s6 = int_to_ptr.vmem [resolvable:$true] %s45_s6  ;;  %s68_s3 = int_to_ptr.vmem [resolvable:$true] %s67_s3 }
  0x62   :  { %s2493_s26 = scalar_lea.vmem %s46_s6, 256  ;;  %p2498_p8 = scmp.lt.s32.totalorder %s46_s6, %s46_s6 }
  0x63   :  { %p2494_p7 = scmp.ne.s32.totalorder %s46_s6, %s2493_s26  ;;  %p2499_p9 = scmp.lt.s32.totalorder %s2493_s26, %s2493_s26 }
  0x65   :  { %p2500_p10 = por %p2499_p9, %p2498_p8 }
  0x67   :  { %p2501_p11 = pnand %p2500_p10, %p2494_p7 }
  0x69   :  { %2504 = shalt.err (!%p2501_p11)
}
  0x6a   :  { %s3067_s9 = sld [smem:[#allocation36_spill]]  ;;  %s2513_s5 = scalar_lea.vmem %s68_s3, 32 }
  0x6b   :  { %p2514_p12 = scmp.ne.s32.totalorder %s68_s3, %s2513_s5  ;;  %p2518_p13 = scmp.lt.s32.totalorder %s68_s3, %s68_s3 }
  0x6c   :  { %p2519_p0 = scmp.lt.s32.totalorder %s2513_s5, %s2513_s5 }
  0x6e   :  { %p2520_p1 = por %p2519_p0, %p2518_p13 }
  0x70   :  { %48 = dma.hbm_to_vmem [thread:$0]  %s3067_s9, 256, %s46_s6, [#allocation3]  }
  0x71   :  { %p2521_p2 = pnand %p2520_p1, %p2514_p12 }
  0x73   :  { %2524 = shalt.err (!%p2521_p2)
}
  0x74   :  { %s3068_s13 = sld [smem:[#allocation38_spill]]  ;;  %s2696_s29 = smov [#allocation10]  }
  0x75   :  { %s89_s28 = sshll.u32 %s2696_s29, 4  ;;  %s2697_s2 = smov [#allocation13]   ;;  %s90_s28 = int_to_ptr.vmem [resolvable:$true] %s89_s28 }
  0x76   :  { %s112_s17 = sshll.u32 %s2697_s2, 4  ;;  %s2533_s26 = scalar_lea.vmem %s90_s28, 32  ;;  %s113_s17 = int_to_ptr.vmem [resolvable:$true] %s112_s17 }
  0x77   :  { %p2534_p3 = scmp.ne.s32.totalorder %s90_s28, %s2533_s26  ;;  %p2538_p4 = scmp.lt.s32.totalorder %s90_s28, %s90_s28 }
  0x78   :  { %p2539_p5 = scmp.lt.s32.totalorder %s2533_s26, %s2533_s26 }
  0x7a   :  { %70 = dma.hbm_to_vmem [thread:$0]  %s3068_s13, 32, %s68_s3, [#allocation6]  }
  0x7b   :  { %p2540_p6 = por %p2539_p5, %p2538_p4 }
  0x7d   :  { %p2541_p7 = pnand %p2540_p6, %p2534_p3 }
  0x7f   :  { %2544 = shalt.err (!%p2541_p7)
}
  0x80   :  { %s3069_s4 = sld [smem:[#allocation40_spill]]  ;;  %s2553_s9 = scalar_lea.vmem %s113_s17, 8192 }
  0x81   :  { %p2554_p8 = scmp.ne.s32.totalorder %s113_s17, %s2553_s9  ;;  %p2558_p9 = scmp.lt.s32.totalorder %s113_s17, %s113_s17 }
  0x82   :  { %p2559_p10 = scmp.lt.s32.totalorder %s2553_s9, %s2553_s9 }
  0x84   :  { %p2560_p11 = por %p2559_p10, %p2558_p9 }
  0x86   :  { %92 = dma.hbm_to_vmem [thread:$0]  %s3069_s4, 32, %s90_s28, [#allocation9]  }
  0x87   :  { %p2561_p12 = pnand %p2560_p11, %p2554_p8 }
  0x89   :  { %2564 = shalt.err (!%p2561_p12)
}
  0x8a   :  { %s3070_s21 = sld [smem:[#allocation43_spill]]  ;;  %s2698_s8 = smov [#allocation16]  }
  0x8b   :  { %s140_s13 = sshll.u32 %s2698_s8, 4  ;;  %s2699_s29 = smov [#allocation19]   ;;  %s141_s13 = int_to_ptr.vmem [resolvable:$true] %s140_s13 }
  0x8c   :  { %s168_s28 = sshll.u32 %s2699_s29, 4  ;;  %s2573_s2 = scalar_lea.vmem %s141_s13, 4096  ;;  %s169_s28 = int_to_ptr.vmem [resolvable:$true] %s168_s28 }
  0x8d   :  { %p2574_p13 = scmp.ne.s32.totalorder %s141_s13, %s2573_s2  ;;  %p2578_p0 = scmp.lt.s32.totalorder %s141_s13, %s141_s13 }
  0x8e   :  { %p2579_p1 = scmp.lt.s32.totalorder %s2573_s2, %s2573_s2 }
  0x90   :  { %118 = dma.hbm_to_vmem [thread:$0]  %s3070_s21, 8192, %s113_s17, [#allocation12], %s2684_s30, %s2684_s30, %s2685_s7  }
  0x91   :  { %p2580_p2 = por %p2579_p1, %p2578_p0 }
  0x93   :  { %p2581_p3 = pnand %p2580_p2, %p2574_p13 }
  0x95   :  { %2584 = shalt.err (!%p2581_p3)
}
  0x96   :  { %146 = dma.hbm_to_vmem [thread:$0]  %s3038_s11, 4096, %s141_s13, [#allocation15], %s2684_s30, %s2684_s30, %s2685_s7  }
  0x97   :  { %s2593_s17 = scalar_lea.vmem %s169_s28, 8192  ;;  %p2598_p5 = scmp.lt.s32.totalorder %s169_s28, %s169_s28 }
  0x98   :  { %p2594_p4 = scmp.ne.s32.totalorder %s169_s28, %s2593_s17  ;;  %p2599_p6 = scmp.lt.s32.totalorder %s2593_s17, %s2593_s17 }
  0x9a   :  { %p2600_p7 = por %p2599_p6, %p2598_p5 }
  0x9c   :  { %p2601_p8 = pnand %p2600_p7, %p2594_p4 }
  0x9e   :  { %2604 = shalt.err (!%p2601_p8)
}
  0x9f   :  { %174 = dma.hbm_to_vmem [thread:$0]  %s3042_s15, 8192, %s169_s28, [#allocation18], %s2684_s30, %s2684_s30, %s2685_s7  }
  0xa0   :  { %s2700_s9 = smov [#allocation22]  }
  0xa1   :  { %s196_s3 = sshll.u32 %s2700_s9, 4  ;;  %s197_s3 = int_to_ptr.vmem [resolvable:$true] %s196_s3 }
  0xa2   :  { %s2613_s5 = scalar_lea.vmem %s197_s3, 4096  ;;  %p2618_p10 = scmp.lt.s32.totalorder %s197_s3, %s197_s3 }
  0xa3   :  { %p2614_p9 = scmp.ne.s32.totalorder %s197_s3, %s2613_s5  ;;  %p2619_p11 = scmp.lt.s32.totalorder %s2613_s5, %s2613_s5 }
  0xa5   :  { %p2620_p12 = por %p2619_p11, %p2618_p10 }
  0xa7   :  { %p2621_p13 = pnand %p2620_p12, %p2614_p9 }
  0xa9   :  { %2624 = shalt.err (!%p2621_p13)
}
  0xaa   :  { %s2701_s11 = smov 128   ;;  %s2702_s21 = smov 8  }
  0xab   :  { %202 = dma.hbm_to_vmem [thread:$0]  %s3046_s19, 4096, %s197_s3, [#allocation21], %s2701_s11, %s2701_s11, %s2702_s21  }
  0xac   :  { %s2703_s29 = smov [#allocation25]  }
  0xad   :  { %s224_s2 = sshll.u32 %s2703_s29, 4  ;;  %s225_s2 = int_to_ptr.vmem [resolvable:$true] %s224_s2 }
  0xae   :  { %s2633_s15 = scalar_lea.vmem %s225_s2, 6144  ;;  %p2638_p1 = scmp.lt.s32.totalorder %s225_s2, %s225_s2 }
  0xaf   :  { %p2634_p0 = scmp.ne.s32.totalorder %s225_s2, %s2633_s15  ;;  %p2639_p2 = scmp.lt.s32.totalorder %s2633_s15, %s2633_s15 }
  0xb1   :  { %p2640_p3 = por %p2639_p2, %p2638_p1 }
  0xb3   :  { %p2641_p4 = pnand %p2640_p3, %p2634_p0 }
  0xb5   :  { %2644 = shalt.err (!%p2641_p4)
}
  0xb6   :  { %230 = dma.hbm_to_vmem [thread:$0]  %s3050_s23, 6144, %s225_s2, [#allocation24], %s2692_s27, %s2692_s27, %s2693_s0  }
  0xb7   :  { %2665 = dma.done.wait [#allocation3], 256  }
  0xb8   :  { %2666 = vsyncadd [#allocation3], 4294967040 }
  0xb9   :  { %2667 = dma.done.wait [#allocation6], 4128  }
  0xba   :  { %2668 = vsyncadd [#allocation6], 4294963168 }
  0xbb   :  { %2669 = dma.done.wait [#allocation9], 8224  }
  0xbc   :  { %2670 = vsyncadd [#allocation9], 4294959072 }
  0xbd   :  { %2671 = dma.done.wait [#allocation12], 16384  }
  0xbe   :  { %2672 = vsyncadd [#allocation12], 4294950912 }
  0xbf   :  { %2673 = dma.done.wait [#allocation15], 12288  }
  0xc0   :  { %2674 = vsyncadd [#allocation15], 4294955008 }
  0xc1   :  { %2675 = dma.done.wait [#allocation18], 16384  }
  0xc2   :  { %2676 = vsyncadd [#allocation18], 4294950912 }
  0xc3   :  { %2677 = dma.done.wait [#allocation21], 12288  }
  0xc4   :  { %2678 = vsyncadd [#allocation21], 4294955008 }
  0xc5   :  { %2679 = dma.done.wait [#allocation24], 18432  }
  0xc6   :  { %2680 = vsyncadd [#allocation24], 4294948864  ;;  %v2704_v0 = vmov 0.0   ;;  %v311_v1 = vld [vmem:[#allocation5 + $0xf8] sm:$0xff]  ;;  %v310_v2 = vld [vmem:[#allocation5 + $0xf0] sm:$0xff]  ;;  %s3071_s27 = sld [smem:[#allocation42_spill]] }
  0xc7   :  { %388 = vmatprep.mubr.f32.mxu0 %v2704_v0  ;;  %v309_v3 = vld [vmem:[#allocation5 + $0xe8] sm:$0xff]  ;;  %324 = vmatprep.subr.mxu0 %v311_v1  ;;  %v308_v4 = vld [vmem:[#allocation5 + $0xe0] sm:$0xff]  ;;  %v307_v5 = vld [vmem:[#allocation5 + $0xd8] sm:$0xff]  ;;  %s3072_s26 = sld [smem:[#allocation44_spill]]  ;;  %vm2705_vm0 = vmmov 0   ;;  %s2706_s13 = smov [#allocation26]  }
  0xc8   :  { %325 = vmatpush1.msra.mxu0 %v310_v2  ;;  %v306_v6 = vld [vmem:[#allocation5 + $0xd0] sm:$0xff]  ;;  %v305_v7 = vld [vmem:[#allocation5 + $0xc8] sm:$0xff]  ;;  %v304_v8 = vld [vmem:[#allocation5 + $0xc0] sm:$0xff] }
  0xc9   :  { %326 = vmatprep.subr.mxu0 %v309_v3  ;;  %v303_v9 = vld [vmem:[#allocation5 + $0xb8] sm:$0xff]  ;;  %v302_v10 = vld [vmem:[#allocation5 + $0xb0] sm:$0xff]  ;;  %v301_v11 = vld [vmem:[#allocation5 + $0xa8] sm:$0xff] }
  0xca   :  { %327 = vmatpush1.msra.mxu0 %v308_v4  ;;  %v300_v12 = vld [vmem:[#allocation5 + $0xa0] sm:$0xff]  ;;  %v299_v13 = vld [vmem:[#allocation5 + $0x98] sm:$0xff]  ;;  %v298_v14 = vld [vmem:[#allocation5 + $0x90] sm:$0xff] }
  0xcb   :  { %328 = vmatprep.subr.mxu0 %v307_v5  ;;  %v428_v15 = vld [vmem:[#allocation8 + $0xf8] sm:$0xff]  ;;  %v427_v16 = vld [vmem:[#allocation8 + $0xf0] sm:$0xff]  ;;  %v426_v17 = vld [vmem:[#allocation8 + $0xe8] sm:$0xff] }
  0xcc   :  { %329 = vmatpush1.msra.mxu0 %v306_v6  ;;  %v297_v18 = vld [vmem:[#allocation5 + $0x88] sm:$0xff]  ;;  %473 = vmatprep.subr.mxu1 %v428_v15  ;;  %v296_v20 = vld [vmem:[#allocation5 + $0x80] sm:$0xff]  ;;  %v295_v22 = vld [vmem:[#allocation5 + $0x78] sm:$0xff] }
  0xcd   :  { %330 = vmatprep.subr.mxu0 %v305_v7  ;;  %v425_v19 = vld [vmem:[#allocation8 + $0xe0] sm:$0xff]  ;;  %474 = vmatpush1.msra.mxu1 %v427_v16  ;;  %v424_v21 = vld [vmem:[#allocation8 + $0xd8] sm:$0xff]  ;;  %v423_v23 = vld [vmem:[#allocation8 + $0xd0] sm:$0xff] }
  0xce   :  { %331 = vmatpush1.msra.mxu0 %v304_v8  ;;  %475 = vmatprep.subr.mxu1 %v426_v17  ;;  %v294_v24 = vld [vmem:[#allocation5 + $0x70] sm:$0xff]  ;;  %v293_v26 = vld [vmem:[#allocation5 + $0x68] sm:$0xff]  ;;  %v292_v28 = vld [vmem:[#allocation5 + $0x60] sm:$0xff] }
  0xcf   :  { %332 = vmatprep.subr.mxu0 %v303_v9  ;;  %476 = vmatpush1.msra.mxu1 %v425_v19  ;;  %v422_v25 = vld [vmem:[#allocation8 + $0xc8] sm:$0xff]  ;;  %v421_v27 = vld [vmem:[#allocation8 + $0xc0] sm:$0xff]  ;;  %v420_v29 = vld [vmem:[#allocation8 + $0xb8] sm:$0xff] }
  0xd0   :  { %333 = vmatpush1.msra.mxu0 %v302_v10  ;;  %477 = vmatprep.subr.mxu1 %v424_v21  ;;  %v291_v30 = vld [vmem:[#allocation5 + $0x58] sm:$0xff]  ;;  %v290_v32 = vld [vmem:[#allocation5 + $0x50] sm:$0xff]  ;;  %v289_v34 = vld [vmem:[#allocation5 + $0x48] sm:$0xff] }
  0xd1   :  { %334 = vmatprep.subr.mxu0 %v301_v11  ;;  %478 = vmatpush1.msra.mxu1 %v423_v23  ;;  %v419_v31 = vld [vmem:[#allocation8 + $0xb0] sm:$0xff]  ;;  %v418_v33 = vld [vmem:[#allocation8 + $0xa8] sm:$0xff]  ;;  %v417_v35 = vld [vmem:[#allocation8 + $0xa0] sm:$0xff] }
  0xd2   :  { %335 = vmatpush1.msra.mxu0 %v300_v12  ;;  %479 = vmatprep.subr.mxu1 %v422_v25  ;;  %v288_v36 = vld [vmem:[#allocation5 + $0x40] sm:$0xff]  ;;  %v287_v38 = vld [vmem:[#allocation5 + $0x38] sm:$0xff]  ;;  %v286_v40 = vld [vmem:[#allocation5 + $0x30] sm:$0xff] }
  0xd3   :  { %336 = vmatprep.subr.mxu0 %v299_v13  ;;  %480 = vmatpush1.msra.mxu1 %v421_v27  ;;  %v416_v37 = vld [vmem:[#allocation8 + $0x98] sm:$0xff]  ;;  %v415_v39 = vld [vmem:[#allocation8 + $0x90] sm:$0xff]  ;;  %v414_v41 = vld [vmem:[#allocation8 + $0x88] sm:$0xff] }
  0xd4   :  { %337 = vmatpush1.msra.mxu0 %v298_v14  ;;  %481 = vmatprep.subr.mxu1 %v420_v29  ;;  %v285_v42 = vld [vmem:[#allocation5 + $0x28] sm:$0xff]  ;;  %v284_v44 = vld [vmem:[#allocation5 + $0x20] sm:$0xff]  ;;  %v283_v46 = vld [vmem:[#allocation5 + $0x18] sm:$0xff] }
  0xd5   :  { %338 = vmatprep.subr.mxu0 %v297_v18  ;;  %482 = vmatpush1.msra.mxu1 %v419_v31  ;;  %v413_v43 = vld [vmem:[#allocation8 + $0x80] sm:$0xff]  ;;  %v412_v45 = vld [vmem:[#allocation8 + $0x78] sm:$0xff]  ;;  %v411_v47 = vld [vmem:[#allocation8 + $0x70] sm:$0xff] }
  0xd6   :  { %339 = vmatpush1.msra.mxu0 %v296_v20  ;;  %483 = vmatprep.subr.mxu1 %v418_v33  ;;  %v282_v48 = vld [vmem:[#allocation5 + $0x10] sm:$0xff]  ;;  %v281_v50 = vld [vmem:[#allocation5 + $0x8] sm:$0xff]  ;;  %v280_v52 = vld [vmem:[#allocation5] sm:$0xff] }
  0xd7   :  { %340 = vmatprep.subr.mxu0 %v295_v22  ;;  %484 = vmatpush1.msra.mxu1 %v417_v35  ;;  %v410_v49 = vld [vmem:[#allocation8 + $0x68] sm:$0xff]  ;;  %v409_v51 = vld [vmem:[#allocation8 + $0x60] sm:$0xff]  ;;  %v408_v53 = vld [vmem:[#allocation8 + $0x58] sm:$0xff] }
  0xd8   :  { %341 = vmatpush1.msra.mxu0 %v294_v24  ;;  %485 = vmatprep.subr.mxu1 %v416_v37  ;;  %v2916_v54 = vld [vmem:[#allocation2] sm:$0xff]  ;;  %v405_v57 = vld [vmem:[#allocation8 + $0x40] sm:$0xff]  ;;  %v404_v58 = vld [vmem:[#allocation8 + $0x38] sm:$0xff] }
  0xd9   :  { %342 = vmatprep.subr.mxu0 %v293_v26  ;;  %486 = vmatpush1.msra.mxu1 %v415_v39  ;;  %v407_v55 = vld [vmem:[#allocation8 + $0x50] sm:$0xff]  ;;  %v406_v56 = vld [vmem:[#allocation8 + $0x48] sm:$0xff]  ;;  %v401_v61 = vld [vmem:[#allocation8 + $0x20] sm:$0xff] }
  0xda   :  { %343 = vmatpush1.msra.mxu0 %v292_v28  ;;  %487 = vmatprep.subr.mxu1 %v414_v41  ;;  %v403_v59 = vld [vmem:[#allocation8 + $0x30] sm:$0xff]  ;;  %v402_v60 = vld [vmem:[#allocation8 + $0x28] sm:$0xff]  ;;  %v400_v62 = vld [vmem:[#allocation8 + $0x18] sm:$0xff] }
  0xdb   :  { %344 = vmatprep.subr.mxu0 %v291_v30  ;;  %488 = vmatpush1.msra.mxu1 %v413_v43  ;;  %v399_v63 = vld [vmem:[#allocation8 + $0x10] sm:$0xff]  ;;  %v398_v1 = vld [vmem:[#allocation8 + $0x8] sm:$0xff]  ;;  %v397_v2 = vld [vmem:[#allocation8] sm:$0xff] }
  0xdc   :  { %345 = vmatpush1.msra.mxu0 %v290_v32  ;;  %489 = vmatprep.subr.mxu1 %v412_v45  ;;  %v460_v3 = vld [vmem:[#allocation8 + $0x1f8] sm:$0xff]  ;;  %v459_v4 = vld [vmem:[#allocation8 + $0x1f0] sm:$0xff]  ;;  %v458_v5 = vld [vmem:[#allocation8 + $0x1e8] sm:$0xff] }
  0xdd   :  { %346 = vmatprep.subr.mxu0 %v289_v34  ;;  %490 = vmatpush1.msra.mxu1 %v411_v47  ;;  %v457_v6 = vld [vmem:[#allocation8 + $0x1e0] sm:$0xff]  ;;  %v456_v7 = vld [vmem:[#allocation8 + $0x1d8] sm:$0xff]  ;;  %v455_v8 = vld [vmem:[#allocation8 + $0x1d0] sm:$0xff] }
  0xde   :  { %347 = vmatpush1.msra.mxu0 %v288_v36  ;;  %491 = vmatprep.subr.mxu1 %v410_v49  ;;  %v454_v9 = vld [vmem:[#allocation8 + $0x1c8] sm:$0xff]  ;;  %v453_v10 = vld [vmem:[#allocation8 + $0x1c0] sm:$0xff]  ;;  %v452_v11 = vld [vmem:[#allocation8 + $0x1b8] sm:$0xff] }
  0xdf   :  { %348 = vmatprep.subr.mxu0 %v287_v38  ;;  %492 = vmatpush1.msra.mxu1 %v409_v51  ;;  %v451_v12 = vld [vmem:[#allocation8 + $0x1b0] sm:$0xff]  ;;  %v450_v13 = vld [vmem:[#allocation8 + $0x1a8] sm:$0xff]  ;;  %v449_v14 = vld [vmem:[#allocation8 + $0x1a0] sm:$0xff] }
  0xe0   :  { %349 = vmatpush1.msra.mxu0 %v286_v40  ;;  %493 = vmatprep.subr.mxu1 %v408_v53  ;;  %v448_v15 = vld [vmem:[#allocation8 + $0x198] sm:$0xff]  ;;  %v447_v16 = vld [vmem:[#allocation8 + $0x190] sm:$0xff]  ;;  %v446_v17 = vld [vmem:[#allocation8 + $0x188] sm:$0xff] }
  0xe1   :  { %350 = vmatprep.subr.mxu0 %v285_v42  ;;  %494 = vmatpush1.msra.mxu1 %v407_v55  ;;  %v445_v18 = vld [vmem:[#allocation8 + $0x180] sm:$0xff]  ;;  %v444_v19 = vld [vmem:[#allocation8 + $0x178] sm:$0xff]  ;;  %v443_v20 = vld [vmem:[#allocation8 + $0x170] sm:$0xff] }
  0xe2   :  { %351 = vmatpush1.msra.mxu0 %v284_v44  ;;  %495 = vmatprep.subr.mxu1 %v406_v56  ;;  %v442_v21 = vld [vmem:[#allocation8 + $0x168] sm:$0xff]  ;;  %v441_v22 = vld [vmem:[#allocation8 + $0x160] sm:$0xff]  ;;  %v440_v23 = vld [vmem:[#allocation8 + $0x158] sm:$0xff] }
  0xe3   :  { %352 = vmatprep.subr.mxu0 %v283_v46  ;;  %496 = vmatpush1.msra.mxu1 %v405_v57  ;;  %v439_v24 = vld [vmem:[#allocation8 + $0x150] sm:$0xff]  ;;  %v438_v25 = vld [vmem:[#allocation8 + $0x148] sm:$0xff]  ;;  %v437_v26 = vld [vmem:[#allocation8 + $0x140] sm:$0xff] }
  0xe4   :  { %353 = vmatpush1.msra.mxu0 %v282_v48  ;;  %497 = vmatprep.subr.mxu1 %v404_v58  ;;  %v436_v27 = vld [vmem:[#allocation8 + $0x138] sm:$0xff]  ;;  %v435_v28 = vld [vmem:[#allocation8 + $0x130] sm:$0xff]  ;;  %v434_v29 = vld [vmem:[#allocation8 + $0x128] sm:$0xff] }
  0xe5   :  { %354 = vmatprep.subr.mxu0 %v281_v50  ;;  %498 = vmatpush1.msra.mxu1 %v403_v59  ;;  %v433_v30 = vld [vmem:[#allocation8 + $0x120] sm:$0xff]  ;;  %v432_v31 = vld [vmem:[#allocation8 + $0x118] sm:$0xff]  ;;  %v431_v32 = vld [vmem:[#allocation8 + $0x110] sm:$0xff] }
  0xe6   :  { %355 = vmatpush1.msra.mxu0 %v280_v52  ;;  %499 = vmatprep.subr.mxu1 %v402_v60  ;;  %v430_v33 = vld [vmem:[#allocation8 + $0x108] sm:$0xff]  ;;  %v429_v34 = vld [vmem:[#allocation8 + $0x100] sm:$0xff]  ;;  %v576_v36 = vld [vmem:[#allocation11 + $0xf0] sm:$0xff] }
  0xe7   :  { %389 = vmatmul.mubr.f32.vlgmr.msra.gmra.mxu0 %v2916_v54  ;;  %500 = vmatpush1.msra.mxu1 %v401_v61  ;;  %v577_v35 = vld [vmem:[#allocation11 + $0xf8] sm:$0xff]  ;;  %v575_v37 = vld [vmem:[#allocation11 + $0xe8] sm:$0xff]  ;;  %v574_v38 = vld [vmem:[#allocation11 + $0xe0] sm:$0xff] }
  0xe8   :  { %501 = vmatprep.subr.mxu1 %v400_v62  ;;  %622 = vmatprep.subr.mxu0 %v577_v35  ;;  %v573_v39 = vld [vmem:[#allocation11 + $0xd8] sm:$0xff]  ;;  %v572_v40 = vld [vmem:[#allocation11 + $0xd0] sm:$0xff]  ;;  %v571_v41 = vld [vmem:[#allocation11 + $0xc8] sm:$0xff] }
  0xe9   :  { %502 = vmatpush1.msra.mxu1 %v399_v63  ;;  %623 = vmatpush1.msra.mxu0 %v576_v36  ;;  %v570_v42 = vld [vmem:[#allocation11 + $0xc0] sm:$0xff]  ;;  %v569_v43 = vld [vmem:[#allocation11 + $0xb8] sm:$0xff]  ;;  %v568_v44 = vld [vmem:[#allocation11 + $0xb0] sm:$0xff] }
  0xea   :  { %503 = vmatprep.subr.mxu1 %v398_v1  ;;  %624 = vmatprep.subr.mxu0 %v575_v37  ;;  %v567_v45 = vld [vmem:[#allocation11 + $0xa8] sm:$0xff]  ;;  %v566_v46 = vld [vmem:[#allocation11 + $0xa0] sm:$0xff]  ;;  %v565_v47 = vld [vmem:[#allocation11 + $0x98] sm:$0xff] }
  0xeb   :  { %504 = vmatpush1.msra.mxu1 %v397_v2  ;;  %625 = vmatpush1.msra.mxu0 %v574_v38  ;;  %v564_v48 = vld [vmem:[#allocation11 + $0x90] sm:$0xff]  ;;  %v563_v49 = vld [vmem:[#allocation11 + $0x88] sm:$0xff]  ;;  %v562_v50 = vld [vmem:[#allocation11 + $0x80] sm:$0xff] }
  0xec   :  { %505 = vmatprep.subr.mxu1 %v460_v3  ;;  %626 = vmatprep.subr.mxu0 %v573_v39  ;;  %v561_v51 = vld [vmem:[#allocation11 + $0x78] sm:$0xff]  ;;  %v560_v52 = vld [vmem:[#allocation11 + $0x70] sm:$0xff]  ;;  %v559_v53 = vld [vmem:[#allocation11 + $0x68] sm:$0xff] }
  0xed   :  { %506 = vmatpush2.msra.mxu1 %v459_v4  ;;  %627 = vmatpush1.msra.mxu0 %v572_v40  ;;  %v558_v55 = vld [vmem:[#allocation11 + $0x60] sm:$0xff]  ;;  %v557_v56 = vld [vmem:[#allocation11 + $0x58] sm:$0xff]  ;;  %v556_v57 = vld [vmem:[#allocation11 + $0x50] sm:$0xff] }
  0xee   :  { %507 = vmatprep.subr.mxu1 %v458_v5  ;;  %628 = vmatprep.subr.mxu0 %v571_v41  ;;  %v555_v58 = vld [vmem:[#allocation11 + $0x48] sm:$0xff]  ;;  %v554_v59 = vld [vmem:[#allocation11 + $0x40] sm:$0xff]  ;;  %v553_v60 = vld [vmem:[#allocation11 + $0x38] sm:$0xff] }
  0xef   :  { %508 = vmatpush2.msra.mxu1 %v457_v6  ;;  %629 = vmatpush1.msra.mxu0 %v570_v42  ;;  %v552_v61 = vld [vmem:[#allocation11 + $0x30] sm:$0xff]  ;;  %v551_v62 = vld [vmem:[#allocation11 + $0x28] sm:$0xff]  ;;  %v550_v63 = vld [vmem:[#allocation11 + $0x20] sm:$0xff] }
  0xf0   :  { %509 = vmatprep.subr.mxu1 %v456_v7  ;;  %630 = vmatprep.subr.mxu0 %v569_v43  ;;  %v549_v1 = vld [vmem:[#allocation11 + $0x18] sm:$0xff]  ;;  %v548_v2 = vld [vmem:[#allocation11 + $0x10] sm:$0xff]  ;;  %v547_v3 = vld [vmem:[#allocation11 + $0x8] sm:$0xff] }
  0xf1   :  { %510 = vmatpush2.msra.mxu1 %v455_v8  ;;  %631 = vmatpush1.msra.mxu0 %v568_v44  ;;  %v546_v4 = vld [vmem:[#allocation11] sm:$0xff]  ;;  %v609_v5 = vld [vmem:[#allocation11 + $0x1f8] sm:$0xff]  ;;  %v608_v6 = vld [vmem:[#allocation11 + $0x1f0] sm:$0xff] }
  0xf2   :  { %511 = vmatprep.subr.mxu1 %v454_v9  ;;  %632 = vmatprep.subr.mxu0 %v567_v45  ;;  %v607_v7 = vld [vmem:[#allocation11 + $0x1e8] sm:$0xff]  ;;  %v606_v8 = vld [vmem:[#allocation11 + $0x1e0] sm:$0xff]  ;;  %v605_v9 = vld [vmem:[#allocation11 + $0x1d8] sm:$0xff] }
  0xf3   :  { %512 = vmatpush2.msra.mxu1 %v453_v10  ;;  %633 = vmatpush1.msra.mxu0 %v566_v46  ;;  %v604_v10 = vld [vmem:[#allocation11 + $0x1d0] sm:$0xff]  ;;  %v585_v42 = vld [vmem:[#allocation11 + $0x138] sm:$0xff]  ;;  %v583_v44 = vld [vmem:[#allocation11 + $0x128] sm:$0xff] }
  0xf4   :  { %513 = vmatprep.subr.mxu1 %v452_v11  ;;  %634 = vmatprep.subr.mxu0 %v565_v47  ;;  %v603_v11 = vld [vmem:[#allocation11 + $0x1c8] sm:$0xff]  ;;  %v584_v43 = vld [vmem:[#allocation11 + $0x130] sm:$0xff]  ;;  %v582_v45 = vld [vmem:[#allocation11 + $0x120] sm:$0xff] }
  0xf5   :  { %514 = vmatpush2.msra.mxu1 %v451_v12  ;;  %635 = vmatpush1.msra.mxu0 %v564_v48  ;;  %v602_v12 = vld [vmem:[#allocation11 + $0x1c0] sm:$0xff]  ;;  %v581_v46 = vld [vmem:[#allocation11 + $0x118] sm:$0xff]  ;;  %v580_v47 = vld [vmem:[#allocation11 + $0x110] sm:$0xff] }
  0xf6   :  { %515 = vmatprep.subr.mxu1 %v450_v13  ;;  %636 = vmatprep.subr.mxu0 %v563_v49  ;;  %v601_v13 = vld [vmem:[#allocation11 + $0x1b8] sm:$0xff]  ;;  %v579_v48 = vld [vmem:[#allocation11 + $0x108] sm:$0xff]  ;;  %v578_v49 = vld [vmem:[#allocation11 + $0x100] sm:$0xff] }
  0xf7   :  { %516 = vmatpush2.msra.mxu1 %v449_v14  ;;  %637 = vmatpush1.msra.mxu0 %v562_v50  ;;  %v600_v14 = vld [vmem:[#allocation11 + $0x1b0] sm:$0xff]  ;;  %v729_v50 = vld [vmem:[#allocation13 + $0xf8] sm:$0xff] }
  0xf8   :  { %517 = vmatprep.subr.mxu1 %v448_v15  ;;  %638 = vmatprep.subr.mxu0 %v561_v51  ;;  %v599_v15 = vld [vmem:[#allocation11 + $0x1a8] sm:$0xff]  ;;  %v728_v51 = vld [vmem:[#allocation13 + $0xf0] sm:$0xff] }
  0xf9   :  { %518 = vmatpush2.msra.mxu1 %v447_v16  ;;  %639 = vmatpush1.msra.mxu0 %v560_v52  ;;  %v598_v16 = vld [vmem:[#allocation11 + $0x1a0] sm:$0xff]  ;;  %v727_v52 = vld [vmem:[#allocation13 + $0xe8] sm:$0xff] }
  0xfa   :  { %519 = vmatprep.subr.mxu1 %v446_v17  ;;  %640 = vmatprep.subr.mxu0 %v559_v53  ;;  %v597_v17 = vld [vmem:[#allocation11 + $0x198] sm:$0xff]  ;;  %v726_v53 = vld [vmem:[#allocation13 + $0xe0] sm:$0xff] }
  0xfb   :  { %520 = vmatpush2.msra.mxu1 %v445_v18  ;;  %641 = vmatpush1.msra.mxu0 %v558_v55  ;;  %v596_v18 = vld [vmem:[#allocation11 + $0x190] sm:$0xff]  ;;  %v725_v55 = vld [vmem:[#allocation13 + $0xd8] sm:$0xff] }
  0xfc   :  { %521 = vmatprep.subr.mxu1 %v444_v19  ;;  %642 = vmatprep.subr.mxu0 %v557_v56  ;;  %v595_v19 = vld [vmem:[#allocation11 + $0x188] sm:$0xff]  ;;  %v724_v56 = vld [vmem:[#allocation13 + $0xd0] sm:$0xff] }
  0xfd   :  { %522 = vmatpush2.msra.mxu1 %v443_v20  ;;  %643 = vmatpush1.msra.mxu0 %v556_v57  ;;  %v594_v20 = vld [vmem:[#allocation11 + $0x180] sm:$0xff]  ;;  %v723_v57 = vld [vmem:[#allocation13 + $0xc8] sm:$0xff] }
  0xfe   :  { %523 = vmatprep.subr.mxu1 %v442_v21  ;;  %644 = vmatprep.subr.mxu0 %v555_v58  ;;  %v593_v21 = vld [vmem:[#allocation11 + $0x178] sm:$0xff]  ;;  %v722_v58 = vld [vmem:[#allocation13 + $0xc0] sm:$0xff] }
  0xff   :  { %524 = vmatpush2.msra.mxu1 %v441_v22  ;;  %645 = vmatpush1.msra.mxu0 %v554_v59  ;;  %v592_v22 = vld [vmem:[#allocation11 + $0x170] sm:$0xff]  ;;  %v721_v59 = vld [vmem:[#allocation13 + $0xb8] sm:$0xff] }
 0x100   :  { %525 = vmatprep.subr.mxu1 %v440_v23  ;;  %646 = vmatprep.subr.mxu0 %v553_v60  ;;  %v591_v23 = vld [vmem:[#allocation11 + $0x168] sm:$0xff]  ;;  %v720_v60 = vld [vmem:[#allocation13 + $0xb0] sm:$0xff] }
 0x101   :  { %526 = vmatpush2.msra.mxu1 %v439_v24  ;;  %647 = vmatpush1.msra.mxu0 %v552_v61  ;;  %v590_v24 = vld [vmem:[#allocation11 + $0x160] sm:$0xff]  ;;  %v719_v61 = vld [vmem:[#allocation13 + $0xa8] sm:$0xff] }
 0x102   :  { %527 = vmatprep.subr.mxu1 %v438_v25  ;;  %648 = vmatprep.subr.mxu0 %v551_v62  ;;  %v589_v25 = vld [vmem:[#allocation11 + $0x158] sm:$0xff]  ;;  %v718_v62 = vld [vmem:[#allocation13 + $0xa0] sm:$0xff] }
 0x103   :  { %528 = vmatpush2.msra.mxu1 %v437_v26  ;;  %649 = vmatpush1.msra.mxu0 %v550_v63  ;;  %v588_v26 = vld [vmem:[#allocation11 + $0x150] sm:$0xff]  ;;  %v717_v63 = vld [vmem:[#allocation13 + $0x98] sm:$0xff] }
 0x104   :  { %529 = vmatprep.subr.mxu1 %v436_v27  ;;  %650 = vmatprep.subr.mxu0 %v549_v1  ;;  %v587_v27 = vld [vmem:[#allocation11 + $0x148] sm:$0xff]  ;;  %v716_v1 = vld [vmem:[#allocation13 + $0x90] sm:$0xff] }
 0x105   :  { %530 = vmatpush2.msra.mxu1 %v435_v28  ;;  %651 = vmatpush1.msra.mxu0 %v548_v2  ;;  %v586_v28 = vld [vmem:[#allocation11 + $0x140] sm:$0xff]  ;;  %v715_v2 = vld [vmem:[#allocation13 + $0x88] sm:$0xff] }
 0x106   :  { %531 = vmatprep.subr.mxu1 %v434_v29  ;;  %652 = vmatprep.subr.mxu0 %v547_v3  ;;  %v314_v29 = vlaneseq  ;;  %v714_v3 = vld [vmem:[#allocation13 + $0x80] sm:$0xff] }
 0x107   :  { %532 = vmatpush2.msra.mxu1 %v433_v30  ;;  %653 = vmatpush1.msra.mxu0 %v546_v4  ;;  %v713_v4 = vld [vmem:[#allocation13 + $0x78] sm:$0xff] }
 0x108   :  { %533 = vmatprep.subr.mxu1 %v432_v31  ;;  %654 = vmatprep.subr.mxu0 %v609_v5  ;;  %v2919_v30 = vshrl.u32 %v314_v29, 7  ;;  %v712_v5 = vld [vmem:[#allocation13 + $0x70] sm:$0xff] }
 0x109   :  { %534 = vmatpush2.msra.mxu1 %v431_v32  ;;  %655 = vmatpush2.msra.mxu0 %v608_v6  ;;  %v312_v32 = vld [vmem:[#allocation7] sm:$0x3]  ;;  %v711_v6 = vld [vmem:[#allocation13 + $0x68] sm:$0xff] }
 0x10a   :  { %535 = vmatprep.subr.mxu1 %v430_v33  ;;  %656 = vmatprep.subr.mxu0 %v607_v7  ;;  %v2922_v31 = vsub.s32 0, %v2919_v30  ;;  %v2925_v33 = vsub.s32 1, %v2919_v30  ;;  %v710_v7 = vld [vmem:[#allocation13 + $0x60] sm:$0xff] }
 0x10b   :  { %536 = vmatpush2.msra.mxu1 %v429_v34  ;;  %657 = vmatpush2.msra.mxu0 %v606_v8  ;;  %v709_v8 = vld [vmem:[#allocation13 + $0x58] sm:$0xff] }
 0x10c   :  { %658 = vmatprep.subr.mxu0 %v605_v9  ;;  %v317_v34 = vrot.slane %v312_v32, %v2922_v31  ;;  %v321_v35 = vrot.slane %v312_v32, %v2925_v33  ;;  %774 = vmatprep.subr.mxu1 %v729_v50  ;;  %v708_v9 = vld [vmem:[#allocation13 + $0x50] sm:$0xff]  ;;  %v743_v50 = vld [vmem:[#allocation13 + $0x168] sm:$0xff] }
 0x10d   :  { %659 = vmatpush2.msra.mxu0 %v604_v10  ;;  %v707_v10 = vld [vmem:[#allocation13 + $0x48] sm:$0xff] }
 0x10e   :  { %660 = vmatprep.subr.mxu0 %v603_v11  ;;  %v706_v11 = vld [vmem:[#allocation13 + $0x40] sm:$0xff] }
 0x10f   :  { %661 = vmatpush2.msra.mxu0 %v602_v12  ;;  %v705_v12 = vld [vmem:[#allocation13 + $0x38] sm:$0xff] }
 0x110   :  { %662 = vmatprep.subr.mxu0 %v601_v13  ;;  %v704_v13 = vld [vmem:[#allocation13 + $0x30] sm:$0xff] }
 0x111   :  { %663 = vmatpush2.msra.mxu0 %v600_v14  ;;  %v703_v14 = vld [vmem:[#allocation13 + $0x28] sm:$0xff] }
 0x112   :  { %664 = vmatprep.subr.mxu0 %v599_v15  ;;  %v702_v15 = vld [vmem:[#allocation13 + $0x20] sm:$0xff] }
 0x113   :  { %665 = vmatpush2.msra.mxu0 %v598_v16  ;;  %v701_v16 = vld [vmem:[#allocation13 + $0x18] sm:$0xff] }
 0x114   :  { %666 = vmatprep.subr.mxu0 %v597_v17  ;;  %v700_v17 = vld [vmem:[#allocation13 + $0x10] sm:$0xff] }
 0x115   :  { %667 = vmatpush2.msra.mxu0 %v596_v18  ;;  %v699_v18 = vld [vmem:[#allocation13 + $0x8] sm:$0xff] }
 0x116   :  { %668 = vmatprep.subr.mxu0 %v595_v19  ;;  %v698_v19 = vld [vmem:[#allocation13] sm:$0xff] }
 0x117   :  { %669 = vmatpush2.msra.mxu0 %v594_v20  ;;  %v761_v20 = vld [vmem:[#allocation13 + $0x1f8] sm:$0xff] }
 0x118   :  { %670 = vmatprep.subr.mxu0 %v593_v21  ;;  %v760_v21 = vld [vmem:[#allocation13 + $0x1f0] sm:$0xff] }
 0x119   :  { %671 = vmatpush2.msra.mxu0 %v592_v22  ;;  %v759_v22 = vld [vmem:[#allocation13 + $0x1e8] sm:$0xff] }
 0x11a   :  { %672 = vmatprep.subr.mxu0 %v591_v23  ;;  %v758_v23 = vld [vmem:[#allocation13 + $0x1e0] sm:$0xff] }
 0x11b   :  { %673 = vmatpush2.msra.mxu0 %v590_v24  ;;  %v461_v24 = vld [vmem:[#allocation10] sm:$0x3] }
 0x11c   :  { %674 = vmatprep.subr.mxu0 %v589_v25  ;;  %v466_v25 = vrot.slane %v461_v24, %v2922_v31 }
 0x11d   :  { %675 = vmatpush2.msra.mxu0 %v588_v26  ;;  %v470_v26 = vrot.slane %v461_v24, %v2925_v33  ;;  %v857_v24 = vld [vmem:[#allocation14 + $0x50] sm:$0xff] }
 0x11e   :  { %676 = vmatprep.subr.mxu0 %v587_v27 }
 0x11f   :  { %677 = vmatpush2.msra.mxu0 %v586_v28 }
 0x120   :  { %678 = vmatprep.subr.mxu0 %v585_v42  ;;  %v751_v42 = vld [vmem:[#allocation13 + $0x1a8] sm:$0xff] }
 0x121   :  { %679 = vmatpush2.msra.mxu0 %v584_v43  ;;  %v750_v43 = vld [vmem:[#allocation13 + $0x1a0] sm:$0xff] }
 0x122   :  { %680 = vmatprep.subr.mxu0 %v583_v44  ;;  %v749_v44 = vld [vmem:[#allocation13 + $0x198] sm:$0xff] }
 0x123   :  { %681 = vmatpush2.msra.mxu0 %v582_v45  ;;  %v748_v45 = vld [vmem:[#allocation13 + $0x190] sm:$0xff] }
 0x124   :  { %682 = vmatprep.subr.mxu0 %v581_v46  ;;  %v747_v46 = vld [vmem:[#allocation13 + $0x188] sm:$0xff] }
 0x125   :  { %683 = vmatpush2.msra.mxu0 %v580_v47  ;;  %v746_v47 = vld [vmem:[#allocation13 + $0x180] sm:$0xff] }
 0x126   :  { %684 = vmatprep.subr.mxu0 %v579_v48  ;;  %v745_v48 = vld [vmem:[#allocation13 + $0x178] sm:$0xff] }
 0x127   :  { %685 = vmatpush2.msra.mxu0 %v578_v49  ;;  %v744_v49 = vld [vmem:[#allocation13 + $0x170] sm:$0xff] }
 0x1a7   :  { %v390_v36 = vpop.f32.mrf.mxu0 }
 0x1a8   :  { %v391_v37 = vadd.f32 %v390_v36, %v317_v34  ;;  %v757_v36 = vld [vmem:[#allocation13 + $0x1d8] sm:$0xff] }
 0x1a9   :  { %v392_v38 = vpop.f32.mrf.mxu0 }
 0x1aa   :  { %v393_v39 = vadd.f32 %v392_v38, %v321_v35  ;;  %v395_v41 = vmax.f32 %v391_v37, 0.0  ;;  %v756_v37 = vld [vmem:[#allocation13 + $0x1d0] sm:$0xff]  ;;  %v755_v38 = vld [vmem:[#allocation13 + $0x1c8] sm:$0xff] }
 0x1ac   :  { %v396_v40 = vmax.f32 %v393_v39, 0.0  ;;  %v754_v39 = vld [vmem:[#allocation13 + $0x1c0] sm:$0xff] }
 0x1ae   :  { %537 = vmatprep.mubr.f32.mxu1 %v396_v40  ;;  %v753_v40 = vld [vmem:[#allocation13 + $0x1b8] sm:$0xff] }
 0x1af   :  { %538 = vmatmul.mubr.f32.vlgmr.msra.gmra.mxu1 %v395_v41  ;;  %v752_v41 = vld [vmem:[#allocation13 + $0x1b0] sm:$0xff] }
 0x1b0   :  { %775 = vmatpush1.msra.mxu1 %v728_v51  ;;  %v742_v51 = vld [vmem:[#allocation13 + $0x160] sm:$0xff] }
 0x1b1   :  { %776 = vmatprep.subr.mxu1 %v727_v52  ;;  %v741_v52 = vld [vmem:[#allocation13 + $0x158] sm:$0xff] }
 0x1b2   :  { %777 = vmatpush1.msra.mxu1 %v726_v53  ;;  %v740_v53 = vld [vmem:[#allocation13 + $0x150] sm:$0xff] }
 0x1b3   :  { %778 = vmatprep.subr.mxu1 %v725_v55  ;;  %v739_v55 = vld [vmem:[#allocation13 + $0x148] sm:$0xff] }
 0x1b4   :  { %779 = vmatpush1.msra.mxu1 %v724_v56  ;;  %v738_v56 = vld [vmem:[#allocation13 + $0x140] sm:$0xff] }
 0x1b5   :  { %780 = vmatprep.subr.mxu1 %v723_v57  ;;  %v737_v57 = vld [vmem:[#allocation13 + $0x138] sm:$0xff] }
 0x1b6   :  { %781 = vmatpush1.msra.mxu1 %v722_v58  ;;  %v736_v58 = vld [vmem:[#allocation13 + $0x130] sm:$0xff] }
 0x1b7   :  { %782 = vmatprep.subr.mxu1 %v721_v59  ;;  %v735_v59 = vld [vmem:[#allocation13 + $0x128] sm:$0xff] }
 0x1b8   :  { %783 = vmatpush1.msra.mxu1 %v720_v60  ;;  %v734_v60 = vld [vmem:[#allocation13 + $0x120] sm:$0xff] }
 0x1b9   :  { %784 = vmatprep.subr.mxu1 %v719_v61  ;;  %v733_v61 = vld [vmem:[#allocation13 + $0x118] sm:$0xff] }
 0x1ba   :  { %785 = vmatpush1.msra.mxu1 %v718_v62  ;;  %v732_v62 = vld [vmem:[#allocation13 + $0x110] sm:$0xff] }
 0x1bb   :  { %786 = vmatprep.subr.mxu1 %v717_v63  ;;  %v731_v63 = vld [vmem:[#allocation13 + $0x108] sm:$0xff] }
 0x1bc   :  { %787 = vmatpush1.msra.mxu1 %v716_v1  ;;  %v730_v1 = vld [vmem:[#allocation13 + $0x100] sm:$0xff] }
 0x1bd   :  { %788 = vmatprep.subr.mxu1 %v715_v2  ;;  %v1025_v2 = vld [vmem:[#allocation16 + $0xf8] sm:$0xff] }
 0x1be   :  { %789 = vmatpush1.msra.mxu1 %v714_v3  ;;  %v878_v3 = vld [vmem:[#allocation14 + $0xf8] sm:$0xff] }
 0x1bf   :  { %790 = vmatprep.subr.mxu1 %v713_v4  ;;  %v877_v4 = vld [vmem:[#allocation14 + $0xf0] sm:$0xff]  ;;  %923 = vmatprep.subr.mxu0 %v878_v3 }
 0x1c0   :  { %791 = vmatpush1.msra.mxu1 %v712_v5  ;;  %v876_v5 = vld [vmem:[#allocation14 + $0xe8] sm:$0xff] }
 0x1c1   :  { %792 = vmatprep.subr.mxu1 %v711_v6  ;;  %v875_v6 = vld [vmem:[#allocation14 + $0xe0] sm:$0xff] }
 0x1c2   :  { %793 = vmatpush1.msra.mxu1 %v710_v7  ;;  %v874_v7 = vld [vmem:[#allocation14 + $0xd8] sm:$0xff] }
 0x1c3   :  { %794 = vmatprep.subr.mxu1 %v709_v8  ;;  %v873_v8 = vld [vmem:[#allocation14 + $0xd0] sm:$0xff] }
 0x1c4   :  { %795 = vmatpush1.msra.mxu1 %v708_v9  ;;  %v872_v9 = vld [vmem:[#allocation14 + $0xc8] sm:$0xff] }
 0x1c5   :  { %796 = vmatprep.subr.mxu1 %v707_v10  ;;  %v871_v10 = vld [vmem:[#allocation14 + $0xc0] sm:$0xff] }
 0x1c6   :  { %797 = vmatpush1.msra.mxu1 %v706_v11  ;;  %v870_v11 = vld [vmem:[#allocation14 + $0xb8] sm:$0xff] }
 0x1c7   :  { %798 = vmatprep.subr.mxu1 %v705_v12  ;;  %v869_v12 = vld [vmem:[#allocation14 + $0xb0] sm:$0xff] }
 0x1c8   :  { %799 = vmatpush1.msra.mxu1 %v704_v13  ;;  %v868_v13 = vld [vmem:[#allocation14 + $0xa8] sm:$0xff] }
 0x1c9   :  { %800 = vmatprep.subr.mxu1 %v703_v14  ;;  %v867_v14 = vld [vmem:[#allocation14 + $0xa0] sm:$0xff] }
 0x1ca   :  { %801 = vmatpush1.msra.mxu1 %v702_v15  ;;  %v866_v15 = vld [vmem:[#allocation14 + $0x98] sm:$0xff] }
 0x1cb   :  { %802 = vmatprep.subr.mxu1 %v701_v16  ;;  %v865_v16 = vld [vmem:[#allocation14 + $0x90] sm:$0xff] }
 0x1cc   :  { %803 = vmatpush1.msra.mxu1 %v700_v17  ;;  %v864_v17 = vld [vmem:[#allocation14 + $0x88] sm:$0xff] }
 0x1cd   :  { %804 = vmatprep.subr.mxu1 %v699_v18  ;;  %v863_v18 = vld [vmem:[#allocation14 + $0x80] sm:$0xff] }
 0x1ce   :  { %805 = vmatpush1.msra.mxu1 %v698_v19  ;;  %v862_v19 = vld [vmem:[#allocation14 + $0x78] sm:$0xff] }
 0x1cf   :  { %806 = vmatprep.subr.mxu1 %v761_v20  ;;  %v861_v20 = vld [vmem:[#allocation14 + $0x70] sm:$0xff] }
 0x1d0   :  { %807 = vmatpush2.msra.mxu1 %v760_v21  ;;  %v860_v21 = vld [vmem:[#allocation14 + $0x68] sm:$0xff] }
 0x1d1   :  { %808 = vmatprep.subr.mxu1 %v759_v22  ;;  %v859_v22 = vld [vmem:[#allocation14 + $0x60] sm:$0xff] }
 0x1d2   :  { %809 = vmatpush2.msra.mxu1 %v758_v23  ;;  %v858_v23 = vld [vmem:[#allocation14 + $0x58] sm:$0xff] }
 0x1d3   :  { %810 = vmatprep.subr.mxu1 %v757_v36  ;;  %v848_v36 = vld [vmem:[#allocation14 + $0x8] sm:$0xff] }
 0x1d4   :  { %811 = vmatpush2.msra.mxu1 %v756_v37  ;;  %v847_v37 = vld [vmem:[#allocation14] sm:$0xff] }
 0x1d5   :  { %812 = vmatprep.subr.mxu1 %v755_v38  ;;  %v910_v38 = vld [vmem:[#allocation14 + $0x1f8] sm:$0xff] }
 0x1d6   :  { %813 = vmatpush2.msra.mxu1 %v754_v39  ;;  %v909_v39 = vld [vmem:[#allocation14 + $0x1f0] sm:$0xff] }
 0x1d7   :  { %814 = vmatprep.subr.mxu1 %v753_v40  ;;  %v908_v40 = vld [vmem:[#allocation14 + $0x1e8] sm:$0xff] }
 0x1d8   :  { %815 = vmatpush2.msra.mxu1 %v752_v41  ;;  %v907_v41 = vld [vmem:[#allocation14 + $0x1e0] sm:$0xff] }
 0x1d9   :  { %816 = vmatprep.subr.mxu1 %v751_v42  ;;  %v906_v42 = vld [vmem:[#allocation14 + $0x1d8] sm:$0xff] }
 0x1da   :  { %817 = vmatpush2.msra.mxu1 %v750_v43  ;;  %v905_v43 = vld [vmem:[#allocation14 + $0x1d0] sm:$0xff] }
 0x1db   :  { %818 = vmatprep.subr.mxu1 %v749_v44  ;;  %v904_v44 = vld [vmem:[#allocation14 + $0x1c8] sm:$0xff] }
 0x1dc   :  { %819 = vmatpush2.msra.mxu1 %v748_v45  ;;  %v903_v45 = vld [vmem:[#allocation14 + $0x1c0] sm:$0xff] }
 0x1dd   :  { %820 = vmatprep.subr.mxu1 %v747_v46  ;;  %v902_v46 = vld [vmem:[#allocation14 + $0x1b8] sm:$0xff] }
 0x1de   :  { %821 = vmatpush2.msra.mxu1 %v746_v47  ;;  %v901_v47 = vld [vmem:[#allocation14 + $0x1b0] sm:$0xff] }
 0x1df   :  { %822 = vmatprep.subr.mxu1 %v745_v48  ;;  %v900_v48 = vld [vmem:[#allocation14 + $0x1a8] sm:$0xff] }
 0x1e0   :  { %823 = vmatpush2.msra.mxu1 %v744_v49  ;;  %v899_v49 = vld [vmem:[#allocation14 + $0x1a0] sm:$0xff] }
 0x1e1   :  { %824 = vmatprep.subr.mxu1 %v743_v50  ;;  %v898_v50 = vld [vmem:[#allocation14 + $0x198] sm:$0xff] }
 0x1e2   :  { %825 = vmatpush2.msra.mxu1 %v742_v51  ;;  %v897_v51 = vld [vmem:[#allocation14 + $0x190] sm:$0xff] }
 0x1e3   :  { %826 = vmatprep.subr.mxu1 %v741_v52  ;;  %v896_v52 = vld [vmem:[#allocation14 + $0x188] sm:$0xff] }
 0x1e4   :  { %827 = vmatpush2.msra.mxu1 %v740_v53  ;;  %v895_v53 = vld [vmem:[#allocation14 + $0x180] sm:$0xff] }
 0x1e5   :  { %828 = vmatprep.subr.mxu1 %v739_v55  ;;  %v894_v55 = vld [vmem:[#allocation14 + $0x178] sm:$0xff] }
 0x1e6   :  { %829 = vmatpush2.msra.mxu1 %v738_v56  ;;  %v893_v56 = vld [vmem:[#allocation14 + $0x170] sm:$0xff] }
 0x1e7   :  { %830 = vmatprep.subr.mxu1 %v737_v57  ;;  %v892_v57 = vld [vmem:[#allocation14 + $0x168] sm:$0xff] }
 0x1e8   :  { %831 = vmatpush2.msra.mxu1 %v736_v58  ;;  %v891_v58 = vld [vmem:[#allocation14 + $0x160] sm:$0xff] }
 0x1e9   :  { %832 = vmatprep.subr.mxu1 %v735_v59  ;;  %v890_v59 = vld [vmem:[#allocation14 + $0x158] sm:$0xff] }
 0x1ea   :  { %833 = vmatpush2.msra.mxu1 %v734_v60  ;;  %v889_v60 = vld [vmem:[#allocation14 + $0x150] sm:$0xff] }
 0x1eb   :  { %834 = vmatprep.subr.mxu1 %v733_v61  ;;  %v888_v61 = vld [vmem:[#allocation14 + $0x148] sm:$0xff] }
 0x1ec   :  { %835 = vmatpush2.msra.mxu1 %v732_v62  ;;  %v887_v62 = vld [vmem:[#allocation14 + $0x140] sm:$0xff] }
 0x1ed   :  { %836 = vmatprep.subr.mxu1 %v731_v63  ;;  %v886_v63 = vld [vmem:[#allocation14 + $0x138] sm:$0xff] }
 0x1ee   :  { %837 = vmatpush2.msra.mxu1 %v730_v1  ;;  %v610_v1 = vld [vmem:[%s3071_s27] sm:$0x3] }
 0x1ef   :  { %1038 = vmatprep.subr.mxu1 %v1025_v2  ;;  %v619_v2 = vrot.slane %v610_v1, %v2925_v33 }
 0x26f   :  { %v539_v27 = vpop.f32.mrf.mxu1 }
 0x270   :  { %v540_v28 = vadd.f32 %v539_v27, %v466_v25  ;;  %v856_v25 = vld [vmem:[#allocation14 + $0x48] sm:$0xff]  ;;  %v854_v27 = vld [vmem:[#allocation14 + $0x38] sm:$0xff] }
 0x271   :  { %v541_v29 = vpop.f32.mrf.mxu1 }
 0x272   :  { %v542_v32 = vadd.f32 %v541_v29, %v470_v26  ;;  %v544_v35 = vmax.f32 %v540_v28, 0.0  ;;  %v855_v26 = vld [vmem:[#allocation14 + $0x40] sm:$0xff]  ;;  %v853_v28 = vld [vmem:[#allocation14 + $0x30] sm:$0xff]  ;;  %v852_v29 = vld [vmem:[#allocation14 + $0x28] sm:$0xff] }
 0x274   :  { %v545_v34 = vmax.f32 %v542_v32, 0.0  ;;  %v851_v32 = vld [vmem:[#allocation14 + $0x20] sm:$0xff] }
 0x276   :  { %686 = vmatprep.mubr.f32.mxu0 %v545_v34  ;;  %v850_v34 = vld [vmem:[#allocation14 + $0x18] sm:$0xff] }
 0x277   :  { %687 = vmatmul.mubr.f32.vlgmr.msra.gmra.mxu0 %v544_v35  ;;  %v849_v35 = vld [vmem:[#allocation14 + $0x10] sm:$0xff] }
 0x278   :  { %924 = vmatpush1.msra.mxu0 %v877_v4 }
 0x279   :  { %925 = vmatprep.subr.mxu0 %v876_v5 }
 0x27a   :  { %926 = vmatpush1.msra.mxu0 %v875_v6 }
 0x27b   :  { %927 = vmatprep.subr.mxu0 %v874_v7 }
 0x27c   :  { %928 = vmatpush1.msra.mxu0 %v873_v8  ;;  %v615_v8 = vrot.slane %v610_v1, %v2922_v31 }
 0x27d   :  { %929 = vmatprep.subr.mxu0 %v872_v9  ;;  %v2936_v9 = vld [vmem:[#allocation2 + $0x8] sm:$0xff] }
 0x27e   :  { %930 = vmatpush1.msra.mxu0 %v871_v10 }
 0x27f   :  { %931 = vmatprep.subr.mxu0 %v870_v11 }
 0x280   :  { %932 = vmatpush1.msra.mxu0 %v869_v12 }
 0x281   :  { %933 = vmatprep.subr.mxu0 %v868_v13 }
 0x282   :  { %934 = vmatpush1.msra.mxu0 %v867_v14  ;;  %v1024_v14 = vld [vmem:[#allocation16 + $0xf0] sm:$0xff] }
 0x283   :  { %935 = vmatprep.subr.mxu0 %v866_v15  ;;  %v1023_v15 = vld [vmem:[#allocation16 + $0xe8] sm:$0xff] }
 0x284   :  { %936 = vmatpush1.msra.mxu0 %v865_v16  ;;  %v1022_v16 = vld [vmem:[#allocation16 + $0xe0] sm:$0xff] }
 0x285   :  { %937 = vmatprep.subr.mxu0 %v864_v17  ;;  %v1021_v17 = vld [vmem:[#allocation16 + $0xd8] sm:$0xff] }
 0x286   :  { %938 = vmatpush1.msra.mxu0 %v863_v18  ;;  %v1020_v18 = vld [vmem:[#allocation16 + $0xd0] sm:$0xff] }
 0x287   :  { %939 = vmatprep.subr.mxu0 %v862_v19  ;;  %v1019_v19 = vld [vmem:[#allocation16 + $0xc8] sm:$0xff] }
 0x288   :  { %940 = vmatpush1.msra.mxu0 %v861_v20  ;;  %v1018_v20 = vld [vmem:[#allocation16 + $0xc0] sm:$0xff] }
 0x289   :  { %941 = vmatprep.subr.mxu0 %v860_v21  ;;  %v1017_v21 = vld [vmem:[#allocation16 + $0xb8] sm:$0xff] }
 0x28a   :  { %942 = vmatpush1.msra.mxu0 %v859_v22  ;;  %v1016_v22 = vld [vmem:[#allocation16 + $0xb0] sm:$0xff] }
 0x28b   :  { %943 = vmatprep.subr.mxu0 %v858_v23  ;;  %v1015_v23 = vld [vmem:[#allocation16 + $0xa8] sm:$0xff] }
 0x28c   :  { %944 = vmatpush1.msra.mxu0 %v857_v24  ;;  %v1014_v24 = vld [vmem:[#allocation16 + $0xa0] sm:$0xff] }
 0x28d   :  { %945 = vmatprep.subr.mxu0 %v856_v25  ;;  %v1012_v25 = vld [vmem:[#allocation16 + $0x90] sm:$0xff] }
 0x28e   :  { %946 = vmatpush1.msra.mxu0 %v855_v26  ;;  %v1011_v26 = vld [vmem:[#allocation16 + $0x88] sm:$0xff] }
 0x28f   :  { %947 = vmatprep.subr.mxu0 %v854_v27  ;;  %v1010_v27 = vld [vmem:[#allocation16 + $0x80] sm:$0xff] }
 0x290   :  { %948 = vmatpush1.msra.mxu0 %v853_v28  ;;  %v1009_v28 = vld [vmem:[#allocation16 + $0x78] sm:$0xff] }
 0x291   :  { %949 = vmatprep.subr.mxu0 %v852_v29  ;;  %v1008_v29 = vld [vmem:[#allocation16 + $0x70] sm:$0xff] }
 0x292   :  { %950 = vmatpush1.msra.mxu0 %v851_v32  ;;  %v1007_v32 = vld [vmem:[#allocation16 + $0x68] sm:$0xff] }
 0x293   :  { %951 = vmatprep.subr.mxu0 %v850_v34  ;;  %v1006_v34 = vld [vmem:[#allocation16 + $0x60] sm:$0xff] }
 0x294   :  { %952 = vmatpush1.msra.mxu0 %v849_v35  ;;  %v1005_v35 = vld [vmem:[#allocation16 + $0x58] sm:$0xff] }
 0x295   :  { %953 = vmatprep.subr.mxu0 %v848_v36  ;;  %v1004_v36 = vld [vmem:[#allocation16 + $0x50] sm:$0xff] }
 0x296   :  { %954 = vmatpush1.msra.mxu0 %v847_v37  ;;  %v1003_v37 = vld [vmem:[#allocation16 + $0x48] sm:$0xff] }
 0x297   :  { %955 = vmatprep.subr.mxu0 %v910_v38  ;;  %v1002_v38 = vld [vmem:[#allocation16 + $0x40] sm:$0xff] }
 0x298   :  { %956 = vmatpush2.msra.mxu0 %v909_v39  ;;  %v1001_v39 = vld [vmem:[#allocation16 + $0x38] sm:$0xff] }
 0x299   :  { %957 = vmatprep.subr.mxu0 %v908_v40  ;;  %v1000_v40 = vld [vmem:[#allocation16 + $0x30] sm:$0xff] }
 0x29a   :  { %958 = vmatpush2.msra.mxu0 %v907_v41  ;;  %v999_v41 = vld [vmem:[#allocation16 + $0x28] sm:$0xff] }
 0x29b   :  { %959 = vmatprep.subr.mxu0 %v906_v42  ;;  %v998_v42 = vld [vmem:[#allocation16 + $0x20] sm:$0xff] }
 0x29c   :  { %960 = vmatpush2.msra.mxu0 %v905_v43  ;;  %v997_v43 = vld [vmem:[#allocation16 + $0x18] sm:$0xff] }
 0x29d   :  { %961 = vmatprep.subr.mxu0 %v904_v44  ;;  %v996_v44 = vld [vmem:[#allocation16 + $0x10] sm:$0xff] }
 0x29e   :  { %962 = vmatpush2.msra.mxu0 %v903_v45  ;;  %v995_v45 = vld [vmem:[#allocation16 + $0x8] sm:$0xff] }
 0x29f   :  { %963 = vmatprep.subr.mxu0 %v902_v46  ;;  %v994_v46 = vld [vmem:[#allocation16] sm:$0xff] }
 0x2a0   :  { %964 = vmatpush2.msra.mxu0 %v901_v47  ;;  %v2941_v47 = vld [vmem:[#allocation2] sm:$0xff] }
 0x2a1   :  { %965 = vmatprep.subr.mxu0 %v900_v48  ;;  %v885_v48 = vld [vmem:[#allocation14 + $0x130] sm:$0xff] }
 0x2a2   :  { %966 = vmatpush2.msra.mxu0 %v899_v49  ;;  %v884_v49 = vld [vmem:[#allocation14 + $0x128] sm:$0xff] }
 0x2a3   :  { %967 = vmatprep.subr.mxu0 %v898_v50  ;;  %v883_v50 = vld [vmem:[#allocation14 + $0x120] sm:$0xff] }
 0x2a4   :  { %968 = vmatpush2.msra.mxu0 %v897_v51  ;;  %v882_v51 = vld [vmem:[#allocation14 + $0x118] sm:$0xff] }
 0x2a5   :  { %969 = vmatprep.subr.mxu0 %v896_v52  ;;  %v881_v52 = vld [vmem:[#allocation14 + $0x110] sm:$0xff] }
 0x2a6   :  { %970 = vmatpush2.msra.mxu0 %v895_v53  ;;  %v880_v53 = vld [vmem:[#allocation14 + $0x108] sm:$0xff] }
 0x2a7   :  { %971 = vmatprep.subr.mxu0 %v894_v55  ;;  %v879_v55 = vld [vmem:[#allocation14 + $0x100] sm:$0xff] }
 0x2a8   :  { %972 = vmatpush2.msra.mxu0 %v893_v56  ;;  %v1142_v56 = vld [vmem:[#allocation17 + $0xf8] sm:$0xff] }
 0x2a9   :  { %973 = vmatprep.subr.mxu0 %v892_v57  ;;  %v762_v57 = vld [vmem:[%s3072_s26] sm:$0x3] }
 0x2aa   :  { %974 = vmatpush2.msra.mxu0 %v891_v58  ;;  %v767_v58 = vrot.slane %v762_v57, %v2922_v31 }
 0x2ab   :  { %975 = vmatprep.subr.mxu0 %v890_v59  ;;  %v771_v59 = vrot.slane %v762_v57, %v2925_v33  ;;  %v1162_v57 = vld [vmem:[#allocation17 + $0x198] sm:$0xff] }
 0x2ac   :  { %976 = vmatpush2.msra.mxu0 %v889_v60 }
 0x2ad   :  { %977 = vmatprep.subr.mxu0 %v888_v61 }
 0x2ae   :  { %978 = vmatpush2.msra.mxu0 %v887_v62 }
 0x2af   :  { %979 = vmatprep.subr.mxu0 %v886_v63 }
 0x2b0   :  { %980 = vmatpush2.msra.mxu0 %v885_v48  ;;  %v1170_v48 = vld [vmem:[#allocation17 + $0x1d8] sm:$0xff] }
 0x2b1   :  { %981 = vmatprep.subr.mxu0 %v884_v49  ;;  %v1169_v49 = vld [vmem:[#allocation17 + $0x1d0] sm:$0xff] }
 0x2b2   :  { %982 = vmatpush2.msra.mxu0 %v883_v50  ;;  %v1168_v50 = vld [vmem:[#allocation17 + $0x1c8] sm:$0xff] }
 0x2b3   :  { %983 = vmatprep.subr.mxu0 %v882_v51  ;;  %v1167_v51 = vld [vmem:[#allocation17 + $0x1c0] sm:$0xff] }
 0x2b4   :  { %984 = vmatpush2.msra.mxu0 %v881_v52  ;;  %v1166_v52 = vld [vmem:[#allocation17 + $0x1b8] sm:$0xff] }
 0x2b5   :  { %985 = vmatprep.subr.mxu0 %v880_v53  ;;  %v1165_v53 = vld [vmem:[#allocation17 + $0x1b0] sm:$0xff] }
 0x2b6   :  { %986 = vmatpush2.msra.mxu0 %v879_v55  ;;  %v1164_v55 = vld [vmem:[#allocation17 + $0x1a8] sm:$0xff] }
 0x2b7   :  { %1187 = vmatprep.subr.mxu0 %v1142_v56  ;;  %v1163_v56 = vld [vmem:[#allocation17 + $0x1a0] sm:$0xff] }
 0x337   :  { %v688_v3 = vpop.f32.mrf.mxu0 }
 0x338   :  { %v689_v11 = vadd.f32 %v688_v3, %v615_v8  ;;  %v1141_v3 = vld [vmem:[#allocation17 + $0xf0] sm:$0xff]  ;;  %v1136_v8 = vld [vmem:[#allocation17 + $0xc8] sm:$0xff] }
 0x339   :  { %v690_v4 = vpop.f32.mrf.mxu0 }
 0x33a   :  { %v691_v5 = vadd.f32 %v690_v4, %v619_v2  ;;  %v1140_v4 = vld [vmem:[#allocation17 + $0xe8] sm:$0xff] }
 0x33c   :  { %v693_v6 = vmul.f32 0.5, %v691_v5  ;;  %v1139_v5 = vld [vmem:[#allocation17 + $0xe0] sm:$0xff] }
 0x33e   :  { %v694_v7 = vmul.f32 1.442695, %v693_v6  ;;  %v1138_v6 = vld [vmem:[#allocation17 + $0xd8] sm:$0xff] }
 0x340   :  { %2329 = vpow2.f32 %v694_v7  ;;  %v1137_v7 = vld [vmem:[#allocation17 + $0xd0] sm:$0xff] }
 0x34d   :  { %v2330_v10 = vpop.eup %2329 }
 0x34e   :  { %v696_v12 = vmul.f32 %v2330_v10, %v2936_v9  ;;  %v1135_v10 = vld [vmem:[#allocation17 + $0xc0] sm:$0xff] }
 0x350   :  { %v697_v13 = vadd.f32 %v696_v12, %v689_v11  ;;  %v1134_v11 = vld [vmem:[#allocation17 + $0xb8] sm:$0xff]  ;;  %v1133_v12 = vld [vmem:[#allocation17 + $0xb0] sm:$0xff] }
 0x352   :  { %838 = vmatprep.mubr.f32.mxu1 %v697_v13  ;;  %v1132_v13 = vld [vmem:[#allocation17 + $0xa8] sm:$0xff] }
 0x353   :  { %839 = vmatmul.mubr.f32.vlgmr.msra.gmra.mxu1 %v2916_v54  ;;  %v1013_v54 = vld [vmem:[#allocation16 + $0x98] sm:$0xff] }
 0x354   :  { %1039 = vmatpush1.msra.mxu1 %v1024_v14  ;;  %1102 = vmatprep.mubr.f32.mxu1 %v2704_v0  ;;  %v1131_v14 = vld [vmem:[#allocation17 + $0xa0] sm:$0xff] }
 0x355   :  { %1040 = vmatprep.subr.mxu1 %v1023_v15  ;;  %v1130_v15 = vld [vmem:[#allocation17 + $0x98] sm:$0xff] }
 0x356   :  { %1041 = vmatpush1.msra.mxu1 %v1022_v16  ;;  %v1129_v16 = vld [vmem:[#allocation17 + $0x90] sm:$0xff] }
 0x357   :  { %1042 = vmatprep.subr.mxu1 %v1021_v17  ;;  %v1128_v17 = vld [vmem:[#allocation17 + $0x88] sm:$0xff] }
 0x358   :  { %1043 = vmatpush1.msra.mxu1 %v1020_v18  ;;  %v1127_v18 = vld [vmem:[#allocation17 + $0x80] sm:$0xff] }
 0x359   :  { %1044 = vmatprep.subr.mxu1 %v1019_v19  ;;  %v1126_v19 = vld [vmem:[#allocation17 + $0x78] sm:$0xff] }
 0x35a   :  { %1045 = vmatpush1.msra.mxu1 %v1018_v20  ;;  %v1125_v20 = vld [vmem:[#allocation17 + $0x70] sm:$0xff] }
 0x35b   :  { %1046 = vmatprep.subr.mxu1 %v1017_v21  ;;  %v1124_v21 = vld [vmem:[#allocation17 + $0x68] sm:$0xff] }
 0x35c   :  { %1047 = vmatpush1.msra.mxu1 %v1016_v22  ;;  %v1123_v22 = vld [vmem:[#allocation17 + $0x60] sm:$0xff] }
 0x35d   :  { %1048 = vmatprep.subr.mxu1 %v1015_v23  ;;  %v1122_v23 = vld [vmem:[#allocation17 + $0x58] sm:$0xff] }
 0x35e   :  { %1049 = vmatpush1.msra.mxu1 %v1014_v24  ;;  %v1121_v24 = vld [vmem:[#allocation17 + $0x50] sm:$0xff] }
 0x35f   :  { %1050 = vmatprep.subr.mxu1 %v1013_v54  ;;  %v1120_v54 = vld [vmem:[#allocation17 + $0x48] sm:$0xff] }
 0x360   :  { %1051 = vmatpush1.msra.mxu1 %v1012_v25  ;;  %v1119_v25 = vld [vmem:[#allocation17 + $0x40] sm:$0xff] }
 0x361   :  { %1052 = vmatprep.subr.mxu1 %v1011_v26  ;;  %v2953_v26 = vld [vmem:[%s3039_s12] sm:$0x3] }
 0x362   :  { %1053 = vmatpush1.msra.mxu1 %v1010_v27  ;;  %v1118_v27 = vld [vmem:[#allocation17 + $0x38] sm:$0xff] }
 0x363   :  { %1054 = vmatprep.subr.mxu1 %v1009_v28  ;;  %v1117_v28 = vld [vmem:[#allocation17 + $0x30] sm:$0xff] }
 0x364   :  { %1055 = vmatpush1.msra.mxu1 %v1008_v29  ;;  %v1116_v29 = vld [vmem:[#allocation17 + $0x28] sm:$0xff] }
 0x365   :  { %1056 = vmatprep.subr.mxu1 %v1007_v32  ;;  %v1035_v32 = vrot.slane %v2953_v26, %v2925_v33 }
 0x366   :  { %1057 = vmatpush1.msra.mxu1 %v1006_v34  ;;  %v1115_v34 = vld [vmem:[#allocation17 + $0x20] sm:$0xff] }
 0x367   :  { %1058 = vmatprep.subr.mxu1 %v1005_v35 }
 0x368   :  { %1059 = vmatpush1.msra.mxu1 %v1004_v36  ;;  %v1114_v36 = vld [vmem:[#allocation17 + $0x18] sm:$0xff] }
 0x369   :  { %1060 = vmatprep.subr.mxu1 %v1003_v37  ;;  %v1113_v37 = vld [vmem:[#allocation17 + $0x10] sm:$0xff] }
 0x36a   :  { %1061 = vmatpush1.msra.mxu1 %v1002_v38 }
 0x36b   :  { %1062 = vmatprep.subr.mxu1 %v1001_v39  ;;  %v1112_v39 = vld [vmem:[#allocation17 + $0x8] sm:$0xff] }
 0x36c   :  { %1063 = vmatpush1.msra.mxu1 %v1000_v40 }
 0x36d   :  { %1064 = vmatprep.subr.mxu1 %v999_v41  ;;  %v1111_v41 = vld [vmem:[#allocation17] sm:$0xff] }
 0x36e   :  { %1065 = vmatpush1.msra.mxu1 %v998_v42  ;;  %v1174_v42 = vld [vmem:[#allocation17 + $0x1f8] sm:$0xff] }
 0x36f   :  { %1066 = vmatprep.subr.mxu1 %v997_v43 }
 0x370   :  { %1067 = vmatpush1.msra.mxu1 %v996_v44  ;;  %v1173_v44 = vld [vmem:[#allocation17 + $0x1f0] sm:$0xff] }
 0x371   :  { %1068 = vmatprep.subr.mxu1 %v995_v45  ;;  %v1172_v45 = vld [vmem:[#allocation17 + $0x1e8] sm:$0xff] }
 0x372   :  { %1069 = vmatpush1.msra.mxu1 %v994_v46  ;;  %v1171_v46 = vld [vmem:[#allocation17 + $0x1e0] sm:$0xff] }
 0x373   :  { %1103 = vmatmul.mubr.f32.vlgmr.msra.gmra.mxu1 %v2941_v47 }
 0x374   :  { %1440 = vmatprep.mubr.f32.mxu1 %v2941_v47 }
 0x413   :  { %v840_v60 = vpop.f32.mrf.mxu1 }
 0x414   :  { %v841_v61 = vadd.f32 %v840_v60, %v767_v58  ;;  %v1161_v58 = vld [vmem:[#allocation17 + $0x190] sm:$0xff]  ;;  %v1159_v60 = vld [vmem:[#allocation17 + $0x180] sm:$0xff] }
 0x415   :  { %v842_v62 = vpop.f32.mrf.mxu1 }
 0x416   :  { %v843_v63 = vadd.f32 %v842_v62, %v771_v59  ;;  %v845_v2 = vmax.f32 %v841_v61, 0.0  ;;  %v1160_v59 = vld [vmem:[#allocation17 + $0x188] sm:$0xff]  ;;  %v1158_v61 = vld [vmem:[#allocation17 + $0x178] sm:$0xff]  ;;  %v1157_v62 = vld [vmem:[#allocation17 + $0x170] sm:$0xff] }
 0x418   :  { %v846_v1 = vmax.f32 %v843_v63, 0.0  ;;  %v1156_v63 = vld [vmem:[#allocation17 + $0x168] sm:$0xff] }
 0x41a   :  { %987 = vmatprep.mubr.f32.mxu0 %v846_v1  ;;  %v1155_v1 = vld [vmem:[#allocation17 + $0x160] sm:$0xff] }
 0x41b   :  { %988 = vmatmul.mubr.f32.vlgmr.msra.gmra.mxu0 %v845_v2  ;;  %v1154_v2 = vld [vmem:[#allocation17 + $0x158] sm:$0xff] }
 0x41c   :  { %1188 = vmatpush1.msra.mxu0 %v1141_v3  ;;  %v1153_v3 = vld [vmem:[#allocation17 + $0x150] sm:$0xff] }
 0x41d   :  { %1189 = vmatprep.subr.mxu0 %v1140_v4  ;;  %v1152_v4 = vld [vmem:[#allocation17 + $0x148] sm:$0xff] }
 0x41e   :  { %1190 = vmatpush1.msra.mxu0 %v1139_v5  ;;  %v1151_v5 = vld [vmem:[#allocation17 + $0x140] sm:$0xff] }
 0x41f   :  { %1191 = vmatprep.subr.mxu0 %v1138_v6  ;;  %v1150_v6 = vld [vmem:[#allocation17 + $0x138] sm:$0xff] }
 0x420   :  { %1192 = vmatpush1.msra.mxu0 %v1137_v7  ;;  %v1031_v7 = vrot.slane %v2953_v26, %v2922_v31  ;;  %v1296_v26 = vld [vmem:[#allocation23 + $0x108] sm:$0xff] }
 0x421   :  { %1193 = vmatprep.subr.mxu0 %v1136_v8  ;;  %v1149_v8 = vld [vmem:[#allocation17 + $0x130] sm:$0xff] }
 0x422   :  { %1194 = vmatpush1.msra.mxu0 %v1135_v10  ;;  %v1148_v10 = vld [vmem:[#allocation17 + $0x128] sm:$0xff] }
 0x423   :  { %1195 = vmatprep.subr.mxu0 %v1134_v11  ;;  %v1147_v11 = vld [vmem:[#allocation17 + $0x120] sm:$0xff] }
 0x424   :  { %1196 = vmatpush1.msra.mxu0 %v1133_v12  ;;  %v1146_v12 = vld [vmem:[#allocation17 + $0x118] sm:$0xff] }
 0x425   :  { %1197 = vmatprep.subr.mxu0 %v1132_v13 }
 0x426   :  { %1198 = vmatpush1.msra.mxu0 %v1131_v14  ;;  %v1145_v14 = vld [vmem:[#allocation17 + $0x110] sm:$0xff] }
 0x427   :  { %1199 = vmatprep.subr.mxu0 %v1130_v15  ;;  %v1144_v15 = vld [vmem:[#allocation17 + $0x108] sm:$0xff] }
 0x428   :  { %1200 = vmatpush1.msra.mxu0 %v1129_v16  ;;  %v1143_v16 = vld [vmem:[#allocation17 + $0x100] sm:$0xff] }
 0x429   :  { %1201 = vmatprep.subr.mxu0 %v1128_v17 }
 0x42a   :  { %1202 = vmatpush1.msra.mxu0 %v1127_v18  ;;  %v1309_v18 = vld [vmem:[#allocation23 + $0x170] sm:$0xff] }
 0x42b   :  { %1203 = vmatprep.subr.mxu0 %v1126_v19  ;;  %v1308_v19 = vld [vmem:[#allocation23 + $0x168] sm:$0xff]  ;;  %1376 = vmatprep.subr.mxu1 %v1309_v18 }
 0x42c   :  { %1204 = vmatpush1.msra.mxu0 %v1125_v20  ;;  %v1306_v20 = vld [vmem:[#allocation23 + $0x158] sm:$0xff]  ;;  %1377 = vmatpush1.msra.mxu1 %v1308_v19  ;;  %v1340_v18 = vld [vmem:[#allocation23 + $0x268] sm:$0xff] }
 0x42d   :  { %1205 = vmatprep.subr.mxu0 %v1124_v21  ;;  %v1305_v21 = vld [vmem:[#allocation23 + $0x150] sm:$0xff]  ;;  %1378 = vmatprep.subr.mxu1 %v1306_v20  ;;  %v1336_v19 = vld [vmem:[#allocation23 + $0x248] sm:$0xff] }
 0x42e   :  { %1206 = vmatpush1.msra.mxu0 %v1123_v22  ;;  %v1303_v22 = vld [vmem:[#allocation23 + $0x140] sm:$0xff]  ;;  %1379 = vmatpush1.msra.mxu1 %v1305_v21  ;;  %v1292_v20 = vld [vmem:[#allocation23 + $0xe8] sm:$0xff] }
 0x42f   :  { %1207 = vmatprep.subr.mxu0 %v1122_v23  ;;  %v1302_v23 = vld [vmem:[#allocation23 + $0x138] sm:$0xff]  ;;  %1380 = vmatprep.subr.mxu1 %v1303_v22  ;;  %v1335_v21 = vld [vmem:[#allocation23 + $0x240] sm:$0xff]  ;;  %v1337_v22 = vld [vmem:[#allocation23 + $0x250] sm:$0xff] }
 0x430   :  { %1208 = vmatpush1.msra.mxu0 %v1121_v24  ;;  %v1300_v24 = vld [vmem:[#allocation23 + $0x128] sm:$0xff]  ;;  %1381 = vmatpush1.msra.mxu1 %v1302_v23  ;;  %v1333_v23 = vld [vmem:[#allocation23 + $0x230] sm:$0xff] }
 0x431   :  { %1209 = vmatprep.subr.mxu0 %v1120_v54  ;;  %v1299_v54 = vld [vmem:[#allocation23 + $0x120] sm:$0xff]  ;;  %1382 = vmatprep.subr.mxu1 %v1300_v24  ;;  %v1289_v24 = vld [vmem:[#allocation23 + $0xd0] sm:$0xff] }
 0x432   :  { %1210 = vmatpush1.msra.mxu0 %v1119_v25  ;;  %v1297_v25 = vld [vmem:[#allocation23 + $0x110] sm:$0xff]  ;;  %1383 = vmatpush1.msra.mxu1 %v1299_v54  ;;  %v1332_v54 = vld [vmem:[#allocation23 + $0x228] sm:$0xff] }
 0x433   :  { %1211 = vmatprep.subr.mxu0 %v1118_v27  ;;  %v2957_v35 = vpop.f32.mrf.mxu1  ;;  %v1294_v27 = vld [vmem:[#allocation23 + $0xf8] sm:$0xff]  ;;  %1384 = vmatprep.subr.mxu1 %v1297_v25 }
 0x434   :  { %1212 = vmatpush1.msra.mxu0 %v1117_v28  ;;  %v1105_v13 = vadd.f32 %v2957_v35, %v1031_v7  ;;  %v1293_v28 = vld [vmem:[#allocation23 + $0xf0] sm:$0xff]  ;;  %1385 = vmatpush1.msra.mxu1 %v1296_v26  ;;  %v1288_v35 = vld [vmem:[#allocation23 + $0xc8] sm:$0xff]  ;;  %v1334_v25 = vld [vmem:[#allocation23 + $0x238] sm:$0xff] }
 0x435   :  { %1213 = vmatprep.subr.mxu0 %v1116_v29  ;;  %v1106_v38 = vpop.f32.mrf.mxu1  ;;  %v1291_v29 = vld [vmem:[#allocation23 + $0xe0] sm:$0xff]  ;;  %1386 = vmatprep.subr.mxu1 %v1294_v27  ;;  %v1301_v7 = vld [vmem:[#allocation23 + $0x130] sm:$0xff]  ;;  %v1330_v26 = vld [vmem:[#allocation23 + $0x218] sm:$0xff] }
 0x436   :  { %1214 = vmatpush1.msra.mxu0 %v1115_v34  ;;  %v1107_v40 = vadd.f32 %v1106_v38, %v1035_v32  ;;  %v1109_v17 = vmax.f32 %v1105_v13, 0.0  ;;  %v1290_v32 = vld [vmem:[#allocation23 + $0xd8] sm:$0xff]  ;;  %1387 = vmatpush1.msra.mxu1 %v1293_v28  ;;  %v1287_v38 = vld [vmem:[#allocation23 + $0xc0] sm:$0xff]  ;;  %v1341_v13 = vld [vmem:[#allocation23 + $0x270] sm:$0xff] }
 0x437   :  { %1215 = vmatprep.subr.mxu0 %v1114_v36  ;;  %v1358_v34 = vld [vmem:[#allocation23 + $0x2f8] sm:$0xff]  ;;  %1388 = vmatprep.subr.mxu1 %v1291_v29  ;;  %v1329_v28 = vld [vmem:[#allocation23 + $0x210] sm:$0xff]  ;;  %v1331_v29 = vld [vmem:[#allocation23 + $0x220] sm:$0xff] }
 0x438   :  { %1216 = vmatpush1.msra.mxu0 %v1113_v37  ;;  %v1110_v43 = vmax.f32 %v1107_v40, 0.0  ;;  %v1310_v36 = vld [vmem:[#allocation23 + $0x178] sm:$0xff]  ;;  %v1355_v37 = vld [vmem:[#allocation23 + $0x2e0] sm:$0xff]  ;;  %1389 = vmatpush1.msra.mxu1 %v1290_v32  ;;  %v1285_v40 = vld [vmem:[#allocation23 + $0xb0] sm:$0xff] }
 0x439   :  { %1217 = vmatprep.subr.mxu0 %v1112_v39  ;;  %v1307_v39 = vld [vmem:[#allocation23 + $0x160] sm:$0xff]  ;;  %1390 = vmatprep.subr.mxu1 %v1288_v35  ;;  %v1286_v27 = vld [vmem:[#allocation23 + $0xb8] sm:$0xff] }
 0x43a   :  { %1218 = vmatpush1.msra.mxu0 %v1111_v41  ;;  %1251 = vmatprep.mubr.f32.mxu0 %v1110_v43  ;;  %v1352_v41 = vld [vmem:[#allocation23 + $0x2c8] sm:$0xff]  ;;  %v1282_v43 = vld [vmem:[#allocation23 + $0x98] sm:$0xff]  ;;  %v1327_v32 = vld [vmem:[#allocation23 + $0x200] sm:$0xff] }
 0x43b   :  { %1219 = vmatprep.subr.mxu0 %v1174_v42  ;;  %v1284_v42 = vld [vmem:[#allocation23 + $0xa8] sm:$0xff]  ;;  %1391 = vmatpush1.msra.mxu1 %v1287_v38  ;;  %v1326_v35 = vld [vmem:[#allocation23 + $0x1f8] sm:$0xff] }
 0x43c   :  { %1220 = vmatpush2.msra.mxu0 %v1173_v44  ;;  %1392 = vmatprep.subr.mxu1 %v1285_v40  ;;  %v1281_v44 = vld [vmem:[#allocation23 + $0x90] sm:$0xff]  ;;  %v1280_v38 = vld [vmem:[#allocation23 + $0x88] sm:$0xff] }
 0x43d   :  { %1221 = vmatprep.subr.mxu0 %v1172_v45  ;;  %1393 = vmatpush1.msra.mxu1 %v1284_v42  ;;  %v1279_v45 = vld [vmem:[#allocation23 + $0x80] sm:$0xff]  ;;  %v1325_v40 = vld [vmem:[#allocation23 + $0x1f0] sm:$0xff] }
 0x43e   :  { %1222 = vmatpush2.msra.mxu0 %v1171_v46  ;;  %1394 = vmatprep.subr.mxu1 %v1282_v43  ;;  %v1278_v46 = vld [vmem:[#allocation23 + $0x78] sm:$0xff]  ;;  %v1277_v42 = vld [vmem:[#allocation23 + $0x70] sm:$0xff]  ;;  %v1320_v43 = vld [vmem:[#allocation23 + $0x1c8] sm:$0xff] }
 0x43f   :  { %1223 = vmatprep.subr.mxu0 %v1170_v48  ;;  %1395 = vmatpush1.msra.mxu1 %v1281_v44  ;;  %v1276_v48 = vld [vmem:[#allocation23 + $0x68] sm:$0xff]  ;;  %v1322_v44 = vld [vmem:[#allocation23 + $0x1d8] sm:$0xff] }
 0x440   :  { %1224 = vmatpush2.msra.mxu0 %v1169_v49  ;;  %1396 = vmatprep.subr.mxu1 %v1279_v45  ;;  %v1275_v49 = vld [vmem:[#allocation23 + $0x60] sm:$0xff]  ;;  %v1318_v45 = vld [vmem:[#allocation23 + $0x1b8] sm:$0xff] }
 0x441   :  { %1225 = vmatprep.subr.mxu0 %v1168_v50  ;;  %1397 = vmatpush1.msra.mxu1 %v1278_v46  ;;  %v1273_v50 = vld [vmem:[#allocation23 + $0x50] sm:$0xff]  ;;  %v1274_v46 = vld [vmem:[#allocation23 + $0x58] sm:$0xff] }
 0x442   :  { %1226 = vmatpush2.msra.mxu0 %v1167_v51  ;;  %1398 = vmatprep.subr.mxu1 %v1276_v48  ;;  %v1272_v51 = vld [vmem:[#allocation23 + $0x48] sm:$0xff]  ;;  %v1317_v48 = vld [vmem:[#allocation23 + $0x1b0] sm:$0xff] }
 0x443   :  { %1227 = vmatprep.subr.mxu0 %v1166_v52  ;;  %1399 = vmatpush1.msra.mxu1 %v1275_v49  ;;  %v1270_v52 = vld [vmem:[#allocation23 + $0x38] sm:$0xff]  ;;  %v1319_v49 = vld [vmem:[#allocation23 + $0x1c0] sm:$0xff] }
 0x444   :  { %1228 = vmatpush2.msra.mxu0 %v1165_v53  ;;  %1400 = vmatprep.subr.mxu1 %v1273_v50  ;;  %v1269_v53 = vld [vmem:[#allocation23 + $0x30] sm:$0xff]  ;;  %v1315_v50 = vld [vmem:[#allocation23 + $0x1a0] sm:$0xff] }
 0x445   :  { %1229 = vmatprep.subr.mxu0 %v1164_v55  ;;  %1401 = vmatpush1.msra.mxu1 %v1272_v51  ;;  %v1267_v55 = vld [vmem:[#allocation23 + $0x20] sm:$0xff] }
 0x446   :  { %1230 = vmatpush2.msra.mxu0 %v1163_v56  ;;  %1402 = vmatprep.subr.mxu1 %v1270_v52  ;;  %v1266_v56 = vld [vmem:[#allocation23 + $0x18] sm:$0xff]  ;;  %v1271_v51 = vld [vmem:[#allocation23 + $0x40] sm:$0xff] }
 0x447   :  { %1231 = vmatprep.subr.mxu0 %v1162_v57  ;;  %1403 = vmatpush1.msra.mxu1 %v1269_v53  ;;  %v1264_v57 = vld [vmem:[#allocation23 + $0x8] sm:$0xff]  ;;  %v1314_v52 = vld [vmem:[#allocation23 + $0x198] sm:$0xff] }
 0x448   :  { %1232 = vmatpush2.msra.mxu0 %v1161_v58  ;;  %1404 = vmatprep.subr.mxu1 %v1267_v55  ;;  %v1263_v58 = vld [vmem:[#allocation23] sm:$0xff]  ;;  %v1316_v53 = vld [vmem:[#allocation23 + $0x1a8] sm:$0xff] }
 0x449   :  { %1233 = vmatprep.subr.mxu0 %v1160_v59  ;;  %1405 = vmatpush1.msra.mxu1 %v1266_v56  ;;  %v1357_v59 = vld [vmem:[#allocation23 + $0x2f0] sm:$0xff]  ;;  %v1312_v55 = vld [vmem:[#allocation23 + $0x188] sm:$0xff] }
 0x44a   :  { %1234 = vmatpush2.msra.mxu0 %v1159_v60  ;;  %1406 = vmatprep.subr.mxu1 %v1264_v57  ;;  %v1356_v60 = vld [vmem:[#allocation23 + $0x2e8] sm:$0xff]  ;;  %v1311_v57 = vld [vmem:[#allocation23 + $0x180] sm:$0xff] }
 0x44b   :  { %1235 = vmatprep.subr.mxu0 %v1158_v61  ;;  %1407 = vmatpush1.msra.mxu1 %v1263_v58  ;;  %v1354_v61 = vld [vmem:[#allocation23 + $0x2d8] sm:$0xff]  ;;  %v1268_v56 = vld [vmem:[#allocation23 + $0x28] sm:$0xff]  ;;  %v1313_v58 = vld [vmem:[#allocation23 + $0x190] sm:$0xff] }
 0x44c   :  { %1236 = vmatpush2.msra.mxu0 %v1157_v62  ;;  %1408 = vmatprep.subr.mxu1 %v1357_v59  ;;  %v1353_v62 = vld [vmem:[#allocation23 + $0x2d0] sm:$0xff] }
 0x44d   :  { %1237 = vmatprep.subr.mxu0 %v1156_v63  ;;  %1409 = vmatpush2.msra.mxu1 %v1356_v60  ;;  %v1351_v63 = vld [vmem:[#allocation23 + $0x2c0] sm:$0xff]  ;;  %v1265_v59 = vld [vmem:[#allocation23 + $0x10] sm:$0xff] }
 0x44e   :  { %1238 = vmatpush2.msra.mxu0 %v1155_v1  ;;  %1410 = vmatprep.subr.mxu1 %v1354_v61  ;;  %v1350_v1 = vld [vmem:[#allocation23 + $0x2b8] sm:$0xff]  ;;  %v1563_v60 = vld [vmem:[#allocation25 + $0x170] sm:$0xff]  ;;  %v911_v61 = vld [vmem:[%s3037_s10] sm:$0x3] }
 0x44f   :  { %1239 = vmatprep.subr.mxu0 %v1154_v2  ;;  %1411 = vmatpush2.msra.mxu1 %v1353_v62  ;;  %v1348_v2 = vld [vmem:[#allocation23 + $0x2a8] sm:$0xff]  ;;  %v916_v62 = vrot.slane %v911_v61, %v2922_v31 }
 0x450   :  { %1240 = vmatpush2.msra.mxu0 %v1153_v3  ;;  %1412 = vmatprep.subr.mxu1 %v1351_v63  ;;  %v1304_v3 = vld [vmem:[#allocation23 + $0x148] sm:$0xff]  ;;  %v920_v63 = vrot.slane %v911_v61, %v2925_v33  ;;  %v1521_v61 = vld [vmem:[#allocation25 + $0x20] sm:$0xff] }
 0x451   :  { %1241 = vmatprep.subr.mxu0 %v1152_v4  ;;  %1413 = vmatpush2.msra.mxu1 %v1350_v1  ;;  %v1347_v4 = vld [vmem:[#allocation23 + $0x2a0] sm:$0xff] }
 0x452   :  { %1242 = vmatpush2.msra.mxu0 %v1151_v5  ;;  %1414 = vmatprep.subr.mxu1 %v1348_v2  ;;  %v1349_v5 = vld [vmem:[#allocation23 + $0x2b0] sm:$0xff] }
 0x453   :  { %1243 = vmatprep.subr.mxu0 %v1150_v6  ;;  %1415 = vmatpush2.msra.mxu1 %v1347_v4  ;;  %v1345_v6 = vld [vmem:[#allocation23 + $0x290] sm:$0xff] }
 0x454   :  { %1244 = vmatpush2.msra.mxu0 %v1149_v8  ;;  %1416 = vmatprep.subr.mxu1 %v1345_v6  ;;  %v1344_v8 = vld [vmem:[#allocation23 + $0x288] sm:$0xff] }
 0x455   :  { %1245 = vmatprep.subr.mxu0 %v1148_v10  ;;  %v1346_v10 = vld [vmem:[#allocation23 + $0x298] sm:$0xff]  ;;  %1417 = vmatpush2.msra.mxu1 %v1344_v8 }
 0x456   :  { %1246 = vmatpush2.msra.mxu0 %v1147_v11  ;;  %v1342_v11 = vld [vmem:[#allocation23 + $0x278] sm:$0xff] }
 0x457   :  { %1247 = vmatprep.subr.mxu0 %v1146_v12  ;;  %v1298_v12 = vld [vmem:[#allocation23 + $0x118] sm:$0xff]  ;;  %1418 = vmatprep.subr.mxu1 %v1342_v11 }
 0x458   :  { %1248 = vmatpush2.msra.mxu0 %v1145_v14  ;;  %v1343_v14 = vld [vmem:[#allocation23 + $0x280] sm:$0xff]  ;;  %1419 = vmatpush2.msra.mxu1 %v1341_v13 }
 0x459   :  { %1249 = vmatprep.subr.mxu0 %v1144_v15  ;;  %v1339_v15 = vld [vmem:[#allocation23 + $0x260] sm:$0xff] }
 0x45a   :  { %1250 = vmatpush2.msra.mxu0 %v1143_v16  ;;  %v1295_v16 = vld [vmem:[#allocation23 + $0x100] sm:$0xff]  ;;  %1420 = vmatprep.subr.mxu1 %v1339_v15 }
 0x45b   :  { %1252 = vmatmul.mubr.f32.vlgmr.msra.gmra.mxu0 %v1109_v17  ;;  %2183 = vmatprep.subr.mxu0 %v1358_v34  ;;  %v1338_v17 = vld [vmem:[#allocation23 + $0x258] sm:$0xff]  ;;  %v1283_v34 = vld [vmem:[#allocation23 + $0xa0] sm:$0xff] }
 0x45c   :  { %1511 = vmatprep.mubr.f32.mxu0 %v2941_v47  ;;  %2184 = vmatpush3.msra.mxu0 %v1310_v36  ;;  %v1328_v36 = vld [vmem:[#allocation23 + $0x208] sm:$0xff] }
 0x45d   :  { %2185 = vmatprep.subr.mxu0 %v1355_v37  ;;  %1421 = vmatpush2.msra.mxu1 %v1338_v17  ;;  %v1324_v37 = vld [vmem:[#allocation23 + $0x1e8] sm:$0xff] }
 0x45e   :  { %2186 = vmatpush3.msra.mxu0 %v1307_v39  ;;  %1422 = vmatprep.subr.mxu1 %v1336_v19  ;;  %v1323_v39 = vld [vmem:[#allocation23 + $0x1e0] sm:$0xff]  ;;  %v1560_v19 = vld [vmem:[#allocation25 + $0x158] sm:$0xff] }
 0x45f   :  { %2187 = vmatprep.subr.mxu0 %v1352_v41  ;;  %1423 = vmatpush2.msra.mxu1 %v1335_v21  ;;  %v1321_v41 = vld [vmem:[#allocation23 + $0x1d0] sm:$0xff] }
 0x460   :  { %2188 = vmatpush3.msra.mxu0 %v1304_v3  ;;  %1424 = vmatprep.subr.mxu1 %v1333_v23  ;;  %v1559_v21 = vld [vmem:[#allocation25 + $0x150] sm:$0xff]  ;;  %v1561_v23 = vld [vmem:[#allocation25 + $0x160] sm:$0xff] }
 0x461   :  { %2189 = vmatprep.subr.mxu0 %v1349_v5  ;;  %1425 = vmatpush2.msra.mxu1 %v1332_v54  ;;  %v1175_v5 = vld [vmem:[%s3041_s14] sm:$0x3] }
 0x462   :  { %2190 = vmatpush3.msra.mxu0 %v1301_v7  ;;  %1426 = vmatprep.subr.mxu1 %v1330_v26  ;;  %v1180_v6 = vrot.slane %v1175_v5, %v2922_v31  ;;  %v1184_v7 = vrot.slane %v1175_v5, %v2925_v33  ;;  %v1558_v54 = vld [vmem:[#allocation25 + $0x148] sm:$0xff]  ;;  %v1551_v26 = vld [vmem:[#allocation25 + $0x110] sm:$0xff]  ;;  %v1775_v5 = vld [vmem:[#allocation19 + $0xf8] sm:$0xff] }
 0x463   :  { %2191 = vmatprep.subr.mxu0 %v1346_v10  ;;  %1427 = vmatpush2.msra.mxu1 %v1329_v28  ;;  %v1550_v28 = vld [vmem:[#allocation25 + $0x108] sm:$0xff] }
 0x464   :  { %2192 = vmatpush3.msra.mxu0 %v1298_v12  ;;  %1428 = vmatprep.subr.mxu1 %v1327_v32  ;;  %v1552_v32 = vld [vmem:[#allocation25 + $0x118] sm:$0xff] }
 0x465   :  { %2193 = vmatprep.subr.mxu0 %v1343_v14  ;;  %1429 = vmatpush2.msra.mxu1 %v1326_v35  ;;  %v1545_v35 = vld [vmem:[#allocation25 + $0xe0] sm:$0xff] }
 0x466   :  { %2194 = vmatpush3.msra.mxu0 %v1295_v16  ;;  %1430 = vmatprep.subr.mxu1 %v1324_v37  ;;  %v1544_v37 = vld [vmem:[#allocation25 + $0xd8] sm:$0xff] }
 0x467   :  { %2195 = vmatprep.subr.mxu0 %v1340_v18  ;;  %1431 = vmatpush2.msra.mxu1 %v1323_v39  ;;  %v1562_v18 = vld [vmem:[#allocation25 + $0x168] sm:$0xff] }
 0x468   :  { %2196 = vmatpush3.msra.mxu0 %v1292_v20  ;;  %1432 = vmatprep.subr.mxu1 %v1321_v41  ;;  %v1564_v20 = vld [vmem:[#allocation25 + $0x178] sm:$0xff]  ;;  %v1546_v39 = vld [vmem:[#allocation25 + $0xe8] sm:$0xff]  ;;  %v1539_v41 = vld [vmem:[#allocation25 + $0xb0] sm:$0xff] }
 0x469   :  { %2197 = vmatprep.subr.mxu0 %v1337_v22  ;;  %1433 = vmatpush2.msra.mxu1 %v1320_v43  ;;  %v1557_v22 = vld [vmem:[#allocation25 + $0x140] sm:$0xff]  ;;  %v1538_v43 = vld [vmem:[#allocation25 + $0xa8] sm:$0xff] }
 0x46a   :  { %2198 = vmatpush3.msra.mxu0 %v1289_v24  ;;  %1434 = vmatprep.subr.mxu1 %v1318_v45  ;;  %v1556_v24 = vld [vmem:[#allocation25 + $0x138] sm:$0xff] }
 0x46b   :  { %2199 = vmatprep.subr.mxu0 %v1334_v25  ;;  %1435 = vmatpush2.msra.mxu1 %v1317_v48  ;;  %v1553_v25 = vld [vmem:[#allocation25 + $0x120] sm:$0xff]  ;;  %v1540_v45 = vld [vmem:[#allocation25 + $0xb8] sm:$0xff] }
 0x46c   :  { %2200 = vmatpush3.msra.mxu0 %v1286_v27  ;;  %1436 = vmatprep.subr.mxu1 %v1315_v50  ;;  %v1555_v27 = vld [vmem:[#allocation25 + $0x130] sm:$0xff]  ;;  %v1533_v48 = vld [vmem:[#allocation25 + $0x80] sm:$0xff]  ;;  %v1532_v50 = vld [vmem:[#allocation25 + $0x78] sm:$0xff] }
 0x46d   :  { %2201 = vmatprep.subr.mxu0 %v1331_v29  ;;  %1437 = vmatpush2.msra.mxu1 %v1314_v52  ;;  %v1548_v29 = vld [vmem:[#allocation25 + $0xf8] sm:$0xff]  ;;  %v1534_v52 = vld [vmem:[#allocation25 + $0x88] sm:$0xff] }
 0x46e   :  { %2202 = vmatpush3.msra.mxu0 %v1283_v34  ;;  %1438 = vmatprep.subr.mxu1 %v1312_v55  ;;  %v1547_v34 = vld [vmem:[#allocation25 + $0xf0] sm:$0xff] }
 0x46f   :  { %2203 = vmatprep.subr.mxu0 %v1328_v36  ;;  %1439 = vmatpush2.msra.mxu1 %v1311_v57  ;;  %v1549_v36 = vld [vmem:[#allocation25 + $0x100] sm:$0xff]  ;;  %v1527_v55 = vld [vmem:[#allocation25 + $0x50] sm:$0xff]  ;;  %v1526_v57 = vld [vmem:[#allocation25 + $0x48] sm:$0xff] }
 0x470   :  { %2204 = vmatpush3.msra.mxu0 %v1280_v38  ;;  %1582 = vmatprep.subr.mxu1 %v1563_v60  ;;  %v1542_v38 = vld [vmem:[#allocation25 + $0xc8] sm:$0xff]  ;;  %v1523_v60 = vld [vmem:[#allocation25 + $0x30] sm:$0xff] }
 0x471   :  { %2205 = vmatprep.subr.mxu0 %v1325_v40  ;;  %v1541_v40 = vld [vmem:[#allocation25 + $0xc0] sm:$0xff] }
 0x472   :  { %2206 = vmatpush3.msra.mxu0 %v1277_v42  ;;  %v1543_v42 = vld [vmem:[#allocation25 + $0xd0] sm:$0xff] }
 0x473   :  { %2207 = vmatprep.subr.mxu0 %v1322_v44  ;;  %v1536_v44 = vld [vmem:[#allocation25 + $0x98] sm:$0xff] }
 0x474   :  { %2208 = vmatpush3.msra.mxu0 %v1274_v46  ;;  %v1535_v46 = vld [vmem:[#allocation25 + $0x90] sm:$0xff] }
 0x475   :  { %2209 = vmatprep.subr.mxu0 %v1319_v49  ;;  %v1537_v49 = vld [vmem:[#allocation25 + $0xa0] sm:$0xff] }
 0x476   :  { %2210 = vmatpush3.msra.mxu0 %v1271_v51  ;;  %v1530_v51 = vld [vmem:[#allocation25 + $0x68] sm:$0xff] }
 0x477   :  { %2211 = vmatprep.subr.mxu0 %v1316_v53  ;;  %v1529_v53 = vld [vmem:[#allocation25 + $0x60] sm:$0xff] }
 0x478   :  { %2212 = vmatpush3.msra.mxu0 %v1268_v56  ;;  %v1531_v56 = vld [vmem:[#allocation25 + $0x70] sm:$0xff] }
 0x479   :  { %2213 = vmatprep.subr.mxu0 %v1313_v58  ;;  %v1524_v58 = vld [vmem:[#allocation25 + $0x38] sm:$0xff] }
 0x47a   :  { %2214 = vmatpush3.msra.mxu0 %v1265_v59  ;;  %v1528_v59 = vld [vmem:[#allocation25 + $0x58] sm:$0xff] }
 0x47b   :  { %2270 = vmatprep.subr.mxu0 %v2704_v0 }
 0x4db   :  { %v989_v1 = vpop.f32.mrf.mxu0 }
 0x4dc   :  { %v990_v2 = vadd.f32 %v989_v1, %v916_v62  ;;  %v1525_v62 = vld [vmem:[#allocation25 + $0x40] sm:$0xff]  ;;  %v1518_v1 = vld [vmem:[#allocation25 + $0x8] sm:$0xff] }
 0x4dd   :  { %v991_v3 = vpop.f32.mrf.mxu0 }
 0x4de   :  { %2151 = vst [vmem:[#allocation26] sm:$0xff] %v990_v2  ;;  %v992_v4 = vadd.f32 %v991_v3, %v920_v63  ;;  %v1520_v63 = vld [vmem:[#allocation25 + $0x18] sm:$0xff]  ;;  %v1522_v2 = vld [vmem:[#allocation25 + $0x28] sm:$0xff]  ;;  %v1517_v3 = vld [vmem:[#allocation25] sm:$0xff] }
 0x4e0   :  { %2152 = vst [vmem:[#allocation26 + $0x8] sm:$0xff] %v992_v4  ;;  %v1519_v4 = vld [vmem:[#allocation25 + $0x10] sm:$0xff] }
 0x51b   :  { %v1253_v8 = vpop.f32.mrf.mxu0 }
 0x51c   :  { %v1254_v10 = vadd.f32 %v1253_v8, %v1180_v6  ;;  %v1774_v6 = vld [vmem:[#allocation19 + $0xf0] sm:$0xff]  ;;  %v1772_v8 = vld [vmem:[#allocation19 + $0xe0] sm:$0xff] }
 0x51d   :  { %v1255_v11 = vpop.f32.mrf.mxu0 }
 0x51e   :  { %2153 = vst [vmem:[#allocation26 + $0x10] sm:$0xff] %v1254_v10  ;;  %v1256_v12 = vadd.f32 %v1255_v11, %v1184_v7  ;;  %v1773_v7 = vld [vmem:[#allocation19 + $0xe8] sm:$0xff]  ;;  %v1770_v11 = vld [vmem:[#allocation19 + $0xd0] sm:$0xff] }
 0x520   :  { %v1258_v13 = vmul.f32 0.5, %v1256_v12  ;;  %2154 = vst [vmem:[#allocation26 + $0x18] sm:$0xff] %v1256_v12  ;;  %v1769_v12 = vld [vmem:[#allocation19 + $0xc8] sm:$0xff] }
 0x522   :  { %v1259_v14 = vmul.f32 1.442695, %v1258_v13  ;;  %v1768_v13 = vld [vmem:[#allocation19 + $0xc0] sm:$0xff] }
 0x524   :  { %2331 = vpow2.f32 %v1259_v14  ;;  %v1767_v14 = vld [vmem:[#allocation19 + $0xb8] sm:$0xff] }
 0x531   :  { %v2332_v15 = vpop.eup %2331 }
 0x532   :  { %v1261_v16 = vmul.f32 %v2332_v15, %v2936_v9  ;;  %v1554_v9 = vld [vmem:[#allocation25 + $0x128] sm:$0xff]  ;;  %v1764_v15 = vld [vmem:[#allocation19 + $0xa0] sm:$0xff] }
 0x534   :  { %v2975_v17 = vadd.f32 %v1261_v16, %v1254_v10  ;;  %v1771_v10 = vld [vmem:[#allocation19 + $0xd8] sm:$0xff] }
 0x535   :  { %v1763_v16 = vld [vmem:[#allocation19 + $0x98] sm:$0xff] }
 0x536   :  { %1441 = vmatmul.mubr.f32.vlgmr.msra.gmra.mxu1 %v2975_v17  ;;  %2155 = vst [vmem:[#allocation26 + $0x20] sm:$0xff] %v2975_v17  ;;  %1512 = vmatmul.mubr.f32.vlgmr.msra.gmra.mxu0 %v2975_v17 }
 0x537   :  { %1583 = vmatpush1.msra.mxu1 %v1562_v18  ;;  %1646 = vmatprep.mubr.f32.mxu1 %v2704_v0  ;;  %v1761_v18 = vld [vmem:[#allocation19 + $0x88] sm:$0xff] }
 0x538   :  { %1584 = vmatprep.subr.mxu1 %v1560_v19  ;;  %2271 = vmatpush3.msra.mxu0 %v1564_v20  ;;  %v1760_v19 = vld [vmem:[#allocation19 + $0x80] sm:$0xff]  ;;  %v1759_v20 = vld [vmem:[#allocation19 + $0x78] sm:$0xff] }
 0x539   :  { %1585 = vmatpush1.msra.mxu1 %v1559_v21  ;;  %2272 = vmatprep.subr.mxu0 %v2704_v0  ;;  %v1758_v21 = vld [vmem:[#allocation19 + $0x70] sm:$0xff] }
 0x53a   :  { %1586 = vmatprep.subr.mxu1 %v1557_v22  ;;  %2273 = vmatpush3.msra.mxu0 %v1561_v23  ;;  %v1757_v22 = vld [vmem:[#allocation19 + $0x68] sm:$0xff]  ;;  %v1756_v23 = vld [vmem:[#allocation19 + $0x60] sm:$0xff] }
 0x53b   :  { %1587 = vmatpush1.msra.mxu1 %v1556_v24  ;;  %2274 = vmatprep.subr.mxu0 %v2704_v0  ;;  %v1755_v24 = vld [vmem:[#allocation19 + $0x58] sm:$0xff] }
 0x53c   :  { %1588 = vmatprep.subr.mxu1 %v1554_v9  ;;  %2275 = vmatpush3.msra.mxu0 %v1558_v54  ;;  %v1754_v9 = vld [vmem:[#allocation19 + $0x50] sm:$0xff]  ;;  %v1753_v54 = vld [vmem:[#allocation19 + $0x48] sm:$0xff] }
 0x53d   :  { %1589 = vmatpush1.msra.mxu1 %v1553_v25  ;;  %2276 = vmatprep.subr.mxu0 %v2704_v0  ;;  %v1752_v25 = vld [vmem:[#allocation19 + $0x40] sm:$0xff] }
 0x53e   :  { %1590 = vmatprep.subr.mxu1 %v1551_v26  ;;  %2277 = vmatpush3.msra.mxu0 %v1555_v27  ;;  %v1751_v26 = vld [vmem:[#allocation19 + $0x38] sm:$0xff]  ;;  %v1750_v27 = vld [vmem:[#allocation19 + $0x30] sm:$0xff] }
 0x53f   :  { %1591 = vmatpush1.msra.mxu1 %v1550_v28  ;;  %2278 = vmatprep.subr.mxu0 %v2704_v0  ;;  %v1749_v28 = vld [vmem:[#allocation19 + $0x28] sm:$0xff] }
 0x540   :  { %1592 = vmatprep.subr.mxu1 %v1548_v29  ;;  %2279 = vmatpush3.msra.mxu0 %v1552_v32  ;;  %v1748_v29 = vld [vmem:[#allocation19 + $0x20] sm:$0xff]  ;;  %v1747_v32 = vld [vmem:[#allocation19 + $0x18] sm:$0xff] }
 0x541   :  { %1593 = vmatpush1.msra.mxu1 %v1547_v34  ;;  %2280 = vmatprep.subr.mxu0 %v2704_v0  ;;  %v1746_v34 = vld [vmem:[#allocation19 + $0x10] sm:$0xff] }
 0x542   :  { %1594 = vmatprep.subr.mxu1 %v1545_v35  ;;  %2281 = vmatpush3.msra.mxu0 %v1549_v36  ;;  %v1745_v35 = vld [vmem:[#allocation19 + $0x8] sm:$0xff]  ;;  %v1744_v36 = vld [vmem:[#allocation19] sm:$0xff] }
 0x543   :  { %1595 = vmatpush1.msra.mxu1 %v1544_v37  ;;  %2282 = vmatprep.subr.mxu0 %v2704_v0  ;;  %v1807_v37 = vld [vmem:[#allocation19 + $0x1f8] sm:$0xff] }
 0x544   :  { %1596 = vmatprep.subr.mxu1 %v1542_v38  ;;  %2283 = vmatpush3.msra.mxu0 %v1546_v39  ;;  %v1806_v38 = vld [vmem:[#allocation19 + $0x1f0] sm:$0xff]  ;;  %v1805_v39 = vld [vmem:[#allocation19 + $0x1e8] sm:$0xff] }
 0x545   :  { %1597 = vmatpush1.msra.mxu1 %v1541_v40  ;;  %2284 = vmatprep.subr.mxu0 %v2704_v0  ;;  %v1804_v40 = vld [vmem:[#allocation19 + $0x1e0] sm:$0xff] }
 0x546   :  { %1598 = vmatprep.subr.mxu1 %v1539_v41  ;;  %2285 = vmatpush3.msra.mxu0 %v1543_v42  ;;  %v1803_v41 = vld [vmem:[#allocation19 + $0x1d8] sm:$0xff]  ;;  %v1802_v42 = vld [vmem:[#allocation19 + $0x1d0] sm:$0xff] }
 0x547   :  { %1599 = vmatpush1.msra.mxu1 %v1538_v43  ;;  %2286 = vmatprep.subr.mxu0 %v2704_v0  ;;  %v1801_v43 = vld [vmem:[#allocation19 + $0x1c8] sm:$0xff] }
 0x548   :  { %1600 = vmatprep.subr.mxu1 %v1536_v44  ;;  %2287 = vmatpush3.msra.mxu0 %v1540_v45  ;;  %v1800_v44 = vld [vmem:[#allocation19 + $0x1c0] sm:$0xff]  ;;  %v1799_v45 = vld [vmem:[#allocation19 + $0x1b8] sm:$0xff] }
 0x549   :  { %1601 = vmatpush1.msra.mxu1 %v1535_v46  ;;  %2288 = vmatprep.subr.mxu0 %v2704_v0  ;;  %v1798_v46 = vld [vmem:[#allocation19 + $0x1b0] sm:$0xff] }
 0x54a   :  { %1602 = vmatprep.subr.mxu1 %v1533_v48  ;;  %2289 = vmatpush3.msra.mxu0 %v1537_v49  ;;  %v1797_v48 = vld [vmem:[#allocation19 + $0x1a8] sm:$0xff]  ;;  %v1796_v49 = vld [vmem:[#allocation19 + $0x1a0] sm:$0xff] }
 0x54b   :  { %1603 = vmatpush1.msra.mxu1 %v1532_v50  ;;  %2290 = vmatprep.subr.mxu0 %v2704_v0  ;;  %v1795_v50 = vld [vmem:[#allocation19 + $0x198] sm:$0xff] }
 0x54c   :  { %1604 = vmatprep.subr.mxu1 %v1530_v51  ;;  %2291 = vmatpush3.msra.mxu0 %v1534_v52  ;;  %v1794_v51 = vld [vmem:[#allocation19 + $0x190] sm:$0xff]  ;;  %v1793_v52 = vld [vmem:[#allocation19 + $0x188] sm:$0xff] }
 0x54d   :  { %1605 = vmatpush1.msra.mxu1 %v1529_v53  ;;  %2292 = vmatprep.subr.mxu0 %v2704_v0  ;;  %v1792_v53 = vld [vmem:[#allocation19 + $0x180] sm:$0xff] }
 0x54e   :  { %1606 = vmatprep.subr.mxu1 %v1527_v55  ;;  %2293 = vmatpush3.msra.mxu0 %v1531_v56  ;;  %v1791_v55 = vld [vmem:[#allocation19 + $0x178] sm:$0xff]  ;;  %v1790_v56 = vld [vmem:[#allocation19 + $0x170] sm:$0xff] }
 0x54f   :  { %1607 = vmatpush1.msra.mxu1 %v1526_v57  ;;  %2294 = vmatprep.subr.mxu0 %v2704_v0  ;;  %v1789_v57 = vld [vmem:[#allocation19 + $0x168] sm:$0xff] }
 0x550   :  { %1608 = vmatprep.subr.mxu1 %v1524_v58  ;;  %2295 = vmatpush3.msra.mxu0 %v1528_v59  ;;  %v1788_v58 = vld [vmem:[#allocation19 + $0x160] sm:$0xff]  ;;  %v1787_v59 = vld [vmem:[#allocation19 + $0x158] sm:$0xff] }
 0x551   :  { %1609 = vmatpush1.msra.mxu1 %v1523_v60  ;;  %2296 = vmatprep.subr.mxu0 %v2704_v0  ;;  %v1786_v60 = vld [vmem:[#allocation19 + $0x150] sm:$0xff] }
 0x552   :  { %1610 = vmatprep.subr.mxu1 %v1521_v61  ;;  %2297 = vmatpush3.msra.mxu0 %v1525_v62  ;;  %v1785_v61 = vld [vmem:[#allocation19 + $0x148] sm:$0xff]  ;;  %v1784_v62 = vld [vmem:[#allocation19 + $0x140] sm:$0xff] }
 0x553   :  { %1611 = vmatpush1.msra.mxu1 %v1520_v63  ;;  %2298 = vmatprep.subr.mxu0 %v2704_v0  ;;  %v1783_v63 = vld [vmem:[#allocation19 + $0x138] sm:$0xff] }
 0x554   :  { %1612 = vmatprep.subr.mxu1 %v1518_v1  ;;  %2299 = vmatpush3.msra.mxu0 %v1522_v2  ;;  %v1782_v1 = vld [vmem:[#allocation19 + $0x130] sm:$0xff]  ;;  %v1781_v2 = vld [vmem:[#allocation19 + $0x128] sm:$0xff] }
 0x555   :  { %1613 = vmatpush1.msra.mxu1 %v1517_v3  ;;  %2300 = vmatprep.subr.mxu0 %v2704_v0  ;;  %v1780_v3 = vld [vmem:[#allocation19 + $0x120] sm:$0xff] }
 0x556   :  { %1647 = vmatmul.mubr.f32.vlgmr.msra.gmra.mxu1 %v2941_v47  ;;  %2301 = vmatpush3.msra.mxu0 %v1519_v4  ;;  %v1779_v4 = vld [vmem:[#allocation19 + $0x118] sm:$0xff] }
 0x557   :  { %1884 = vmatprep.mubr.f32.mxu1 %v2975_v17  ;;  %2302 = vmatprep.mubr.msk.f32.mxu0 %vm2705_vm0, %v2704_v0  ;;  %v1766_v0 = vld [vmem:[#allocation19 + $0xb0] sm:$0xff] }
 0x558   :  { %2303 = vmatmul.mubr.f32.vlgmr.msra.gmra.mxu0 %v2941_v47  ;;  %1820 = vmatprep.subr.mxu1 %v1775_v5  ;;  %v1765_v47 = vld [vmem:[#allocation19 + $0xa8] sm:$0xff]  ;;  %v1762_v17 = vld [vmem:[#allocation19 + $0x90] sm:$0xff] }
 0x559   :  { %1821 = vmatpush1.msra.mxu1 %v1774_v6  ;;  %v1778_v5 = vld [vmem:[#allocation19 + $0x110] sm:$0xff]  ;;  %v1777_v6 = vld [vmem:[#allocation19 + $0x108] sm:$0xff] }
 0x55a   :  { %1822 = vmatprep.subr.mxu1 %v1773_v7  ;;  %v1776_v7 = vld [vmem:[#allocation19 + $0x100] sm:$0xff] }
 0x55b   :  { %1823 = vmatpush1.msra.mxu1 %v1772_v8  ;;  %v1924_v8 = vld [vmem:[#allocation20 + $0xf8] sm:$0xff] }
 0x55c   :  { %1824 = vmatprep.subr.mxu1 %v1771_v10  ;;  %v1923_v10 = vld [vmem:[#allocation20 + $0xf0] sm:$0xff]  ;;  %1969 = vmatprep.subr.mxu0 %v1924_v8 }
 0x55d   :  { %1825 = vmatpush1.msra.mxu1 %v1770_v11  ;;  %v1922_v11 = vld [vmem:[#allocation20 + $0xe8] sm:$0xff]  ;;  %1970 = vmatpush1.msra.mxu0 %v1923_v10 }
 0x55e   :  { %1826 = vmatprep.subr.mxu1 %v1769_v12  ;;  %v1921_v12 = vld [vmem:[#allocation20 + $0xe0] sm:$0xff]  ;;  %1971 = vmatprep.subr.mxu0 %v1922_v11 }
 0x55f   :  { %1827 = vmatpush1.msra.mxu1 %v1768_v13  ;;  %v1920_v13 = vld [vmem:[#allocation20 + $0xd8] sm:$0xff]  ;;  %1972 = vmatpush1.msra.mxu0 %v1921_v12 }
 0x560   :  { %1828 = vmatprep.subr.mxu1 %v1767_v14  ;;  %v1919_v14 = vld [vmem:[#allocation20 + $0xd0] sm:$0xff]  ;;  %1973 = vmatprep.subr.mxu0 %v1920_v13 }
 0x561   :  { %1829 = vmatpush1.msra.mxu1 %v1766_v0  ;;  %v1918_v0 = vld [vmem:[#allocation20 + $0xc8] sm:$0xff]  ;;  %1974 = vmatpush1.msra.mxu0 %v1919_v14 }
 0x562   :  { %1830 = vmatprep.subr.mxu1 %v1765_v47  ;;  %v1917_v47 = vld [vmem:[#allocation20 + $0xc0] sm:$0xff]  ;;  %1975 = vmatprep.subr.mxu0 %v1918_v0 }
 0x563   :  { %1831 = vmatpush1.msra.mxu1 %v1764_v15  ;;  %v1916_v15 = vld [vmem:[#allocation20 + $0xb8] sm:$0xff]  ;;  %1976 = vmatpush1.msra.mxu0 %v1917_v47 }
 0x564   :  { %1832 = vmatprep.subr.mxu1 %v1763_v16  ;;  %v1915_v16 = vld [vmem:[#allocation20 + $0xb0] sm:$0xff]  ;;  %1977 = vmatprep.subr.mxu0 %v1916_v15 }
 0x565   :  { %1833 = vmatpush1.msra.mxu1 %v1762_v17  ;;  %v1914_v17 = vld [vmem:[#allocation20 + $0xa8] sm:$0xff]  ;;  %1978 = vmatpush1.msra.mxu0 %v1915_v16 }
 0x566   :  { %1834 = vmatprep.subr.mxu1 %v1761_v18  ;;  %v1913_v18 = vld [vmem:[#allocation20 + $0xa0] sm:$0xff]  ;;  %1979 = vmatprep.subr.mxu0 %v1914_v17 }
 0x567   :  { %1835 = vmatpush1.msra.mxu1 %v1760_v19  ;;  %v1912_v19 = vld [vmem:[#allocation20 + $0x98] sm:$0xff]  ;;  %1980 = vmatpush1.msra.mxu0 %v1913_v18 }
 0x568   :  { %1836 = vmatprep.subr.mxu1 %v1759_v20  ;;  %v1911_v20 = vld [vmem:[#allocation20 + $0x90] sm:$0xff]  ;;  %1981 = vmatprep.subr.mxu0 %v1912_v19 }
 0x569   :  { %1837 = vmatpush1.msra.mxu1 %v1758_v21  ;;  %v1910_v21 = vld [vmem:[#allocation20 + $0x88] sm:$0xff]  ;;  %1982 = vmatpush1.msra.mxu0 %v1911_v20 }
 0x56a   :  { %1838 = vmatprep.subr.mxu1 %v1757_v22  ;;  %v1909_v22 = vld [vmem:[#allocation20 + $0x80] sm:$0xff]  ;;  %1983 = vmatprep.subr.mxu0 %v1910_v21 }
 0x56b   :  { %1839 = vmatpush1.msra.mxu1 %v1756_v23  ;;  %v1908_v23 = vld [vmem:[#allocation20 + $0x78] sm:$0xff]  ;;  %1984 = vmatpush1.msra.mxu0 %v1909_v22 }
 0x56c   :  { %1840 = vmatprep.subr.mxu1 %v1755_v24  ;;  %v1907_v24 = vld [vmem:[#allocation20 + $0x70] sm:$0xff]  ;;  %1985 = vmatprep.subr.mxu0 %v1908_v23 }
 0x56d   :  { %1841 = vmatpush1.msra.mxu1 %v1754_v9  ;;  %v1906_v9 = vld [vmem:[#allocation20 + $0x68] sm:$0xff]  ;;  %1986 = vmatpush1.msra.mxu0 %v1907_v24 }
 0x56e   :  { %1842 = vmatprep.subr.mxu1 %v1753_v54  ;;  %v1905_v54 = vld [vmem:[#allocation20 + $0x60] sm:$0xff]  ;;  %1987 = vmatprep.subr.mxu0 %v1906_v9 }
 0x56f   :  { %1843 = vmatpush1.msra.mxu1 %v1752_v25  ;;  %v1904_v25 = vld [vmem:[#allocation20 + $0x58] sm:$0xff]  ;;  %1988 = vmatpush1.msra.mxu0 %v1905_v54  ;;  %v1371_v54 = vsub.s32 2, %v2919_v30 }
 0x570   :  { %1844 = vmatprep.subr.mxu1 %v1751_v26  ;;  %v1903_v26 = vld [vmem:[#allocation20 + $0x50] sm:$0xff]  ;;  %1989 = vmatprep.subr.mxu0 %v1904_v25  ;;  %v1932_v30 = vld [vmem:[#allocation20 + $0x138] sm:$0xff] }
 0x571   :  { %1845 = vmatpush1.msra.mxu1 %v1750_v27  ;;  %v1902_v27 = vld [vmem:[#allocation20 + $0x48] sm:$0xff]  ;;  %1990 = vmatpush1.msra.mxu0 %v1903_v26 }
 0x572   :  { %1846 = vmatprep.subr.mxu1 %v1749_v28  ;;  %v1901_v28 = vld [vmem:[#allocation20 + $0x40] sm:$0xff]  ;;  %1991 = vmatprep.subr.mxu0 %v1902_v27 }
 0x573   :  { %1847 = vmatpush1.msra.mxu1 %v1748_v29  ;;  %v1900_v29 = vld [vmem:[#allocation20 + $0x38] sm:$0xff]  ;;  %1992 = vmatpush1.msra.mxu0 %v1901_v28 }
 0x574   :  { %1848 = vmatprep.subr.mxu1 %v1747_v32  ;;  %v1899_v32 = vld [vmem:[#allocation20 + $0x30] sm:$0xff]  ;;  %1993 = vmatprep.subr.mxu0 %v1900_v29 }
 0x575   :  { %1849 = vmatpush1.msra.mxu1 %v1746_v34  ;;  %v1898_v34 = vld [vmem:[#allocation20 + $0x28] sm:$0xff]  ;;  %1994 = vmatpush1.msra.mxu0 %v1899_v32 }
 0x576   :  { %1850 = vmatprep.subr.mxu1 %v1745_v35  ;;  %v1897_v35 = vld [vmem:[#allocation20 + $0x20] sm:$0xff]  ;;  %1995 = vmatprep.subr.mxu0 %v1898_v34 }
 0x577   :  { %1851 = vmatpush1.msra.mxu1 %v1744_v36  ;;  %v1896_v36 = vld [vmem:[#allocation20 + $0x18] sm:$0xff]  ;;  %1996 = vmatpush1.msra.mxu0 %v1897_v35 }
 0x578   :  { %1852 = vmatprep.subr.mxu1 %v1807_v37  ;;  %v1895_v37 = vld [vmem:[#allocation20 + $0x10] sm:$0xff]  ;;  %1997 = vmatprep.subr.mxu0 %v1896_v36 }
 0x579   :  { %1853 = vmatpush2.msra.mxu1 %v1806_v38  ;;  %v1894_v38 = vld [vmem:[#allocation20 + $0x8] sm:$0xff]  ;;  %1998 = vmatpush1.msra.mxu0 %v1895_v37 }
 0x57a   :  { %1854 = vmatprep.subr.mxu1 %v1805_v39  ;;  %v1893_v39 = vld [vmem:[#allocation20] sm:$0xff]  ;;  %1999 = vmatprep.subr.mxu0 %v1894_v38 }
 0x57b   :  { %1855 = vmatpush2.msra.mxu1 %v1804_v40  ;;  %v1956_v40 = vld [vmem:[#allocation20 + $0x1f8] sm:$0xff]  ;;  %2000 = vmatpush1.msra.mxu0 %v1893_v39 }
 0x57c   :  { %1856 = vmatprep.subr.mxu1 %v1803_v41  ;;  %v1955_v41 = vld [vmem:[#allocation20 + $0x1f0] sm:$0xff]  ;;  %2001 = vmatprep.subr.mxu0 %v1956_v40 }
 0x57d   :  { %1857 = vmatpush2.msra.mxu1 %v1802_v42  ;;  %v1954_v42 = vld [vmem:[#allocation20 + $0x1e8] sm:$0xff]  ;;  %2002 = vmatpush2.msra.mxu0 %v1955_v41 }
 0x57e   :  { %1858 = vmatprep.subr.mxu1 %v1801_v43  ;;  %v1953_v43 = vld [vmem:[#allocation20 + $0x1e0] sm:$0xff]  ;;  %2003 = vmatprep.subr.mxu0 %v1954_v42  ;;  %v2344_v42 = vld [vmem:[#allocation2] sm:$0xff] }
 0x57f   :  { %1859 = vmatpush2.msra.mxu1 %v1800_v44  ;;  %v1952_v44 = vld [vmem:[#allocation20 + $0x1d8] sm:$0xff]  ;;  %2004 = vmatpush2.msra.mxu0 %v1953_v43 }
 0x580   :  { %1860 = vmatprep.subr.mxu1 %v1799_v45  ;;  %v1951_v45 = vld [vmem:[#allocation20 + $0x1d0] sm:$0xff]  ;;  %2005 = vmatprep.subr.mxu0 %v1952_v44 }
 0x581   :  { %1861 = vmatpush2.msra.mxu1 %v1798_v46  ;;  %v1950_v46 = vld [vmem:[#allocation20 + $0x1c8] sm:$0xff]  ;;  %2006 = vmatpush2.msra.mxu0 %v1951_v45  ;;  %v1931_v45 = vld [vmem:[#allocation20 + $0x130] sm:$0xff] }
 0x582   :  { %1862 = vmatprep.subr.mxu1 %v1797_v48  ;;  %v1949_v48 = vld [vmem:[#allocation20 + $0x1c0] sm:$0xff]  ;;  %2007 = vmatprep.subr.mxu0 %v1950_v46  ;;  %v1930_v46 = vld [vmem:[#allocation20 + $0x128] sm:$0xff] }
 0x583   :  { %1863 = vmatpush2.msra.mxu1 %v1796_v49  ;;  %v1948_v49 = vld [vmem:[#allocation20 + $0x1b8] sm:$0xff]  ;;  %2008 = vmatpush2.msra.mxu0 %v1949_v48  ;;  %v1929_v48 = vld [vmem:[#allocation20 + $0x120] sm:$0xff] }
 0x584   :  { %1864 = vmatprep.subr.mxu1 %v1795_v50  ;;  %v1947_v50 = vld [vmem:[#allocation20 + $0x1b0] sm:$0xff]  ;;  %2009 = vmatprep.subr.mxu0 %v1948_v49  ;;  %v1928_v49 = vld [vmem:[#allocation20 + $0x118] sm:$0xff] }
 0x585   :  { %1865 = vmatpush2.msra.mxu1 %v1794_v51  ;;  %v1946_v51 = vld [vmem:[#allocation20 + $0x1a8] sm:$0xff]  ;;  %2010 = vmatpush2.msra.mxu0 %v1947_v50  ;;  %v1927_v50 = vld [vmem:[#allocation20 + $0x110] sm:$0xff] }
 0x586   :  { %1866 = vmatprep.subr.mxu1 %v1793_v52  ;;  %v1945_v52 = vld [vmem:[#allocation20 + $0x1a0] sm:$0xff]  ;;  %2011 = vmatprep.subr.mxu0 %v1946_v51  ;;  %v1926_v51 = vld [vmem:[#allocation20 + $0x108] sm:$0xff] }
 0x587   :  { %1867 = vmatpush2.msra.mxu1 %v1792_v53  ;;  %v1944_v53 = vld [vmem:[#allocation20 + $0x198] sm:$0xff]  ;;  %2012 = vmatpush2.msra.mxu0 %v1945_v52  ;;  %v1925_v52 = vld [vmem:[#allocation20 + $0x100] sm:$0xff] }
 0x588   :  { %1868 = vmatprep.subr.mxu1 %v1791_v55  ;;  %v1943_v55 = vld [vmem:[#allocation20 + $0x190] sm:$0xff]  ;;  %2013 = vmatprep.subr.mxu0 %v1944_v53  ;;  %v2073_v53 = vld [vmem:[#allocation22 + $0xf8] sm:$0xff] }
 0x589   :  { %1869 = vmatpush2.msra.mxu1 %v1790_v56  ;;  %v1942_v56 = vld [vmem:[#allocation20 + $0x188] sm:$0xff]  ;;  %2014 = vmatpush2.msra.mxu0 %v1943_v55  ;;  %v2057_v55 = vld [vmem:[#allocation22 + $0x78] sm:$0xff] }
 0x58a   :  { %1870 = vmatprep.subr.mxu1 %v1789_v57  ;;  %v1941_v57 = vld [vmem:[#allocation20 + $0x180] sm:$0xff]  ;;  %2015 = vmatprep.subr.mxu0 %v1942_v56  ;;  %v2072_v56 = vld [vmem:[#allocation22 + $0xf0] sm:$0xff] }
 0x58b   :  { %1871 = vmatpush2.msra.mxu1 %v1788_v58  ;;  %v1940_v58 = vld [vmem:[#allocation20 + $0x178] sm:$0xff]  ;;  %2016 = vmatpush2.msra.mxu0 %v1941_v57  ;;  %v2056_v57 = vld [vmem:[#allocation22 + $0x70] sm:$0xff] }
 0x58c   :  { %1872 = vmatprep.subr.mxu1 %v1787_v59  ;;  %v1939_v59 = vld [vmem:[#allocation20 + $0x170] sm:$0xff]  ;;  %2017 = vmatprep.subr.mxu0 %v1940_v58  ;;  %v2071_v58 = vld [vmem:[#allocation22 + $0xe8] sm:$0xff] }
 0x58d   :  { %1873 = vmatpush2.msra.mxu1 %v1786_v60  ;;  %v1938_v60 = vld [vmem:[#allocation20 + $0x168] sm:$0xff]  ;;  %2018 = vmatpush2.msra.mxu0 %v1939_v59 }
 0x58e   :  { %1874 = vmatprep.subr.mxu1 %v1785_v61  ;;  %v1937_v61 = vld [vmem:[#allocation20 + $0x160] sm:$0xff]  ;;  %2019 = vmatprep.subr.mxu0 %v1938_v60  ;;  %v2055_v59 = vld [vmem:[#allocation22 + $0x68] sm:$0xff] }
 0x58f   :  { %1875 = vmatpush2.msra.mxu1 %v1784_v62  ;;  %v1936_v62 = vld [vmem:[#allocation20 + $0x158] sm:$0xff]  ;;  %2020 = vmatpush2.msra.mxu0 %v1937_v61  ;;  %v2070_v60 = vld [vmem:[#allocation22 + $0xe0] sm:$0xff] }
 0x590   :  { %1876 = vmatprep.subr.mxu1 %v1783_v63  ;;  %v1935_v63 = vld [vmem:[#allocation20 + $0x150] sm:$0xff]  ;;  %2021 = vmatprep.subr.mxu0 %v1936_v62  ;;  %v2054_v61 = vld [vmem:[#allocation22 + $0x60] sm:$0xff]  ;;  %v2069_v62 = vld [vmem:[#allocation22 + $0xd8] sm:$0xff] }
 0x591   :  { %1877 = vmatpush2.msra.mxu1 %v1782_v1  ;;  %v1934_v1 = vld [vmem:[#allocation20 + $0x148] sm:$0xff]  ;;  %2022 = vmatpush2.msra.mxu0 %v1935_v63  ;;  %v2053_v63 = vld [vmem:[#allocation22 + $0x58] sm:$0xff] }
 0x592   :  { %1878 = vmatprep.subr.mxu1 %v1781_v2  ;;  %v1933_v2 = vld [vmem:[#allocation20 + $0x140] sm:$0xff]  ;;  %2023 = vmatprep.subr.mxu0 %v1934_v1  ;;  %v2068_v1 = vld [vmem:[#allocation22 + $0xd0] sm:$0xff] }
 0x593   :  { %1879 = vmatpush2.msra.mxu1 %v1780_v3  ;;  %2024 = vmatpush2.msra.mxu0 %v1933_v2  ;;  %v1359_v3 = vld [vmem:[%s3049_s22] sm:$0x7]  ;;  %v2052_v2 = vld [vmem:[#allocation22 + $0x50] sm:$0xff] }
 0x594   :  { %1880 = vmatprep.subr.mxu1 %v1779_v4  ;;  %v1368_v16 = vrot.slane %v1359_v3, %v2925_v33  ;;  %v1372_v27 = vrot.slane %v1359_v3, %v1371_v54  ;;  %2025 = vmatprep.subr.mxu0 %v1932_v30 }
 0x595   :  { %1881 = vmatpush2.msra.mxu1 %v1778_v5  ;;  %v1565_v5 = vld [vmem:[%s3051_s24] sm:$0x7]  ;;  %2026 = vmatpush2.msra.mxu0 %v1931_v45 }
 0x596   :  { %1882 = vmatprep.subr.mxu1 %v1777_v6  ;;  %v1570_v8 = vrot.slane %v1565_v5, %v2922_v31  ;;  %v1574_v0 = vrot.slane %v1565_v5, %v2925_v33  ;;  %v1578_v25 = vrot.slane %v1565_v5, %v1371_v54  ;;  %2027 = vmatprep.subr.mxu0 %v1930_v46  ;;  %v2066_v5 = vld [vmem:[#allocation22 + $0xc0] sm:$0xff]  ;;  %v2044_v54 = vld [vmem:[#allocation22 + $0x10] sm:$0xff] }
 0x597   :  { %1883 = vmatpush2.msra.mxu1 %v1776_v7  ;;  %v1364_v7 = vrot.slane %v1359_v3, %v2922_v31  ;;  %2028 = vmatpush2.msra.mxu0 %v1929_v48  ;;  %v2067_v3 = vld [vmem:[#allocation22 + $0xc8] sm:$0xff] }
 0x598   :  { %2029 = vmatprep.subr.mxu0 %v1928_v49  ;;  %2235 = vmatprep.subr.mxu1 %v2073_v53 }
 0x599   :  { %2030 = vmatpush2.msra.mxu0 %v1927_v50 }
 0x59a   :  { %2031 = vmatprep.subr.mxu0 %v1926_v51 }
 0x59b   :  { %2032 = vmatpush2.msra.mxu0 %v1925_v52 }
 0x5f6   :  { %v1442_v4 = vpop.f32.mrf.mxu1  ;;  %v2215_v6 = vpop.f32.mrf.mxu0 }
 0x5f7   :  { %v1443_v13 = vadd.f32 %v1442_v4, %v1364_v7  ;;  %v2051_v4 = vld [vmem:[#allocation22 + $0x48] sm:$0xff]  ;;  %v2065_v7 = vld [vmem:[#allocation22 + $0xb8] sm:$0xff] }
 0x5f8   :  { %v1444_v10 = vpop.f32.mrf.mxu1  ;;  %v2216_v11 = vpop.f32.mrf.mxu0 }
 0x5f9   :  { %v1445_v21 = vadd.f32 %v1444_v10, %v1368_v16  ;;  %v2217_v28 = vadd.f32 %v2216_v11, %v2215_v6  ;;  %v2050_v6 = vld [vmem:[#allocation22 + $0x40] sm:$0xff]  ;;  %v2064_v10 = vld [vmem:[#allocation22 + $0xb0] sm:$0xff] }
 0x5fa   :  { %v2048_v11 = vld [vmem:[#allocation22 + $0x30] sm:$0xff] }
 0x5fb   :  { %v1514_v35 = vadd.f32 %v2217_v28, %v1372_v27  ;;  %v2058_v27 = vld [vmem:[#allocation22 + $0x80] sm:$0xff] }
 0x5fc   :  { %v2042_v28 = vld [vmem:[#allocation22] sm:$0xff] }
 0x616   :  { %v1648_v12 = vpop.f32.mrf.mxu1 }
 0x617   :  { %v1649_v14 = vadd.f32 %v1648_v12, %v1570_v8  ;;  %v2049_v8 = vld [vmem:[#allocation22 + $0x38] sm:$0xff]  ;;  %v2063_v12 = vld [vmem:[#allocation22 + $0xa8] sm:$0xff] }
 0x618   :  { %v1650_v47 = vpop.f32.mrf.mxu1  ;;  %v1719_v15 = vpop.f32.mrf.mxu0 }
 0x619   :  { %v1723_v17 = vadd.f32 %v1649_v14, %v1443_v13  ;;  %v1651_v20 = vadd.f32 %v1650_v47, %v1574_v0  ;;  %v1720_v32 = vadd.f32 %v1719_v15, %v1578_v25  ;;  %v2047_v13 = vld [vmem:[#allocation22 + $0x28] sm:$0xff]  ;;  %v2062_v14 = vld [vmem:[#allocation22 + $0xa0] sm:$0xff] }
 0x61a   :  { %v2304_v18 = vpop.f32.mrf.mxu0  ;;  %v2046_v0 = vld [vmem:[#allocation22 + $0x20] sm:$0xff]  ;;  %v1808_v47 = vld [vmem:[%s3043_s16] sm:$0x3] }
 0x61b   :  { %v2180_v19 = vmul.f32 -1.442695, %v1723_v17  ;;  %v1730_v22 = vadd.f32 %v1651_v20, %v1445_v21  ;;  %v1813_v15 = vrot.slane %v1808_v47, %v2922_v31  ;;  %v1817_v16 = vrot.slane %v1808_v47, %v2925_v33  ;;  %v2059_v25 = vld [vmem:[#allocation22 + $0x88] sm:$0xff] }
 0x61d   :  { %2333 = vpow2.f32 %v2180_v19  ;;  %v2181_v23 = vmul.f32 -1.442695, %v1730_v22 }
 0x61f   :  { %2335 = vpow2.f32 %v2181_v23  ;;  %v2061_v23 = vld [vmem:[#allocation22 + $0x98] sm:$0xff] }
 0x62a   :  { %v2334_v24 = vpop.eup %2333 }
 0x62b   :  { %v1727_v9 = vadd.f32 1.0, %v2334_v24  ;;  %v2045_v24 = vld [vmem:[#allocation22 + $0x18] sm:$0xff] }
 0x62c   :  { %v2336_v26 = vpop.eup %2335 }
 0x62d   :  { %2337 = vrcp.f32 %v1727_v9  ;;  %v1734_v29 = vadd.f32 1.0, %v2336_v26  ;;  %v2060_v9 = vld [vmem:[#allocation22 + $0x90] sm:$0xff]  ;;  %v2043_v26 = vld [vmem:[#allocation22 + $0x8] sm:$0xff] }
 0x62f   :  { %2339 = vrcp.f32 %v1734_v29  ;;  %v1957_v29 = vld [vmem:[%s3045_s18] sm:$0x3]  ;;  %s2164_s18 = sshll.u32 %s2706_s13, 4  ;;  %s2165_s18 = int_to_ptr.vmem [resolvable:$true] %s2164_s18 }
 0x630   :  { %s2645_s29 = scalar_lea.vmem %s2165_s18, 896  ;;  %p2650_p6 = scmp.lt.s32.totalorder %s2165_s18, %s2165_s18 }
 0x631   :  { %p2646_p5 = scmp.ne.s32.totalorder %s2165_s18, %s2645_s29  ;;  %p2651_p7 = scmp.lt.s32.totalorder %s2645_s29, %s2645_s29 }
 0x633   :  { %p2652_p8 = por %p2651_p7, %p2650_p6 }
 0x635   :  { %p2653_p9 = pnand %p2652_p8, %p2646_p5 }
 0x63a   :  { %v2338_v34 = vpop.eup %2337 }
 0x63b   :  { %v1737_v36 = vmul.f32 %v2338_v34, %v1720_v32  ;;  %v1962_v32 = vrot.slane %v1957_v29, %v2922_v31  ;;  %v1966_v34 = vrot.slane %v1957_v29, %v2925_v33 }
 0x63c   :  { %v2340_v38 = vpop.eup %2339 }
 0x63d   :  { %v1738_v37 = vadd.f32 %v1737_v36, %v1514_v35  ;;  %v1740_v39 = vsub.f32 1.0, %v2340_v38  ;;  %v1742_v43 = vmul.f32 %v2344_v42, %v2340_v38  ;;  %v2182_v42 = vld [vmem:[%s3047_s20] ss:$0 sm:$0xff] }
 0x63f   :  { %2341 = vtanh.f32 %v1738_v37 }
 0x64c   :  { %v2342_v40 = vpop.eup %2341 }
 0x64d   :  { %v1741_v41 = vmul.f32 %v2342_v40, %v1740_v39 }
 0x64f   :  { %v1743_v44 = vadd.f32 %v1742_v43, %v1741_v41 }
 0x651   :  { %1885 = vmatmul.mubr.f32.vlgmr.msra.gmra.mxu1 %v1743_v44  ;;  %2156 = vst [vmem:[#allocation26 + $0x28] sm:$0xff] %v1743_v44 }
 0x652   :  { %2236 = vmatpush3.msra.mxu1 %v2057_v55 }
 0x653   :  { %2237 = vmatprep.subr.mxu1 %v2072_v56 }
 0x654   :  { %2238 = vmatpush3.msra.mxu1 %v2056_v57 }
 0x655   :  { %2239 = vmatprep.subr.mxu1 %v2071_v58 }
 0x656   :  { %2240 = vmatpush3.msra.mxu1 %v2055_v59 }
 0x657   :  { %2241 = vmatprep.subr.mxu1 %v2070_v60 }
 0x658   :  { %2242 = vmatpush3.msra.mxu1 %v2054_v61 }
 0x659   :  { %2243 = vmatprep.subr.mxu1 %v2069_v62 }
 0x65a   :  { %2244 = vmatpush3.msra.mxu1 %v2053_v63 }
 0x65b   :  { %2245 = vmatprep.subr.mxu1 %v2068_v1 }
 0x65c   :  { %2246 = vmatpush3.msra.mxu1 %v2052_v2 }
 0x65d   :  { %2247 = vmatprep.subr.mxu1 %v2067_v3 }
 0x65e   :  { %2248 = vmatpush3.msra.mxu1 %v2051_v4 }
 0x65f   :  { %2249 = vmatprep.subr.mxu1 %v2066_v5 }
 0x660   :  { %2250 = vmatpush3.msra.mxu1 %v2050_v6 }
 0x661   :  { %2251 = vmatprep.subr.mxu1 %v2065_v7 }
 0x662   :  { %2252 = vmatpush3.msra.mxu1 %v2049_v8 }
 0x663   :  { %2253 = vmatprep.subr.mxu1 %v2064_v10 }
 0x664   :  { %2254 = vmatpush3.msra.mxu1 %v2048_v11 }
 0x665   :  { %2255 = vmatprep.subr.mxu1 %v2063_v12 }
 0x666   :  { %2256 = vmatpush3.msra.mxu1 %v2047_v13 }
 0x667   :  { %2257 = vmatprep.subr.mxu1 %v2062_v14 }
 0x668   :  { %2258 = vmatpush3.msra.mxu1 %v2046_v0 }
 0x669   :  { %2259 = vmatprep.subr.mxu1 %v2061_v23 }
 0x66a   :  { %2260 = vmatpush3.msra.mxu1 %v2045_v24 }
 0x66b   :  { %2261 = vmatprep.subr.mxu1 %v2060_v9 }
 0x66c   :  { %2262 = vmatpush3.msra.mxu1 %v2044_v54 }
 0x66d   :  { %2263 = vmatprep.subr.mxu1 %v2059_v25 }
 0x66e   :  { %2264 = vmatpush3.msra.mxu1 %v2043_v26 }
 0x66f   :  { %2265 = vmatprep.subr.mxu1 %v2058_v27 }
 0x670   :  { %2266 = vmatpush3.msra.mxu1 %v2042_v28 }
 0x711   :  { %v1886_v17 = vpop.f32.mrf.mxu1 }
 0x712   :  { %v1887_v18 = vadd.f32 %v1886_v17, %v1813_v15 }
 0x713   :  { %v1888_v19 = vpop.f32.mrf.mxu1 }
 0x714   :  { %v1889_v20 = vadd.f32 %v1888_v19, %v1817_v16  ;;  %v1891_v22 = vmax.f32 %v1887_v18, 0.0 }
 0x716   :  { %v1892_v21 = vmax.f32 %v1889_v20, 0.0 }
 0x718   :  { %2033 = vmatprep.mubr.f32.mxu0 %v1892_v21 }
 0x719   :  { %2034 = vmatmul.mubr.f32.vlgmr.msra.gmra.mxu0 %v1891_v22 }
 0x7d9   :  { %v2035_v35 = vpop.f32.mrf.mxu0 }
 0x7da   :  { %v2036_v36 = vadd.f32 %v2035_v35, %v1962_v32 }
 0x7db   :  { %v2037_v37 = vpop.f32.mrf.mxu0 }
 0x7dc   :  { %v2038_v38 = vadd.f32 %v2037_v37, %v1966_v34  ;;  %v2040_v40 = vmax.f32 %v2036_v36, 0.0 }
 0x7de   :  { %v2041_v39 = vmax.f32 %v2038_v38, 0.0 }
 0x7e0   :  { %2145 = vmatprep.mubr.f32.mxu1 %v2041_v39 }
 0x7e1   :  { %2146 = vmatmul.mubr.f32.vlgmr.msra.gmra.mxu1 %v2040_v40 }
 0x8a1   :  { %v2267_v41 = vpop.f32.mrf.mxu1 }
 0x8a3   :  { %v2268_v43 = vpop.f32.mrf.mxu1 }
 0x8a4   :  { %v2269_v44 = vadd.f32 %v2268_v43, %v2267_v41 }
 0x8a6   :  { %v2148_v31 = vadd.f32 %v2269_v44, %v2182_v42 }
 0x8a8   :  { %2157 = vst [vmem:[#allocation26 + $0x30] sm:$0xff] %v2148_v31 }
 0x8a9   :  { %2656 = shalt.err (!%p2653_p9)
}
 0x8aa   :  { %2167 = dma.vmem_to_hbm [thread:$0]  %s2165_s18, 896, %s3052_s25, [#allocation4]  }
 0x8ab   :  { %2681 = dma.done.wait [#allocation4], 896  }
 0x8ac   :  { %2682 = vsyncadd [#allocation4], 4294966400 }
 0x8ad   :  { %2171 = vsyncpa [#allocation3], 1 }
 0x8ae   :  { %2172 = vsyncpa [#allocation6], 1 }
 0x8af   :  { %2173 = vsyncpa [#allocation9], 1 }
 0x8b0   :  { %2174 = vsyncpa [#allocation12], 1 }
 0x8b1   :  { %2175 = vsyncpa [#allocation15], 1 }
 0x8b2   :  { %2176 = vsyncpa [#allocation18], 1 }
 0x8b3   :  { %2177 = vsyncpa [#allocation21], 1 }
 0x8b4   :  { %2178 = vsyncpa [#allocation24], 1 }
 0x8b5   :  { %2179 = vsyncpa [#allocation4], 1 }

</bundles_post_ra>
